<compile_context>
chip_gen: v5e
topology: v5e:2x2
jax: 0.10.0
libtpu: 0.0.40
codegen_flags: <defaults>
</compile_context>

<pallas_src>
import functools

import jax
import jax.numpy as jnp
from jax import lax
from jax.experimental import pallas as pl
from jax.experimental.pallas import tpu as pltpu


def _round_up(x, m):
    return ((x + m - 1) // m) * m


# ----------------------------------------------------------------------------
# Pallas kernel: direct conv (K*K shifted bf16 matmuls, f32 accumulation)
#                + folded-BN bias + optional residual + ReLU / PReLU epilogue.
# ----------------------------------------------------------------------------
def _conv_bn_act_kernel(x_ref, w_ref, bias_ref, *rest,
                        ksize, stride, Ho, Wo, Wq, M,
                        nonlin, has_alpha, has_res):
    # x_ref : (1, P, Hq*Wq, Cin) bf16   phase-split, padded, flattened input
    # w_ref : (K*K, Cin, Cout)   bf16   BN-scale-folded weights
    # bias  : (1, Cout)          f32    folded BN bias
    # rest  : [alpha_ref] [res_ref] o_ref y_scratch
    idx = 0
    alpha_ref = None
    res_ref = None
    if has_alpha:
        alpha_ref = rest[idx]
        idx += 1
    if has_res:
        res_ref = rest[idx]
        idx += 1
    o_ref = rest[idx]            # (1, Ho, Wo, Cout)
    y_ref = rest[idx + 1]        # (M, Cout) f32 VMEM scratch

    s = stride
    acc = None
    for ki in range(ksize):
        for kj in range(ksize):
            t = ki * ksize + kj
            ph = (ki % s) * s + (kj % s)                 # phase (space-to-depth)
            off = (ki // s) * Wq + (kj // s)             # within-phase shift
            xt = x_ref[0, ph, pl.ds(off, M), :]          # (M, Cin) bf16
            d = jnp.dot(xt, w_ref[t], preferred_element_type=jnp.float32)
            acc = d if acc is None else acc + d

    # Folded-BN bias in one vectorized pass over the whole accumulator.
    y = acc + bias_ref[...]
    # Without a residual, the activation commutes with row packing: apply it
    # to the full (M, Cout) block and keep the row loop store-only.
    if not has_res:
        if nonlin == 'relu':
            y = jnp.maximum(y, 0.0)
        elif nonlin == 'prelu':
            y = jnp.where(y >= 0.0, y, alpha_ref[...] * y)
    y_ref[...] = y

    # Hoist the PReLU alpha broadcast for the residual path out of the loop
    # (JAX does not CSE broadcast_in_dim; do it once, not once per row).
    alpha_b = None
    if has_res and nonlin == 'prelu':
        alpha_b = pl.broadcast_to(alpha_ref[...], (Wo, alpha_ref.shape[-1]))

    def row_body(ho, carry):
        start = pl.multiple_of(ho * Wq, 8)               # Wq is 8-aligned
        r = y_ref[pl.ds(start, Wo), :]                   # (Wo, Cout) f32
        if has_res:
            r = r + res_ref[0, ho, :, :].astype(jnp.float32)
            if nonlin == 'relu':
                r = jnp.maximum(r, 0.0)
            elif nonlin == 'prelu':
                r = jnp.where(r >= 0.0, r, alpha_b * r)
        o_ref[0, ho, :, :] = r.astype(o_ref.dtype)
        return carry

    # Ho per grid step is small here; full unroll gives the scheduler the
    # whole epilogue.  Fall back to a rolled loop for large spatial extents.
    lax.fori_loop(0, Ho, row_body, 0, unroll=(Ho <= 64))


# ----------------------------------------------------------------------------
# Wrapper: pad + space-to-depth phase split (one fused input-sized copy),
#          BN folding, and the pallas_call.
# ----------------------------------------------------------------------------
def _prep_input(x, ksize, stride, padding):
    """(N, H, W, C) -> (N, s*s, Hq*Wq, C) bf16 phase-split padded input."""
    N, H, W, C = x.shape
    s = stride
    Ho = (H + 2 * padding - ksize) // s + 1
    Wo = (W + 2 * padding - ksize) // s + 1
    qmax = (ksize - 1) // s
    Hq = Ho + qmax
    Wq = _round_up(Wo + qmax, 8)          # 8-aligned rows for the epilogue loads
    pad_b = Hq * s - H - padding
    pad_r = Wq * s - W - padding
    xp = jnp.pad(x, ((0, 0), (padding, pad_b), (padding, pad_r), (0, 0)))
    xph = xp.reshape(N, Hq, s, Wq, s, C)
    xph = jnp.transpose(xph, (0, 2, 4, 1, 3, 5))         # (N, s, s, Hq, Wq, C)
    xph = xph.reshape(N, s * s, Hq * Wq, C)
    if ksize == 1:
        xph = xph[:, :1]                                 # only phase (0,0) used
    return xph.astype(jnp.bfloat16), (Ho, Wo, Hq, Wq)


def conv_bn_act(x, w, gamma, beta, mean, var, *, stride, padding, ksize,
                nonlin='identity', alpha=None, residual=None,
                out_dtype=jnp.float32, eps=1e-5):
    """x: NHWC, w: PyTorch OIHW conv weight.  Fused conv + BN (+res) (+act)."""
    N, H, W, Cin = x.shape
    Cout = w.shape[0]

    xph, (Ho, Wo, Hq, Wq) = _prep_input(x, ksize, stride, padding)
    P, L = xph.shape[1], xph.shape[2]
    M = (Ho - 1) * Wq + Wo                               # flattened GEMM rows

    # Fold eval-mode BatchNorm: y = conv(x, w*scale) + bias
    scale = gamma / jnp.sqrt(var + eps)
    bias = (beta - mean * scale).reshape(1, Cout).astype(jnp.float32)
    w_mat = jnp.transpose(w, (2, 3, 1, 0)).reshape(ksize * ksize, Cin, Cout)
    w_mat = (w_mat * scale[None, None, :]).astype(jnp.bfloat16)

    has_alpha = (nonlin == 'prelu')
    has_res = residual is not None

    args = [xph, w_mat, bias]
    in_specs = [
        pl.BlockSpec((1, P, L, Cin), lambda n: (n, 0, 0, 0)),
        pl.BlockSpec((ksize * ksize, Cin, Cout), lambda n: (0, 0, 0)),
        pl.BlockSpec((1, Cout), lambda n: (0, 0)),
    ]
    if has_alpha:
        args.append(alpha.reshape(1, Cout).astype(jnp.float32))
        in_specs.append(pl.BlockSpec((1, Cout), lambda n: (0, 0)))
    if has_res:
        args.append(residual.astype(jnp.bfloat16))
        in_specs.append(pl.BlockSpec((1, Ho, Wo, Cout), lambda n: (n, 0, 0, 0)))

    kernel = functools.partial(
        _conv_bn_act_kernel, ksize=ksize, stride=stride,
        Ho=Ho, Wo=Wo, Wq=Wq, M=M, nonlin=nonlin,
        has_alpha=has_alpha, has_res=has_res)

    return pl.pallas_call(
        kernel,
        out_shape=jax.ShapeDtypeStruct((N, Ho, Wo, Cout), out_dtype),
        grid=(N,),
        in_specs=in_specs,
        out_specs=pl.BlockSpec((1, Ho, Wo, Cout), lambda n: (n, 0, 0, 0)),
        scratch_shapes=[pltpu.VMEM((M, Cout), jnp.float32)],
        compiler_params=pltpu.CompilerParams(
            dimension_semantics=("parallel",)),
    )(*args)


# ----------------------------------------------------------------------------
# RegularBasicBlock forward
# ----------------------------------------------------------------------------
def regular_basic_block(x_nhwc, p, nonlins, stride):
    """Forward of RegularBasicBlock.  x_nhwc: [N, H, W, in_planes]."""
    in_planes = x_nhwc.shape[-1]
    planes = p['w1'].shape[0]

    # conv1 -> bn1 -> nonlin1   (one fused Pallas kernel), bf16 inter-layer act
    out1 = conv_bn_act(x_nhwc, p['w1'], p['g1'], p['b1'], p['m1'], p['v1'],
                       stride=stride, padding=1, ksize=3,
                       nonlin=nonlins[0], alpha=p.get('alpha1'),
                       out_dtype=jnp.bfloat16)

    # shortcut (projection 1x1 conv+bn fused, stride handled inside the kernel)
    if stride != 1 or in_planes != planes:
        sc = conv_bn_act(x_nhwc, p['ws'], p['gs'], p['bs'], p['ms'], p['vs'],
                         stride=stride, padding=0, ksize=1,
                         nonlin='identity', out_dtype=jnp.bfloat16)
    else:
        sc = x_nhwc.astype(jnp.bfloat16)

    # conv2 -> bn2 -> (+shortcut) -> nonlin2   (one fused Pallas kernel)
    out2 = conv_bn_act(out1, p['w2'], p['g2'], p['b2'], p['m2'], p['v2'],
                       stride=1, padding=1, ksize=3,
                       nonlin=nonlins[1], alpha=p.get('alpha2'),
                       residual=sc, out_dtype=jnp.float32)
    return out2


# ----------------------------------------------------------------------------
# Pure-JAX f32 reference (matches PyTorch NCHW semantics, eval-mode BN)
# ----------------------------------------------------------------------------
def ref_block(x_nchw, p, nonlins, stride, eps=1e-5):
    def bn(y, g, b, m, v):
        c = lambda a: a[None, :, None, None]
        return (y - c(m)) / jnp.sqrt(c(v) + eps) * c(g) + c(b)

    def act(y, kind, a=None):
        if kind == 'relu':
            return jnp.maximum(y, 0.0)
        if kind == 'prelu':
            return jnp.where(y >= 0.0, y, a[None, :, None, None] * y)
        return y

    def conv(xx, w, s, pad):
        return jax.lax.conv_general_dilated(
            xx, w, (s, s), ((pad, pad), (pad, pad)),
            dimension_numbers=('NCHW', 'OIHW', 'NCHW'))

    in_planes, planes = p['w1'].shape[1], p['w1'].shape[0]
    out = act(bn(conv(x_nchw, p['w1'], stride, 1),
                 p['g1'], p['b1'], p['m1'], p['v1']),
              nonlins[0], p.get('alpha1'))
    out = bn(conv(out, p['w2'], 1, 1), p['g2'], p['b2'], p['m2'], p['v2'])
    if stride != 1 or in_planes != planes:
        sc = bn(conv(x_nchw, p['ws'], stride, 0),
                p['gs'], p['bs'], p['ms'], p['vs'])
    else:
        sc = x_nchw
    return act(out + sc, nonlins[1], p.get('alpha2'))


# ----------------------------------------------------------------------------
if __name__ == "__main__":
    key = jax.random.PRNGKey(0)
    N, Cin, H, W = 2, 4, 16, 16
    planes, stride = 8, 2
    nonlins = ('prelu', 'relu')          # nonlin1 = PReLU(planes), nonlin2 = ReLU

    ks = jax.random.split(key, 20)
    u = lambda k, s: jax.random.uniform(k, s, jnp.float32, 0.5, 1.5)
    nrm = lambda k, s, sc=0.1: jax.random.normal(k, s, jnp.float32) * sc

    p = {
        'w1': nrm(ks[0], (planes, Cin, 3, 3)),
        'g1': u(ks[1], (planes,)), 'b1': nrm(ks[2], (planes,)),
        'm1': nrm(ks[3], (planes,)), 'v1': u(ks[4], (planes,)),
        'alpha1': jnp.full((planes,), 0.25, jnp.float32),

        'w2': nrm(ks[5], (planes, planes, 3, 3)),
        'g2': u(ks[6], (planes,)), 'b2': nrm(ks[7], (planes,)),
        'm2': nrm(ks[8], (planes,)), 'v2': u(ks[9], (planes,)),

        'ws': nrm(ks[10], (planes, Cin, 1, 1)),
        'gs': u(ks[11], (planes,)), 'bs': nrm(ks[12], (planes,)),
        'ms': nrm(ks[13], (planes,)), 'vs': u(ks[14], (planes,)),
    }

    x_nchw = jax.random.normal(ks[15], (N, Cin, H, W), jnp.float32)
    x_nhwc = jnp.transpose(x_nchw, (0, 2, 3, 1))

    fwd = jax.jit(regular_basic_block, static_argnames=('nonlins', 'stride'))
    out_nhwc = fwd(x_nhwc, p, nonlins=nonlins, stride=stride)
    out_nchw = jnp.transpose(out_nhwc, (0, 3, 1, 2))
    jax.block_until_ready(out_nchw)

    ref = ref_block(x_nchw, p, nonlins, stride)
    assert out_nchw.shape == ref.shape
    # bf16 MXU inputs + bf16 inter-layer activations -> loose tolerance vs f32 ref.
    assert jnp.allclose(out_nchw, ref, atol=2e-1, rtol=1e-1), \
        float(jnp.max(jnp.abs(out_nchw - ref)))

    print("KERNEL_OK")
</pallas_src>

<mosaic_0001>
module attributes {stable_mosaic.version = 11 : i64} {
  func.func @_conv_bn_act_kernel(%arg0: i32, %arg1: memref<1x1x64x4xbf16, #tpu.memory_space<vmem>>, %arg2: memref<1x4x8xbf16, #tpu.memory_space<vmem>>, %arg3: memref<1x8xf32, #tpu.memory_space<vmem>>, %arg4: memref<1x8x8x8xbf16, #tpu.memory_space<vmem>>, %arg5: memref<64x8xf32, #tpu.memory_space<vmem>>) attributes {dimension_semantics = [#tpu.dimension_semantics<parallel>], iteration_bounds = array<i64: 2>, scalar_prefetch = 0 : i64, scratch_operands = 1 : i64, tpu.core_type = #tpu.core_type<tc>, window_params = [{transform_indices = @transform_0, window_bounds = array<i64: 1, 1, 64, 4>}, {pipeline_mode = #tpu.pipeline_mode<synchronous>, transform_indices = @transform_1, window_bounds = array<i64: 1, 4, 8>}, {pipeline_mode = #tpu.pipeline_mode<synchronous>, transform_indices = @transform_2, window_bounds = array<i64: 1, 8>}, {transform_indices = @transform_3, window_bounds = array<i64: 1, 8, 8, 8>}]} {
    %c0 = arith.constant 0 : index
    %c0_0 = arith.constant 0 : index
    %c0_1 = arith.constant 0 : index
    %c0_2 = arith.constant 0 : index
    %0 = vector.load %arg1[%c0, %c0_0, %c0_1, %c0_2] : memref<1x1x64x4xbf16, #tpu.memory_space<vmem>>, vector<1x1x64x4xbf16>
    %1 = vector.shape_cast %0 : vector<1x1x64x4xbf16> to vector<64x4xbf16>
    %c0_3 = arith.constant 0 : index
    %c0_4 = arith.constant 0 : index
    %c0_5 = arith.constant 0 : index
    %2 = vector.load %arg2[%c0_3, %c0_4, %c0_5] : memref<1x4x8xbf16, #tpu.memory_space<vmem>>, vector<1x4x8xbf16>
    %3 = vector.shape_cast %2 : vector<1x4x8xbf16> to vector<4x8xbf16>
    %cst = arith.constant dense<0.000000e+00> : vector<64x8xf32>
    %4 = tpu.matmul %1, %3, %cst {dimension_numbers = #tpu.dot_dimension_numbers<[1], [0], [0], [1], [0, 0, 1, 1], [], []>} : vector<64x4xbf16>, vector<4x8xbf16>, vector<64x8xf32> -> vector<64x8xf32>
    %c0_6 = arith.constant 0 : index
    %c0_7 = arith.constant 0 : index
    %5 = vector.load %arg3[%c0_6, %c0_7] : memref<1x8xf32, #tpu.memory_space<vmem>>, vector<1x8xf32>
    %6 = vector.broadcast %5 : vector<1x8xf32> to vector<64x8xf32>
    %7 = arith.addf %4, %6 : vector<64x8xf32>
    %c0_8 = arith.constant 0 : index
    %c0_9 = arith.constant 0 : index
    %8 = vector.load %arg5[%c0_8, %c0_9] : memref<64x8xf32, #tpu.memory_space<vmem>>, vector<64x8xf32>
    tpu.vector_store %arg5[%c0_8, %c0_9], %7 {strides = array<i32>} : memref<64x8xf32, #tpu.memory_space<vmem>>, vector<64x8xf32>,
    %c0_i32 = arith.constant 0 : i32
    %c8_i32 = arith.constant 8 : i32
    %9 = arith.muli %c0_i32, %c8_i32 : i32
    %10 = tpu.assume_multiple %9, 8 : i32
    %11 = arith.index_cast %10 : i32 to index
    %c0_10 = arith.constant 0 : index
    %12 = vector.load %arg5[%11, %c0_10] : memref<64x8xf32, #tpu.memory_space<vmem>>, vector<8x8xf32>
    %13 = arith.truncf %12 : vector<8x8xf32> to vector<8x8xbf16>
    %c0_11 = arith.constant 0 : index
    %14 = arith.index_cast %c0_i32 : i32 to index
    %c0_12 = arith.constant 0 : index
    %c0_13 = arith.constant 0 : index
    %15 = vector.load %arg4[%c0_11, %14, %c0_12, %c0_13] : memref<1x8x8x8xbf16, #tpu.memory_space<vmem>>, vector<1x1x8x8xbf16>
    %16 = vector.shape_cast %15 : vector<1x1x8x8xbf16> to vector<8x8xbf16>
    %17 = vector.shape_cast %13 : vector<8x8xbf16> to vector<1x1x8x8xbf16>
    tpu.vector_store %arg4[%c0_11, %14, %c0_12, %c0_13], %17 {strides = array<i32>} : memref<1x8x8x8xbf16, #tpu.memory_space<vmem>>, vector<1x1x8x8xbf16>,
    %c1_i32 = arith.constant 1 : i32
    %c8_i32_14 = arith.constant 8 : i32
    %18 = arith.muli %c1_i32, %c8_i32_14 : i32
    %19 = tpu.assume_multiple %18, 8 : i32
    %20 = arith.index_cast %19 : i32 to index
    %c0_15 = arith.constant 0 : index
    %21 = vector.load %arg5[%20, %c0_15] : memref<64x8xf32, #tpu.memory_space<vmem>>, vector<8x8xf32>
    %22 = arith.truncf %21 : vector<8x8xf32> to vector<8x8xbf16>
    %c0_16 = arith.constant 0 : index
    %23 = arith.index_cast %c1_i32 : i32 to index
    %c0_17 = arith.constant 0 : index
    %c0_18 = arith.constant 0 : index
    %24 = vector.load %arg4[%c0_16, %23, %c0_17, %c0_18] : memref<1x8x8x8xbf16, #tpu.memory_space<vmem>>, vector<1x1x8x8xbf16>
    %25 = vector.shape_cast %24 : vector<1x1x8x8xbf16> to vector<8x8xbf16>
    %26 = vector.shape_cast %22 : vector<8x8xbf16> to vector<1x1x8x8xbf16>
    tpu.vector_store %arg4[%c0_16, %23, %c0_17, %c0_18], %26 {strides = array<i32>} : memref<1x8x8x8xbf16, #tpu.memory_space<vmem>>, vector<1x1x8x8xbf16>,
    %c2_i32 = arith.constant 2 : i32
    %c8_i32_19 = arith.constant 8 : i32
    %27 = arith.muli %c2_i32, %c8_i32_19 : i32
    %28 = tpu.assume_multiple %27, 8 : i32
    %29 = arith.index_cast %28 : i32 to index
    %c0_20 = arith.constant 0 : index
    %30 = vector.load %arg5[%29, %c0_20] : memref<64x8xf32, #tpu.memory_space<vmem>>, vector<8x8xf32>
    %31 = arith.truncf %30 : vector<8x8xf32> to vector<8x8xbf16>
    %c0_21 = arith.constant 0 : index
    %32 = arith.index_cast %c2_i32 : i32 to index
    %c0_22 = arith.constant 0 : index
    %c0_23 = arith.constant 0 : index
    %33 = vector.load %arg4[%c0_21, %32, %c0_22, %c0_23] : memref<1x8x8x8xbf16, #tpu.memory_space<vmem>>, vector<1x1x8x8xbf16>
    %34 = vector.shape_cast %33 : vector<1x1x8x8xbf16> to vector<8x8xbf16>
    %35 = vector.shape_cast %31 : vector<8x8xbf16> to vector<1x1x8x8xbf16>
    tpu.vector_store %arg4[%c0_21, %32, %c0_22, %c0_23], %35 {strides = array<i32>} : memref<1x8x8x8xbf16, #tpu.memory_space<vmem>>, vector<1x1x8x8xbf16>,
    %c3_i32 = arith.constant 3 : i32
    %c8_i32_24 = arith.constant 8 : i32
    %36 = arith.muli %c3_i32, %c8_i32_24 : i32
    %37 = tpu.assume_multiple %36, 8 : i32
    %38 = arith.index_cast %37 : i32 to index
    %c0_25 = arith.constant 0 : index
    %39 = vector.load %arg5[%38, %c0_25] : memref<64x8xf32, #tpu.memory_space<vmem>>, vector<8x8xf32>
    %40 = arith.truncf %39 : vector<8x8xf32> to vector<8x8xbf16>
    %c0_26 = arith.constant 0 : index
    %41 = arith.index_cast %c3_i32 : i32 to index
    %c0_27 = arith.constant 0 : index
    %c0_28 = arith.constant 0 : index
    %42 = vector.load %arg4[%c0_26, %41, %c0_27, %c0_28] : memref<1x8x8x8xbf16, #tpu.memory_space<vmem>>, vector<1x1x8x8xbf16>
    %43 = vector.shape_cast %42 : vector<1x1x8x8xbf16> to vector<8x8xbf16>
    %44 = vector.shape_cast %40 : vector<8x8xbf16> to vector<1x1x8x8xbf16>
    tpu.vector_store %arg4[%c0_26, %41, %c0_27, %c0_28], %44 {strides = array<i32>} : memref<1x8x8x8xbf16, #tpu.memory_space<vmem>>, vector<1x1x8x8xbf16>,
    %c4_i32 = arith.constant 4 : i32
    %c8_i32_29 = arith.constant 8 : i32
    %45 = arith.muli %c4_i32, %c8_i32_29 : i32
    %46 = tpu.assume_multiple %45, 8 : i32
    %47 = arith.index_cast %46 : i32 to index
    %c0_30 = arith.constant 0 : index
    %48 = vector.load %arg5[%47, %c0_30] : memref<64x8xf32, #tpu.memory_space<vmem>>, vector<8x8xf32>
    %49 = arith.truncf %48 : vector<8x8xf32> to vector<8x8xbf16>
    %c0_31 = arith.constant 0 : index
    %50 = arith.index_cast %c4_i32 : i32 to index
    %c0_32 = arith.constant 0 : index
    %c0_33 = arith.constant 0 : index
    %51 = vector.load %arg4[%c0_31, %50, %c0_32, %c0_33] : memref<1x8x8x8xbf16, #tpu.memory_space<vmem>>, vector<1x1x8x8xbf16>
    %52 = vector.shape_cast %51 : vector<1x1x8x8xbf16> to vector<8x8xbf16>
    %53 = vector.shape_cast %49 : vector<8x8xbf16> to vector<1x1x8x8xbf16>
    tpu.vector_store %arg4[%c0_31, %50, %c0_32, %c0_33], %53 {strides = array<i32>} : memref<1x8x8x8xbf16, #tpu.memory_space<vmem>>, vector<1x1x8x8xbf16>,
    %c5_i32 = arith.constant 5 : i32
    %c8_i32_34 = arith.constant 8 : i32
    %54 = arith.muli %c5_i32, %c8_i32_34 : i32
    %55 = tpu.assume_multiple %54, 8 : i32
    %56 = arith.index_cast %55 : i32 to index
    %c0_35 = arith.constant 0 : index
    %57 = vector.load %arg5[%56, %c0_35] : memref<64x8xf32, #tpu.memory_space<vmem>>, vector<8x8xf32>
    %58 = arith.truncf %57 : vector<8x8xf32> to vector<8x8xbf16>
    %c0_36 = arith.constant 0 : index
    %59 = arith.index_cast %c5_i32 : i32 to index
    %c0_37 = arith.constant 0 : index
    %c0_38 = arith.constant 0 : index
    %60 = vector.load %arg4[%c0_36, %59, %c0_37, %c0_38] : memref<1x8x8x8xbf16, #tpu.memory_space<vmem>>, vector<1x1x8x8xbf16>
    %61 = vector.shape_cast %60 : vector<1x1x8x8xbf16> to vector<8x8xbf16>
    %62 = vector.shape_cast %58 : vector<8x8xbf16> to vector<1x1x8x8xbf16>
    tpu.vector_store %arg4[%c0_36, %59, %c0_37, %c0_38], %62 {strides = array<i32>} : memref<1x8x8x8xbf16, #tpu.memory_space<vmem>>, vector<1x1x8x8xbf16>,
    %c6_i32 = arith.constant 6 : i32
    %c8_i32_39 = arith.constant 8 : i32
    %63 = arith.muli %c6_i32, %c8_i32_39 : i32
    %64 = tpu.assume_multiple %63, 8 : i32
    %65 = arith.index_cast %64 : i32 to index
    %c0_40 = arith.constant 0 : index
    %66 = vector.load %arg5[%65, %c0_40] : memref<64x8xf32, #tpu.memory_space<vmem>>, vector<8x8xf32>
    %67 = arith.truncf %66 : vector<8x8xf32> to vector<8x8xbf16>
    %c0_41 = arith.constant 0 : index
    %68 = arith.index_cast %c6_i32 : i32 to index
    %c0_42 = arith.constant 0 : index
    %c0_43 = arith.constant 0 : index
    %69 = vector.load %arg4[%c0_41, %68, %c0_42, %c0_43] : memref<1x8x8x8xbf16, #tpu.memory_space<vmem>>, vector<1x1x8x8xbf16>
    %70 = vector.shape_cast %69 : vector<1x1x8x8xbf16> to vector<8x8xbf16>
    %71 = vector.shape_cast %67 : vector<8x8xbf16> to vector<1x1x8x8xbf16>
    tpu.vector_store %arg4[%c0_41, %68, %c0_42, %c0_43], %71 {strides = array<i32>} : memref<1x8x8x8xbf16, #tpu.memory_space<vmem>>, vector<1x1x8x8xbf16>,
    %c7_i32 = arith.constant 7 : i32
    %c8_i32_44 = arith.constant 8 : i32
    %72 = arith.muli %c7_i32, %c8_i32_44 : i32
    %73 = tpu.assume_multiple %72, 8 : i32
    %74 = arith.index_cast %73 : i32 to index
    %c0_45 = arith.constant 0 : index
    %75 = vector.load %arg5[%74, %c0_45] : memref<64x8xf32, #tpu.memory_space<vmem>>, vector<8x8xf32>
    %76 = arith.truncf %75 : vector<8x8xf32> to vector<8x8xbf16>
    %c0_46 = arith.constant 0 : index
    %77 = arith.index_cast %c7_i32 : i32 to index
    %c0_47 = arith.constant 0 : index
    %c0_48 = arith.constant 0 : index
    %78 = vector.load %arg4[%c0_46, %77, %c0_47, %c0_48] : memref<1x8x8x8xbf16, #tpu.memory_space<vmem>>, vector<1x1x8x8xbf16>
    %79 = vector.shape_cast %78 : vector<1x1x8x8xbf16> to vector<8x8xbf16>
    %80 = vector.shape_cast %76 : vector<8x8xbf16> to vector<1x1x8x8xbf16>
    tpu.vector_store %arg4[%c0_46, %77, %c0_47, %c0_48], %80 {strides = array<i32>} : memref<1x8x8x8xbf16, #tpu.memory_space<vmem>>, vector<1x1x8x8xbf16>,
    %c8_i32_49 = arith.constant 8 : i32
    return
  }
  func.func @transform_0(%arg0: i32) -> (i32, i32, i32, i32) {
    %c0_i32 = arith.constant 0 : i32
    %c0_i32_0 = arith.constant 0 : i32
    %c0_i32_1 = arith.constant 0 : i32
    %c0_i32_2 = arith.constant 0 : i32
    return %arg0, %c0_i32, %c0_i32_0, %c0_i32_1 : i32, i32, i32, i32
  }
  func.func @transform_1(%arg0: i32) -> (i32, i32, i32) {
    %c0_i32 = arith.constant 0 : i32
    %c0_i32_0 = arith.constant 0 : i32
    %c0_i32_1 = arith.constant 0 : i32
    %c0_i32_2 = arith.constant 0 : i32
    return %c0_i32, %c0_i32_0, %c0_i32_1 : i32, i32, i32
  }
  func.func @transform_2(%arg0: i32) -> (i32, i32) {
    %c0_i32 = arith.constant 0 : i32
    %c0_i32_0 = arith.constant 0 : i32
    %c0_i32_1 = arith.constant 0 : i32
    return %c0_i32, %c0_i32_0 : i32, i32
  }
  func.func @transform_3(%arg0: i32) -> (i32, i32, i32, i32) {
    %c0_i32 = arith.constant 0 : i32
    %c0_i32_0 = arith.constant 0 : i32
    %c0_i32_1 = arith.constant 0 : i32
    %c0_i32_2 = arith.constant 0 : i32
    return %arg0, %c0_i32, %c0_i32_0, %c0_i32_1 : i32, i32, i32, i32
  }
}

module attributes {stable_mosaic.version = 11 : i64} {
  func.func @_conv_bn_act_kernel(%arg0: i32, %arg1: memref<1x4x144x4xbf16, #tpu.memory_space<vmem>>, %arg2: memref<9x4x8xbf16, #tpu.memory_space<vmem>>, %arg3: memref<1x8xf32, #tpu.memory_space<vmem>>, %arg4: memref<1x8xf32, #tpu.memory_space<vmem>>, %arg5: memref<1x8x8x8xbf16, #tpu.memory_space<vmem>>, %arg6: memref<120x8xf32, #tpu.memory_space<vmem>>) attributes {dimension_semantics = [#tpu.dimension_semantics<parallel>], iteration_bounds = array<i64: 2>, scalar_prefetch = 0 : i64, scratch_operands = 1 : i64, tpu.core_type = #tpu.core_type<tc>, window_params = [{transform_indices = @transform_0, window_bounds = array<i64: 1, 4, 144, 4>}, {pipeline_mode = #tpu.pipeline_mode<synchronous>, transform_indices = @transform_1, window_bounds = array<i64: 9, 4, 8>}, {pipeline_mode = #tpu.pipeline_mode<synchronous>, transform_indices = @transform_2, window_bounds = array<i64: 1, 8>}, {pipeline_mode = #tpu.pipeline_mode<synchronous>, transform_indices = @transform_3, window_bounds = array<i64: 1, 8>}, {transform_indices = @transform_4, window_bounds = array<i64: 1, 8, 8, 8>}]} {
    %c0 = arith.constant 0 : index
    %c0_0 = arith.constant 0 : index
    %c0_1 = arith.constant 0 : index
    %c0_2 = arith.constant 0 : index
    %0 = vector.load %arg1[%c0, %c0_0, %c0_1, %c0_2] : memref<1x4x144x4xbf16, #tpu.memory_space<vmem>>, vector<1x1x120x4xbf16>
    %1 = vector.shape_cast %0 : vector<1x1x120x4xbf16> to vector<120x4xbf16>
    %c0_3 = arith.constant 0 : index
    %c0_4 = arith.constant 0 : index
    %c0_5 = arith.constant 0 : index
    %2 = vector.load %arg2[%c0_3, %c0_4, %c0_5] : memref<9x4x8xbf16, #tpu.memory_space<vmem>>, vector<1x4x8xbf16>
    %3 = vector.shape_cast %2 : vector<1x4x8xbf16> to vector<4x8xbf16>
    %cst = arith.constant dense<0.000000e+00> : vector<120x8xf32>
    %4 = tpu.matmul %1, %3, %cst {dimension_numbers = #tpu.dot_dimension_numbers<[1], [0], [0], [1], [0, 0, 1, 1], [], []>} : vector<120x4xbf16>, vector<4x8xbf16>, vector<120x8xf32> -> vector<120x8xf32>
    %c0_6 = arith.constant 0 : index
    %c1 = arith.constant 1 : index
    %c0_7 = arith.constant 0 : index
    %c0_8 = arith.constant 0 : index
    %5 = vector.load %arg1[%c0_6, %c1, %c0_7, %c0_8] : memref<1x4x144x4xbf16, #tpu.memory_space<vmem>>, vector<1x1x120x4xbf16>
    %6 = vector.shape_cast %5 : vector<1x1x120x4xbf16> to vector<120x4xbf16>
    %c1_9 = arith.constant 1 : index
    %c0_10 = arith.constant 0 : index
    %c0_11 = arith.constant 0 : index
    %7 = vector.load %arg2[%c1_9, %c0_10, %c0_11] : memref<9x4x8xbf16, #tpu.memory_space<vmem>>, vector<1x4x8xbf16>
    %8 = vector.shape_cast %7 : vector<1x4x8xbf16> to vector<4x8xbf16>
    %cst_12 = arith.constant dense<0.000000e+00> : vector<120x8xf32>
    %9 = tpu.matmul %6, %8, %cst_12 {dimension_numbers = #tpu.dot_dimension_numbers<[1], [0], [0], [1], [0, 0, 1, 1], [], []>} : vector<120x4xbf16>, vector<4x8xbf16>, vector<120x8xf32> -> vector<120x8xf32>
    %10 = arith.addf %4, %9 : vector<120x8xf32>
    %c0_13 = arith.constant 0 : index
    %c0_14 = arith.constant 0 : index
    %c1_15 = arith.constant 1 : index
    %c0_16 = arith.constant 0 : index
    %11 = vector.load %arg1[%c0_13, %c0_14, %c1_15, %c0_16] : memref<1x4x144x4xbf16, #tpu.memory_space<vmem>>, vector<1x1x120x4xbf16>
    %12 = vector.shape_cast %11 : vector<1x1x120x4xbf16> to vector<120x4xbf16>
    %c2 = arith.constant 2 : index
    %c0_17 = arith.constant 0 : index
    %c0_18 = arith.constant 0 : index
    %13 = vector.load %arg2[%c2, %c0_17, %c0_18] : memref<9x4x8xbf16, #tpu.memory_space<vmem>>, vector<1x4x8xbf16>
    %14 = vector.shape_cast %13 : vector<1x4x8xbf16> to vector<4x8xbf16>
    %cst_19 = arith.constant dense<0.000000e+00> : vector<120x8xf32>
    %15 = tpu.matmul %12, %14, %cst_19 {dimension_numbers = #tpu.dot_dimension_numbers<[1], [0], [0], [1], [0, 0, 1, 1], [], []>} : vector<120x4xbf16>, vector<4x8xbf16>, vector<120x8xf32> -> vector<120x8xf32>
    %16 = arith.addf %10, %15 : vector<120x8xf32>
    %c0_20 = arith.constant 0 : index
    %c2_21 = arith.constant 2 : index
    %c0_22 = arith.constant 0 : index
    %c0_23 = arith.constant 0 : index
    %17 = vector.load %arg1[%c0_20, %c2_21, %c0_22, %c0_23] : memref<1x4x144x4xbf16, #tpu.memory_space<vmem>>, vector<1x1x120x4xbf16>
    %18 = vector.shape_cast %17 : vector<1x1x120x4xbf16> to vector<120x4xbf16>
    %c3 = arith.constant 3 : index
    %c0_24 = arith.constant 0 : index
    %c0_25 = arith.constant 0 : index
    %19 = vector.load %arg2[%c3, %c0_24, %c0_25] : memref<9x4x8xbf16, #tpu.memory_space<vmem>>, vector<1x4x8xbf16>
    %20 = vector.shape_cast %19 : vector<1x4x8xbf16> to vector<4x8xbf16>
    %cst_26 = arith.constant dense<0.000000e+00> : vector<120x8xf32>
    %21 = tpu.matmul %18, %20, %cst_26 {dimension_numbers = #tpu.dot_dimension_numbers<[1], [0], [0], [1], [0, 0, 1, 1], [], []>} : vector<120x4xbf16>, vector<4x8xbf16>, vector<120x8xf32> -> vector<120x8xf32>
    %22 = arith.addf %16, %21 : vector<120x8xf32>
    %c0_27 = arith.constant 0 : index
    %c3_28 = arith.constant 3 : index
    %c0_29 = arith.constant 0 : index
    %c0_30 = arith.constant 0 : index
    %23 = vector.load %arg1[%c0_27, %c3_28, %c0_29, %c0_30] : memref<1x4x144x4xbf16, #tpu.memory_space<vmem>>, vector<1x1x120x4xbf16>
    %24 = vector.shape_cast %23 : vector<1x1x120x4xbf16> to vector<120x4xbf16>
    %c4 = arith.constant 4 : index
    %c0_31 = arith.constant 0 : index
    %c0_32 = arith.constant 0 : index
    %25 = vector.load %arg2[%c4, %c0_31, %c0_32] : memref<9x4x8xbf16, #tpu.memory_space<vmem>>, vector<1x4x8xbf16>
    %26 = vector.shape_cast %25 : vector<1x4x8xbf16> to vector<4x8xbf16>
    %cst_33 = arith.constant dense<0.000000e+00> : vector<120x8xf32>
    %27 = tpu.matmul %24, %26, %cst_33 {dimension_numbers = #tpu.dot_dimension_numbers<[1], [0], [0], [1], [0, 0, 1, 1], [], []>} : vector<120x4xbf16>, vector<4x8xbf16>, vector<120x8xf32> -> vector<120x8xf32>
    %28 = arith.addf %22, %27 : vector<120x8xf32>
    %c0_34 = arith.constant 0 : index
    %c2_35 = arith.constant 2 : index
    %c1_36 = arith.constant 1 : index
    %c0_37 = arith.constant 0 : index
    %29 = vector.load %arg1[%c0_34, %c2_35, %c1_36, %c0_37] : memref<1x4x144x4xbf16, #tpu.memory_space<vmem>>, vector<1x1x120x4xbf16>
    %30 = vector.shape_cast %29 : vector<1x1x120x4xbf16> to vector<120x4xbf16>
    %c5 = arith.constant 5 : index
    %c0_38 = arith.constant 0 : index
    %c0_39 = arith.constant 0 : index
    %31 = vector.load %arg2[%c5, %c0_38, %c0_39] : memref<9x4x8xbf16, #tpu.memory_space<vmem>>, vector<1x4x8xbf16>
    %32 = vector.shape_cast %31 : vector<1x4x8xbf16> to vector<4x8xbf16>
    %cst_40 = arith.constant dense<0.000000e+00> : vector<120x8xf32>
    %33 = tpu.matmul %30, %32, %cst_40 {dimension_numbers = #tpu.dot_dimension_numbers<[1], [0], [0], [1], [0, 0, 1, 1], [], []>} : vector<120x4xbf16>, vector<4x8xbf16>, vector<120x8xf32> -> vector<120x8xf32>
    %34 = arith.addf %28, %33 : vector<120x8xf32>
    %c0_41 = arith.constant 0 : index
    %c0_42 = arith.constant 0 : index
    %c16 = arith.constant 16 : index
    %c0_43 = arith.constant 0 : index
    %35 = vector.load %arg1[%c0_41, %c0_42, %c16, %c0_43] : memref<1x4x144x4xbf16, #tpu.memory_space<vmem>>, vector<1x1x120x4xbf16>
    %36 = vector.shape_cast %35 : vector<1x1x120x4xbf16> to vector<120x4xbf16>
    %c6 = arith.constant 6 : index
    %c0_44 = arith.constant 0 : index
    %c0_45 = arith.constant 0 : index
    %37 = vector.load %arg2[%c6, %c0_44, %c0_45] : memref<9x4x8xbf16, #tpu.memory_space<vmem>>, vector<1x4x8xbf16>
    %38 = vector.shape_cast %37 : vector<1x4x8xbf16> to vector<4x8xbf16>
    %cst_46 = arith.constant dense<0.000000e+00> : vector<120x8xf32>
    %39 = tpu.matmul %36, %38, %cst_46 {dimension_numbers = #tpu.dot_dimension_numbers<[1], [0], [0], [1], [0, 0, 1, 1], [], []>} : vector<120x4xbf16>, vector<4x8xbf16>, vector<120x8xf32> -> vector<120x8xf32>
    %40 = arith.addf %34, %39 : vector<120x8xf32>
    %c0_47 = arith.constant 0 : index
    %c1_48 = arith.constant 1 : index
    %c16_49 = arith.constant 16 : index
    %c0_50 = arith.constant 0 : index
    %41 = vector.load %arg1[%c0_47, %c1_48, %c16_49, %c0_50] : memref<1x4x144x4xbf16, #tpu.memory_space<vmem>>, vector<1x1x120x4xbf16>
    %42 = vector.shape_cast %41 : vector<1x1x120x4xbf16> to vector<120x4xbf16>
    %c7 = arith.constant 7 : index
    %c0_51 = arith.constant 0 : index
    %c0_52 = arith.constant 0 : index
    %43 = vector.load %arg2[%c7, %c0_51, %c0_52] : memref<9x4x8xbf16, #tpu.memory_space<vmem>>, vector<1x4x8xbf16>
    %44 = vector.shape_cast %43 : vector<1x4x8xbf16> to vector<4x8xbf16>
    %cst_53 = arith.constant dense<0.000000e+00> : vector<120x8xf32>
    %45 = tpu.matmul %42, %44, %cst_53 {dimension_numbers = #tpu.dot_dimension_numbers<[1], [0], [0], [1], [0, 0, 1, 1], [], []>} : vector<120x4xbf16>, vector<4x8xbf16>, vector<120x8xf32> -> vector<120x8xf32>
    %46 = arith.addf %40, %45 : vector<120x8xf32>
    %c0_54 = arith.constant 0 : index
    %c0_55 = arith.constant 0 : index
    %c17 = arith.constant 17 : index
    %c0_56 = arith.constant 0 : index
    %47 = vector.load %arg1[%c0_54, %c0_55, %c17, %c0_56] : memref<1x4x144x4xbf16, #tpu.memory_space<vmem>>, vector<1x1x120x4xbf16>
    %48 = vector.shape_cast %47 : vector<1x1x120x4xbf16> to vector<120x4xbf16>
    %c8 = arith.constant 8 : index
    %c0_57 = arith.constant 0 : index
    %c0_58 = arith.constant 0 : index
    %49 = vector.load %arg2[%c8, %c0_57, %c0_58] : memref<9x4x8xbf16, #tpu.memory_space<vmem>>, vector<1x4x8xbf16>
    %50 = vector.shape_cast %49 : vector<1x4x8xbf16> to vector<4x8xbf16>
    %cst_59 = arith.constant dense<0.000000e+00> : vector<120x8xf32>
    %51 = tpu.matmul %48, %50, %cst_59 {dimension_numbers = #tpu.dot_dimension_numbers<[1], [0], [0], [1], [0, 0, 1, 1], [], []>} : vector<120x4xbf16>, vector<4x8xbf16>, vector<120x8xf32> -> vector<120x8xf32>
    %52 = arith.addf %46, %51 : vector<120x8xf32>
    %c0_60 = arith.constant 0 : index
    %c0_61 = arith.constant 0 : index
    %53 = vector.load %arg3[%c0_60, %c0_61] : memref<1x8xf32, #tpu.memory_space<vmem>>, vector<1x8xf32>
    %54 = vector.broadcast %53 : vector<1x8xf32> to vector<120x8xf32>
    %55 = arith.addf %52, %54 : vector<120x8xf32>
    %cst_62 = arith.constant 0.000000e+00 : f32
    %56 = vector.broadcast %cst_62 : f32 to vector<120x8xf32>
    %57 = arith.cmpf oge, %55, %56 : vector<120x8xf32>
    %c0_63 = arith.constant 0 : index
    %c0_64 = arith.constant 0 : index
    %58 = vector.load %arg4[%c0_63, %c0_64] : memref<1x8xf32, #tpu.memory_space<vmem>>, vector<1x8xf32>
    %59 = vector.broadcast %58 : vector<1x8xf32> to vector<120x8xf32>
    %60 = arith.mulf %59, %55 : vector<120x8xf32>
    %61 = arith.select %57, %55, %60 : vector<120x8xi1>, vector<120x8xf32>
    %c0_65 = arith.constant 0 : index
    %c0_66 = arith.constant 0 : index
    %62 = vector.load %arg6[%c0_65, %c0_66] : memref<120x8xf32, #tpu.memory_space<vmem>>, vector<120x8xf32>
    tpu.vector_store %arg6[%c0_65, %c0_66], %61 {strides = array<i32>} : memref<120x8xf32, #tpu.memory_space<vmem>>, vector<120x8xf32>,
    %c0_i32 = arith.constant 0 : i32
    %c16_i32 = arith.constant 16 : i32
    %63 = arith.muli %c0_i32, %c16_i32 : i32
    %64 = tpu.assume_multiple %63, 8 : i32
    %65 = arith.index_cast %64 : i32 to index
    %c0_67 = arith.constant 0 : index
    %66 = vector.load %arg6[%65, %c0_67] : memref<120x8xf32, #tpu.memory_space<vmem>>, vector<8x8xf32>
    %67 = arith.truncf %66 : vector<8x8xf32> to vector<8x8xbf16>
    %c0_68 = arith.constant 0 : index
    %68 = arith.index_cast %c0_i32 : i32 to index
    %c0_69 = arith.constant 0 : index
    %c0_70 = arith.constant 0 : index
    %69 = vector.load %arg5[%c0_68, %68, %c0_69, %c0_70] : memref<1x8x8x8xbf16, #tpu.memory_space<vmem>>, vector<1x1x8x8xbf16>
    %70 = vector.shape_cast %69 : vector<1x1x8x8xbf16> to vector<8x8xbf16>
    %71 = vector.shape_cast %67 : vector<8x8xbf16> to vector<1x1x8x8xbf16>
    tpu.vector_store %arg5[%c0_68, %68, %c0_69, %c0_70], %71 {strides = array<i32>} : memref<1x8x8x8xbf16, #tpu.memory_space<vmem>>, vector<1x1x8x8xbf16>,
    %c1_i32 = arith.constant 1 : i32
    %c16_i32_71 = arith.constant 16 : i32
    %72 = arith.muli %c1_i32, %c16_i32_71 : i32
    %73 = tpu.assume_multiple %72, 8 : i32
    %74 = arith.index_cast %73 : i32 to index
    %c0_72 = arith.constant 0 : index
    %75 = vector.load %arg6[%74, %c0_72] : memref<120x8xf32, #tpu.memory_space<vmem>>, vector<8x8xf32>
    %76 = arith.truncf %75 : vector<8x8xf32> to vector<8x8xbf16>
    %c0_73 = arith.constant 0 : index
    %77 = arith.index_cast %c1_i32 : i32 to index
    %c0_74 = arith.constant 0 : index
    %c0_75 = arith.constant 0 : index
    %78 = vector.load %arg5[%c0_73, %77, %c0_74, %c0_75] : memref<1x8x8x8xbf16, #tpu.memory_space<vmem>>, vector<1x1x8x8xbf16>
    %79 = vector.shape_cast %78 : vector<1x1x8x8xbf16> to vector<8x8xbf16>
    %80 = vector.shape_cast %76 : vector<8x8xbf16> to vector<1x1x8x8xbf16>
    tpu.vector_store %arg5[%c0_73, %77, %c0_74, %c0_75], %80 {strides = array<i32>} : memref<1x8x8x8xbf16, #tpu.memory_space<vmem>>, vector<1x1x8x8xbf16>,
    %c2_i32 = arith.constant 2 : i32
    %c16_i32_76 = arith.constant 16 : i32
    %81 = arith.muli %c2_i32, %c16_i32_76 : i32
    %82 = tpu.assume_multiple %81, 8 : i32
    %83 = arith.index_cast %82 : i32 to index
    %c0_77 = arith.constant 0 : index
    %84 = vector.load %arg6[%83, %c0_77] : memref<120x8xf32, #tpu.memory_space<vmem>>, vector<8x8xf32>
    %85 = arith.truncf %84 : vector<8x8xf32> to vector<8x8xbf16>
    %c0_78 = arith.constant 0 : index
    %86 = arith.index_cast %c2_i32 : i32 to index
    %c0_79 = arith.constant 0 : index
    %c0_80 = arith.constant 0 : index
    %87 = vector.load %arg5[%c0_78, %86, %c0_79, %c0_80] : memref<1x8x8x8xbf16, #tpu.memory_space<vmem>>, vector<1x1x8x8xbf16>
    %88 = vector.shape_cast %87 : vector<1x1x8x8xbf16> to vector<8x8xbf16>
    %89 = vector.shape_cast %85 : vector<8x8xbf16> to vector<1x1x8x8xbf16>
    tpu.vector_store %arg5[%c0_78, %86, %c0_79, %c0_80], %89 {strides = array<i32>} : memref<1x8x8x8xbf16, #tpu.memory_space<vmem>>, vector<1x1x8x8xbf16>,
    %c3_i32 = arith.constant 3 : i32
    %c16_i32_81 = arith.constant 16 : i32
    %90 = arith.muli %c3_i32, %c16_i32_81 : i32
    %91 = tpu.assume_multiple %90, 8 : i32
    %92 = arith.index_cast %91 : i32 to index
    %c0_82 = arith.constant 0 : index
    %93 = vector.load %arg6[%92, %c0_82] : memref<120x8xf32, #tpu.memory_space<vmem>>, vector<8x8xf32>
    %94 = arith.truncf %93 : vector<8x8xf32> to vector<8x8xbf16>
    %c0_83 = arith.constant 0 : index
    %95 = arith.index_cast %c3_i32 : i32 to index
    %c0_84 = arith.constant 0 : index
    %c0_85 = arith.constant 0 : index
    %96 = vector.load %arg5[%c0_83, %95, %c0_84, %c0_85] : memref<1x8x8x8xbf16, #tpu.memory_space<vmem>>, vector<1x1x8x8xbf16>
    %97 = vector.shape_cast %96 : vector<1x1x8x8xbf16> to vector<8x8xbf16>
    %98 = vector.shape_cast %94 : vector<8x8xbf16> to vector<1x1x8x8xbf16>
    tpu.vector_store %arg5[%c0_83, %95, %c0_84, %c0_85], %98 {strides = array<i32>} : memref<1x8x8x8xbf16, #tpu.memory_space<vmem>>, vector<1x1x8x8xbf16>,
    %c4_i32 = arith.constant 4 : i32
    %c16_i32_86 = arith.constant 16 : i32
    %99 = arith.muli %c4_i32, %c16_i32_86 : i32
    %100 = tpu.assume_multiple %99, 8 : i32
    %101 = arith.index_cast %100 : i32 to index
    %c0_87 = arith.constant 0 : index
    %102 = vector.load %arg6[%101, %c0_87] : memref<120x8xf32, #tpu.memory_space<vmem>>, vector<8x8xf32>
    %103 = arith.truncf %102 : vector<8x8xf32> to vector<8x8xbf16>
    %c0_88 = arith.constant 0 : index
    %104 = arith.index_cast %c4_i32 : i32 to index
    %c0_89 = arith.constant 0 : index
    %c0_90 = arith.constant 0 : index
    %105 = vector.load %arg5[%c0_88, %104, %c0_89, %c0_90] : memref<1x8x8x8xbf16, #tpu.memory_space<vmem>>, vector<1x1x8x8xbf16>
    %106 = vector.shape_cast %105 : vector<1x1x8x8xbf16> to vector<8x8xbf16>
    %107 = vector.shape_cast %103 : vector<8x8xbf16> to vector<1x1x8x8xbf16>
    tpu.vector_store %arg5[%c0_88, %104, %c0_89, %c0_90], %107 {strides = array<i32>} : memref<1x8x8x8xbf16, #tpu.memory_space<vmem>>, vector<1x1x8x8xbf16>,
    %c5_i32 = arith.constant 5 : i32
    %c16_i32_91 = arith.constant 16 : i32
    %108 = arith.muli %c5_i32, %c16_i32_91 : i32
    %109 = tpu.assume_multiple %108, 8 : i32
    %110 = arith.index_cast %109 : i32 to index
    %c0_92 = arith.constant 0 : index
    %111 = vector.load %arg6[%110, %c0_92] : memref<120x8xf32, #tpu.memory_space<vmem>>, vector<8x8xf32>
    %112 = arith.truncf %111 : vector<8x8xf32> to vector<8x8xbf16>
    %c0_93 = arith.constant 0 : index
    %113 = arith.index_cast %c5_i32 : i32 to index
    %c0_94 = arith.constant 0 : index
    %c0_95 = arith.constant 0 : index
    %114 = vector.load %arg5[%c0_93, %113, %c0_94, %c0_95] : memref<1x8x8x8xbf16, #tpu.memory_space<vmem>>, vector<1x1x8x8xbf16>
    %115 = vector.shape_cast %114 : vector<1x1x8x8xbf16> to vector<8x8xbf16>
    %116 = vector.shape_cast %112 : vector<8x8xbf16> to vector<1x1x8x8xbf16>
    tpu.vector_store %arg5[%c0_93, %113, %c0_94, %c0_95], %116 {strides = array<i32>} : memref<1x8x8x8xbf16, #tpu.memory_space<vmem>>, vector<1x1x8x8xbf16>,
    %c6_i32 = arith.constant 6 : i32
    %c16_i32_96 = arith.constant 16 : i32
    %117 = arith.muli %c6_i32, %c16_i32_96 : i32
    %118 = tpu.assume_multiple %117, 8 : i32
    %119 = arith.index_cast %118 : i32 to index
    %c0_97 = arith.constant 0 : index
    %120 = vector.load %arg6[%119, %c0_97] : memref<120x8xf32, #tpu.memory_space<vmem>>, vector<8x8xf32>
    %121 = arith.truncf %120 : vector<8x8xf32> to vector<8x8xbf16>
    %c0_98 = arith.constant 0 : index
    %122 = arith.index_cast %c6_i32 : i32 to index
    %c0_99 = arith.constant 0 : index
    %c0_100 = arith.constant 0 : index
    %123 = vector.load %arg5[%c0_98, %122, %c0_99, %c0_100] : memref<1x8x8x8xbf16, #tpu.memory_space<vmem>>, vector<1x1x8x8xbf16>
    %124 = vector.shape_cast %123 : vector<1x1x8x8xbf16> to vector<8x8xbf16>
    %125 = vector.shape_cast %121 : vector<8x8xbf16> to vector<1x1x8x8xbf16>
    tpu.vector_store %arg5[%c0_98, %122, %c0_99, %c0_100], %125 {strides = array<i32>} : memref<1x8x8x8xbf16, #tpu.memory_space<vmem>>, vector<1x1x8x8xbf16>,
    %c7_i32 = arith.constant 7 : i32
    %c16_i32_101 = arith.constant 16 : i32
    %126 = arith.muli %c7_i32, %c16_i32_101 : i32
    %127 = tpu.assume_multiple %126, 8 : i32
    %128 = arith.index_cast %127 : i32 to index
    %c0_102 = arith.constant 0 : index
    %129 = vector.load %arg6[%128, %c0_102] : memref<120x8xf32, #tpu.memory_space<vmem>>, vector<8x8xf32>
    %130 = arith.truncf %129 : vector<8x8xf32> to vector<8x8xbf16>
    %c0_103 = arith.constant 0 : index
    %131 = arith.index_cast %c7_i32 : i32 to index
    %c0_104 = arith.constant 0 : index
    %c0_105 = arith.constant 0 : index
    %132 = vector.load %arg5[%c0_103, %131, %c0_104, %c0_105] : memref<1x8x8x8xbf16, #tpu.memory_space<vmem>>, vector<1x1x8x8xbf16>
    %133 = vector.shape_cast %132 : vector<1x1x8x8xbf16> to vector<8x8xbf16>
    %134 = vector.shape_cast %130 : vector<8x8xbf16> to vector<1x1x8x8xbf16>
    tpu.vector_store %arg5[%c0_103, %131, %c0_104, %c0_105], %134 {strides = array<i32>} : memref<1x8x8x8xbf16, #tpu.memory_space<vmem>>, vector<1x1x8x8xbf16>,
    %c8_i32 = arith.constant 8 : i32
    return
  }
  func.func @transform_0(%arg0: i32) -> (i32, i32, i32, i32) {
    %c0_i32 = arith.constant 0 : i32
    %c0_i32_0 = arith.constant 0 : i32
    %c0_i32_1 = arith.constant 0 : i32
    %c0_i32_2 = arith.constant 0 : i32
    return %arg0, %c0_i32, %c0_i32_0, %c0_i32_1 : i32, i32, i32, i32
  }
  func.func @transform_1(%arg0: i32) -> (i32, i32, i32) {
    %c0_i32 = arith.constant 0 : i32
    %c0_i32_0 = arith.constant 0 : i32
    %c0_i32_1 = arith.constant 0 : i32
    %c0_i32_2 = arith.constant 0 : i32
    return %c0_i32, %c0_i32_0, %c0_i32_1 : i32, i32, i32
  }
  func.func @transform_2(%arg0: i32) -> (i32, i32) {
    %c0_i32 = arith.constant 0 : i32
    %c0_i32_0 = arith.constant 0 : i32
    %c0_i32_1 = arith.constant 0 : i32
    return %c0_i32, %c0_i32_0 : i32, i32
  }
  func.func @transform_3(%arg0: i32) -> (i32, i32) {
    %c0_i32 = arith.constant 0 : i32
    %c0_i32_0 = arith.constant 0 : i32
    %c0_i32_1 = arith.constant 0 : i32
    return %c0_i32, %c0_i32_0 : i32, i32
  }
  func.func @transform_4(%arg0: i32) -> (i32, i32, i32, i32) {
    %c0_i32 = arith.constant 0 : i32
    %c0_i32_0 = arith.constant 0 : i32
    %c0_i32_1 = arith.constant 0 : i32
    %c0_i32_2 = arith.constant 0 : i32
    return %arg0, %c0_i32, %c0_i32_0, %c0_i32_1 : i32, i32, i32, i32
  }
}

module attributes {stable_mosaic.version = 11 : i64} {
  func.func @_conv_bn_act_kernel(%arg0: i32, %arg1: memref<1x1x160x8xbf16, #tpu.memory_space<vmem>>, %arg2: memref<9x8x8xbf16, #tpu.memory_space<vmem>>, %arg3: memref<1x8xf32, #tpu.memory_space<vmem>>, %arg4: memref<1x8x8x8xbf16, #tpu.memory_space<vmem>>, %arg5: memref<1x8x8x8xf32, #tpu.memory_space<vmem>>, %arg6: memref<120x8xf32, #tpu.memory_space<vmem>>) attributes {dimension_semantics = [#tpu.dimension_semantics<parallel>], iteration_bounds = array<i64: 2>, scalar_prefetch = 0 : i64, scratch_operands = 1 : i64, tpu.core_type = #tpu.core_type<tc>, window_params = [{transform_indices = @transform_0, window_bounds = array<i64: 1, 1, 160, 8>}, {pipeline_mode = #tpu.pipeline_mode<synchronous>, transform_indices = @transform_1, window_bounds = array<i64: 9, 8, 8>}, {pipeline_mode = #tpu.pipeline_mode<synchronous>, transform_indices = @transform_2, window_bounds = array<i64: 1, 8>}, {transform_indices = @transform_3, window_bounds = array<i64: 1, 8, 8, 8>}, {transform_indices = @transform_4, window_bounds = array<i64: 1, 8, 8, 8>}]} {
    %c0 = arith.constant 0 : index
    %c0_0 = arith.constant 0 : index
    %c0_1 = arith.constant 0 : index
    %c0_2 = arith.constant 0 : index
    %0 = vector.load %arg1[%c0, %c0_0, %c0_1, %c0_2] : memref<1x1x160x8xbf16, #tpu.memory_space<vmem>>, vector<1x1x120x8xbf16>
    %1 = vector.shape_cast %0 : vector<1x1x120x8xbf16> to vector<120x8xbf16>
    %c0_3 = arith.constant 0 : index
    %c0_4 = arith.constant 0 : index
    %c0_5 = arith.constant 0 : index
    %2 = vector.load %arg2[%c0_3, %c0_4, %c0_5] : memref<9x8x8xbf16, #tpu.memory_space<vmem>>, vector<1x8x8xbf16>
    %3 = vector.shape_cast %2 : vector<1x8x8xbf16> to vector<8x8xbf16>
    %cst = arith.constant dense<0.000000e+00> : vector<120x8xf32>
    %4 = tpu.matmul %1, %3, %cst {dimension_numbers = #tpu.dot_dimension_numbers<[1], [0], [0], [1], [0, 0, 1, 1], [], []>} : vector<120x8xbf16>, vector<8x8xbf16>, vector<120x8xf32> -> vector<120x8xf32>
    %c0_6 = arith.constant 0 : index
    %c0_7 = arith.constant 0 : index
    %c1 = arith.constant 1 : index
    %c0_8 = arith.constant 0 : index
    %5 = vector.load %arg1[%c0_6, %c0_7, %c1, %c0_8] : memref<1x1x160x8xbf16, #tpu.memory_space<vmem>>, vector<1x1x120x8xbf16>
    %6 = vector.shape_cast %5 : vector<1x1x120x8xbf16> to vector<120x8xbf16>
    %c1_9 = arith.constant 1 : index
    %c0_10 = arith.constant 0 : index
    %c0_11 = arith.constant 0 : index
    %7 = vector.load %arg2[%c1_9, %c0_10, %c0_11] : memref<9x8x8xbf16, #tpu.memory_space<vmem>>, vector<1x8x8xbf16>
    %8 = vector.shape_cast %7 : vector<1x8x8xbf16> to vector<8x8xbf16>
    %cst_12 = arith.constant dense<0.000000e+00> : vector<120x8xf32>
    %9 = tpu.matmul %6, %8, %cst_12 {dimension_numbers = #tpu.dot_dimension_numbers<[1], [0], [0], [1], [0, 0, 1, 1], [], []>} : vector<120x8xbf16>, vector<8x8xbf16>, vector<120x8xf32> -> vector<120x8xf32>
    %10 = arith.addf %4, %9 : vector<120x8xf32>
    %c0_13 = arith.constant 0 : index
    %c0_14 = arith.constant 0 : index
    %c2 = arith.constant 2 : index
    %c0_15 = arith.constant 0 : index
    %11 = vector.load %arg1[%c0_13, %c0_14, %c2, %c0_15] : memref<1x1x160x8xbf16, #tpu.memory_space<vmem>>, vector<1x1x120x8xbf16>
    %12 = vector.shape_cast %11 : vector<1x1x120x8xbf16> to vector<120x8xbf16>
    %c2_16 = arith.constant 2 : index
    %c0_17 = arith.constant 0 : index
    %c0_18 = arith.constant 0 : index
    %13 = vector.load %arg2[%c2_16, %c0_17, %c0_18] : memref<9x8x8xbf16, #tpu.memory_space<vmem>>, vector<1x8x8xbf16>
    %14 = vector.shape_cast %13 : vector<1x8x8xbf16> to vector<8x8xbf16>
    %cst_19 = arith.constant dense<0.000000e+00> : vector<120x8xf32>
    %15 = tpu.matmul %12, %14, %cst_19 {dimension_numbers = #tpu.dot_dimension_numbers<[1], [0], [0], [1], [0, 0, 1, 1], [], []>} : vector<120x8xbf16>, vector<8x8xbf16>, vector<120x8xf32> -> vector<120x8xf32>
    %16 = arith.addf %10, %15 : vector<120x8xf32>
    %c0_20 = arith.constant 0 : index
    %c0_21 = arith.constant 0 : index
    %c16 = arith.constant 16 : index
    %c0_22 = arith.constant 0 : index
    %17 = vector.load %arg1[%c0_20, %c0_21, %c16, %c0_22] : memref<1x1x160x8xbf16, #tpu.memory_space<vmem>>, vector<1x1x120x8xbf16>
    %18 = vector.shape_cast %17 : vector<1x1x120x8xbf16> to vector<120x8xbf16>
    %c3 = arith.constant 3 : index
    %c0_23 = arith.constant 0 : index
    %c0_24 = arith.constant 0 : index
    %19 = vector.load %arg2[%c3, %c0_23, %c0_24] : memref<9x8x8xbf16, #tpu.memory_space<vmem>>, vector<1x8x8xbf16>
    %20 = vector.shape_cast %19 : vector<1x8x8xbf16> to vector<8x8xbf16>
    %cst_25 = arith.constant dense<0.000000e+00> : vector<120x8xf32>
    %21 = tpu.matmul %18, %20, %cst_25 {dimension_numbers = #tpu.dot_dimension_numbers<[1], [0], [0], [1], [0, 0, 1, 1], [], []>} : vector<120x8xbf16>, vector<8x8xbf16>, vector<120x8xf32> -> vector<120x8xf32>
    %22 = arith.addf %16, %21 : vector<120x8xf32>
    %c0_26 = arith.constant 0 : index
    %c0_27 = arith.constant 0 : index
    %c17 = arith.constant 17 : index
    %c0_28 = arith.constant 0 : index
    %23 = vector.load %arg1[%c0_26, %c0_27, %c17, %c0_28] : memref<1x1x160x8xbf16, #tpu.memory_space<vmem>>, vector<1x1x120x8xbf16>
    %24 = vector.shape_cast %23 : vector<1x1x120x8xbf16> to vector<120x8xbf16>
    %c4 = arith.constant 4 : index
    %c0_29 = arith.constant 0 : index
    %c0_30 = arith.constant 0 : index
    %25 = vector.load %arg2[%c4, %c0_29, %c0_30] : memref<9x8x8xbf16, #tpu.memory_space<vmem>>, vector<1x8x8xbf16>
    %26 = vector.shape_cast %25 : vector<1x8x8xbf16> to vector<8x8xbf16>
    %cst_31 = arith.constant dense<0.000000e+00> : vector<120x8xf32>
    %27 = tpu.matmul %24, %26, %cst_31 {dimension_numbers = #tpu.dot_dimension_numbers<[1], [0], [0], [1], [0, 0, 1, 1], [], []>} : vector<120x8xbf16>, vector<8x8xbf16>, vector<120x8xf32> -> vector<120x8xf32>
    %28 = arith.addf %22, %27 : vector<120x8xf32>
    %c0_32 = arith.constant 0 : index
    %c0_33 = arith.constant 0 : index
    %c18 = arith.constant 18 : index
    %c0_34 = arith.constant 0 : index
    %29 = vector.load %arg1[%c0_32, %c0_33, %c18, %c0_34] : memref<1x1x160x8xbf16, #tpu.memory_space<vmem>>, vector<1x1x120x8xbf16>
    %30 = vector.shape_cast %29 : vector<1x1x120x8xbf16> to vector<120x8xbf16>
    %c5 = arith.constant 5 : index
    %c0_35 = arith.constant 0 : index
    %c0_36 = arith.constant 0 : index
    %31 = vector.load %arg2[%c5, %c0_35, %c0_36] : memref<9x8x8xbf16, #tpu.memory_space<vmem>>, vector<1x8x8xbf16>
    %32 = vector.shape_cast %31 : vector<1x8x8xbf16> to vector<8x8xbf16>
    %cst_37 = arith.constant dense<0.000000e+00> : vector<120x8xf32>
    %33 = tpu.matmul %30, %32, %cst_37 {dimension_numbers = #tpu.dot_dimension_numbers<[1], [0], [0], [1], [0, 0, 1, 1], [], []>} : vector<120x8xbf16>, vector<8x8xbf16>, vector<120x8xf32> -> vector<120x8xf32>
    %34 = arith.addf %28, %33 : vector<120x8xf32>
    %c0_38 = arith.constant 0 : index
    %c0_39 = arith.constant 0 : index
    %c32 = arith.constant 32 : index
    %c0_40 = arith.constant 0 : index
    %35 = vector.load %arg1[%c0_38, %c0_39, %c32, %c0_40] : memref<1x1x160x8xbf16, #tpu.memory_space<vmem>>, vector<1x1x120x8xbf16>
    %36 = vector.shape_cast %35 : vector<1x1x120x8xbf16> to vector<120x8xbf16>
    %c6 = arith.constant 6 : index
    %c0_41 = arith.constant 0 : index
    %c0_42 = arith.constant 0 : index
    %37 = vector.load %arg2[%c6, %c0_41, %c0_42] : memref<9x8x8xbf16, #tpu.memory_space<vmem>>, vector<1x8x8xbf16>
    %38 = vector.shape_cast %37 : vector<1x8x8xbf16> to vector<8x8xbf16>
    %cst_43 = arith.constant dense<0.000000e+00> : vector<120x8xf32>
    %39 = tpu.matmul %36, %38, %cst_43 {dimension_numbers = #tpu.dot_dimension_numbers<[1], [0], [0], [1], [0, 0, 1, 1], [], []>} : vector<120x8xbf16>, vector<8x8xbf16>, vector<120x8xf32> -> vector<120x8xf32>
    %40 = arith.addf %34, %39 : vector<120x8xf32>
    %c0_44 = arith.constant 0 : index
    %c0_45 = arith.constant 0 : index
    %c33 = arith.constant 33 : index
    %c0_46 = arith.constant 0 : index
    %41 = vector.load %arg1[%c0_44, %c0_45, %c33, %c0_46] : memref<1x1x160x8xbf16, #tpu.memory_space<vmem>>, vector<1x1x120x8xbf16>
    %42 = vector.shape_cast %41 : vector<1x1x120x8xbf16> to vector<120x8xbf16>
    %c7 = arith.constant 7 : index
    %c0_47 = arith.constant 0 : index
    %c0_48 = arith.constant 0 : index
    %43 = vector.load %arg2[%c7, %c0_47, %c0_48] : memref<9x8x8xbf16, #tpu.memory_space<vmem>>, vector<1x8x8xbf16>
    %44 = vector.shape_cast %43 : vector<1x8x8xbf16> to vector<8x8xbf16>
    %cst_49 = arith.constant dense<0.000000e+00> : vector<120x8xf32>
    %45 = tpu.matmul %42, %44, %cst_49 {dimension_numbers = #tpu.dot_dimension_numbers<[1], [0], [0], [1], [0, 0, 1, 1], [], []>} : vector<120x8xbf16>, vector<8x8xbf16>, vector<120x8xf32> -> vector<120x8xf32>
    %46 = arith.addf %40, %45 : vector<120x8xf32>
    %c0_50 = arith.constant 0 : index
    %c0_51 = arith.constant 0 : index
    %c34 = arith.constant 34 : index
    %c0_52 = arith.constant 0 : index
    %47 = vector.load %arg1[%c0_50, %c0_51, %c34, %c0_52] : memref<1x1x160x8xbf16, #tpu.memory_space<vmem>>, vector<1x1x120x8xbf16>
    %48 = vector.shape_cast %47 : vector<1x1x120x8xbf16> to vector<120x8xbf16>
    %c8 = arith.constant 8 : index
    %c0_53 = arith.constant 0 : index
    %c0_54 = arith.constant 0 : index
    %49 = vector.load %arg2[%c8, %c0_53, %c0_54] : memref<9x8x8xbf16, #tpu.memory_space<vmem>>, vector<1x8x8xbf16>
    %50 = vector.shape_cast %49 : vector<1x8x8xbf16> to vector<8x8xbf16>
    %cst_55 = arith.constant dense<0.000000e+00> : vector<120x8xf32>
    %51 = tpu.matmul %48, %50, %cst_55 {dimension_numbers = #tpu.dot_dimension_numbers<[1], [0], [0], [1], [0, 0, 1, 1], [], []>} : vector<120x8xbf16>, vector<8x8xbf16>, vector<120x8xf32> -> vector<120x8xf32>
    %52 = arith.addf %46, %51 : vector<120x8xf32>
    %c0_56 = arith.constant 0 : index
    %c0_57 = arith.constant 0 : index
    %53 = vector.load %arg3[%c0_56, %c0_57] : memref<1x8xf32, #tpu.memory_space<vmem>>, vector<1x8xf32>
    %54 = vector.broadcast %53 : vector<1x8xf32> to vector<120x8xf32>
    %55 = arith.addf %52, %54 : vector<120x8xf32>
    %c0_58 = arith.constant 0 : index
    %c0_59 = arith.constant 0 : index
    %56 = vector.load %arg6[%c0_58, %c0_59] : memref<120x8xf32, #tpu.memory_space<vmem>>, vector<120x8xf32>
    tpu.vector_store %arg6[%c0_58, %c0_59], %55 {strides = array<i32>} : memref<120x8xf32, #tpu.memory_space<vmem>>, vector<120x8xf32>,
    %c0_i32 = arith.constant 0 : i32
    %c16_i32 = arith.constant 16 : i32
    %57 = arith.muli %c0_i32, %c16_i32 : i32
    %58 = tpu.assume_multiple %57, 8 : i32
    %59 = arith.index_cast %58 : i32 to index
    %c0_60 = arith.constant 0 : index
    %60 = vector.load %arg6[%59, %c0_60] : memref<120x8xf32, #tpu.memory_space<vmem>>, vector<8x8xf32>
    %c0_61 = arith.constant 0 : index
    %61 = arith.index_cast %c0_i32 : i32 to index
    %c0_62 = arith.constant 0 : index
    %c0_63 = arith.constant 0 : index
    %62 = vector.load %arg4[%c0_61, %61, %c0_62, %c0_63] : memref<1x8x8x8xbf16, #tpu.memory_space<vmem>>, vector<1x1x8x8xbf16>
    %63 = vector.shape_cast %62 : vector<1x1x8x8xbf16> to vector<8x8xbf16>
    %64 = arith.extf %63 : vector<8x8xbf16> to vector<8x8xf32>
    %65 = arith.addf %60, %64 : vector<8x8xf32>
    %cst_64 = arith.constant 0.000000e+00 : f32
    %66 = vector.broadcast %cst_64 : f32 to vector<8x8xf32>
    %67 = arith.maximumf %65, %66 : vector<8x8xf32>
    %c0_65 = arith.constant 0 : index
    %68 = arith.index_cast %c0_i32 : i32 to index
    %c0_66 = arith.constant 0 : index
    %c0_67 = arith.constant 0 : index
    %69 = vector.load %arg5[%c0_65, %68, %c0_66, %c0_67] : memref<1x8x8x8xf32, #tpu.memory_space<vmem>>, vector<1x1x8x8xf32>
    %70 = vector.shape_cast %69 : vector<1x1x8x8xf32> to vector<8x8xf32>
    %71 = vector.shape_cast %67 : vector<8x8xf32> to vector<1x1x8x8xf32>
    tpu.vector_store %arg5[%c0_65, %68, %c0_66, %c0_67], %71 {strides = array<i32>} : memref<1x8x8x8xf32, #tpu.memory_space<vmem>>, vector<1x1x8x8xf32>,
    %c1_i32 = arith.constant 1 : i32
    %c16_i32_68 = arith.constant 16 : i32
    %72 = arith.muli %c1_i32, %c16_i32_68 : i32
    %73 = tpu.assume_multiple %72, 8 : i32
    %74 = arith.index_cast %73 : i32 to index
    %c0_69 = arith.constant 0 : index
    %75 = vector.load %arg6[%74, %c0_69] : memref<120x8xf32, #tpu.memory_space<vmem>>, vector<8x8xf32>
    %c0_70 = arith.constant 0 : index
    %76 = arith.index_cast %c1_i32 : i32 to index
    %c0_71 = arith.constant 0 : index
    %c0_72 = arith.constant 0 : index
    %77 = vector.load %arg4[%c0_70, %76, %c0_71, %c0_72] : memref<1x8x8x8xbf16, #tpu.memory_space<vmem>>, vector<1x1x8x8xbf16>
    %78 = vector.shape_cast %77 : vector<1x1x8x8xbf16> to vector<8x8xbf16>
    %79 = arith.extf %78 : vector<8x8xbf16> to vector<8x8xf32>
    %80 = arith.addf %75, %79 : vector<8x8xf32>
    %cst_73 = arith.constant 0.000000e+00 : f32
    %81 = vector.broadcast %cst_73 : f32 to vector<8x8xf32>
    %82 = arith.maximumf %80, %81 : vector<8x8xf32>
    %c0_74 = arith.constant 0 : index
    %83 = arith.index_cast %c1_i32 : i32 to index
    %c0_75 = arith.constant 0 : index
    %c0_76 = arith.constant 0 : index
    %84 = vector.load %arg5[%c0_74, %83, %c0_75, %c0_76] : memref<1x8x8x8xf32, #tpu.memory_space<vmem>>, vector<1x1x8x8xf32>
    %85 = vector.shape_cast %84 : vector<1x1x8x8xf32> to vector<8x8xf32>
    %86 = vector.shape_cast %82 : vector<8x8xf32> to vector<1x1x8x8xf32>
    tpu.vector_store %arg5[%c0_74, %83, %c0_75, %c0_76], %86 {strides = array<i32>} : memref<1x8x8x8xf32, #tpu.memory_space<vmem>>, vector<1x1x8x8xf32>,
    %c2_i32 = arith.constant 2 : i32
    %c16_i32_77 = arith.constant 16 : i32
    %87 = arith.muli %c2_i32, %c16_i32_77 : i32
    %88 = tpu.assume_multiple %87, 8 : i32
    %89 = arith.index_cast %88 : i32 to index
    %c0_78 = arith.constant 0 : index
    %90 = vector.load %arg6[%89, %c0_78] : memref<120x8xf32, #tpu.memory_space<vmem>>, vector<8x8xf32>
    %c0_79 = arith.constant 0 : index
    %91 = arith.index_cast %c2_i32 : i32 to index
    %c0_80 = arith.constant 0 : index
    %c0_81 = arith.constant 0 : index
    %92 = vector.load %arg4[%c0_79, %91, %c0_80, %c0_81] : memref<1x8x8x8xbf16, #tpu.memory_space<vmem>>, vector<1x1x8x8xbf16>
    %93 = vector.shape_cast %92 : vector<1x1x8x8xbf16> to vector<8x8xbf16>
    %94 = arith.extf %93 : vector<8x8xbf16> to vector<8x8xf32>
    %95 = arith.addf %90, %94 : vector<8x8xf32>
    %cst_82 = arith.constant 0.000000e+00 : f32
    %96 = vector.broadcast %cst_82 : f32 to vector<8x8xf32>
    %97 = arith.maximumf %95, %96 : vector<8x8xf32>
    %c0_83 = arith.constant 0 : index
    %98 = arith.index_cast %c2_i32 : i32 to index
    %c0_84 = arith.constant 0 : index
    %c0_85 = arith.constant 0 : index
    %99 = vector.load %arg5[%c0_83, %98, %c0_84, %c0_85] : memref<1x8x8x8xf32, #tpu.memory_space<vmem>>, vector<1x1x8x8xf32>
    %100 = vector.shape_cast %99 : vector<1x1x8x8xf32> to vector<8x8xf32>
    %101 = vector.shape_cast %97 : vector<8x8xf32> to vector<1x1x8x8xf32>
    tpu.vector_store %arg5[%c0_83, %98, %c0_84, %c0_85], %101 {strides = array<i32>} : memref<1x8x8x8xf32, #tpu.memory_space<vmem>>, vector<1x1x8x8xf32>,
    %c3_i32 = arith.constant 3 : i32
    %c16_i32_86 = arith.constant 16 : i32
    %102 = arith.muli %c3_i32, %c16_i32_86 : i32
    %103 = tpu.assume_multiple %102, 8 : i32
    %104 = arith.index_cast %103 : i32 to index
    %c0_87 = arith.constant 0 : index
    %105 = vector.load %arg6[%104, %c0_87] : memref<120x8xf32, #tpu.memory_space<vmem>>, vector<8x8xf32>
    %c0_88 = arith.constant 0 : index
    %106 = arith.index_cast %c3_i32 : i32 to index
    %c0_89 = arith.constant 0 : index
    %c0_90 = arith.constant 0 : index
    %107 = vector.load %arg4[%c0_88, %106, %c0_89, %c0_90] : memref<1x8x8x8xbf16, #tpu.memory_space<vmem>>, vector<1x1x8x8xbf16>
    %108 = vector.shape_cast %107 : vector<1x1x8x8xbf16> to vector<8x8xbf16>
    %109 = arith.extf %108 : vector<8x8xbf16> to vector<8x8xf32>
    %110 = arith.addf %105, %109 : vector<8x8xf32>
    %cst_91 = arith.constant 0.000000e+00 : f32
    %111 = vector.broadcast %cst_91 : f32 to vector<8x8xf32>
    %112 = arith.maximumf %110, %111 : vector<8x8xf32>
    %c0_92 = arith.constant 0 : index
    %113 = arith.index_cast %c3_i32 : i32 to index
    %c0_93 = arith.constant 0 : index
    %c0_94 = arith.constant 0 : index
    %114 = vector.load %arg5[%c0_92, %113, %c0_93, %c0_94] : memref<1x8x8x8xf32, #tpu.memory_space<vmem>>, vector<1x1x8x8xf32>
    %115 = vector.shape_cast %114 : vector<1x1x8x8xf32> to vector<8x8xf32>
    %116 = vector.shape_cast %112 : vector<8x8xf32> to vector<1x1x8x8xf32>
    tpu.vector_store %arg5[%c0_92, %113, %c0_93, %c0_94], %116 {strides = array<i32>} : memref<1x8x8x8xf32, #tpu.memory_space<vmem>>, vector<1x1x8x8xf32>,
    %c4_i32 = arith.constant 4 : i32
    %c16_i32_95 = arith.constant 16 : i32
    %117 = arith.muli %c4_i32, %c16_i32_95 : i32
    %118 = tpu.assume_multiple %117, 8 : i32
    %119 = arith.index_cast %118 : i32 to index
    %c0_96 = arith.constant 0 : index
    %120 = vector.load %arg6[%119, %c0_96] : memref<120x8xf32, #tpu.memory_space<vmem>>, vector<8x8xf32>
    %c0_97 = arith.constant 0 : index
    %121 = arith.index_cast %c4_i32 : i32 to index
    %c0_98 = arith.constant 0 : index
    %c0_99 = arith.constant 0 : index
    %122 = vector.load %arg4[%c0_97, %121, %c0_98, %c0_99] : memref<1x8x8x8xbf16, #tpu.memory_space<vmem>>, vector<1x1x8x8xbf16>
    %123 = vector.shape_cast %122 : vector<1x1x8x8xbf16> to vector<8x8xbf16>
    %124 = arith.extf %123 : vector<8x8xbf16> to vector<8x8xf32>
    %125 = arith.addf %120, %124 : vector<8x8xf32>
    %cst_100 = arith.constant 0.000000e+00 : f32
    %126 = vector.broadcast %cst_100 : f32 to vector<8x8xf32>
    %127 = arith.maximumf %125, %126 : vector<8x8xf32>
    %c0_101 = arith.constant 0 : index
    %128 = arith.index_cast %c4_i32 : i32 to index
    %c0_102 = arith.constant 0 : index
    %c0_103 = arith.constant 0 : index
    %129 = vector.load %arg5[%c0_101, %128, %c0_102, %c0_103] : memref<1x8x8x8xf32, #tpu.memory_space<vmem>>, vector<1x1x8x8xf32>
    %130 = vector.shape_cast %129 : vector<1x1x8x8xf32> to vector<8x8xf32>
    %131 = vector.shape_cast %127 : vector<8x8xf32> to vector<1x1x8x8xf32>
    tpu.vector_store %arg5[%c0_101, %128, %c0_102, %c0_103], %131 {strides = array<i32>} : memref<1x8x8x8xf32, #tpu.memory_space<vmem>>, vector<1x1x8x8xf32>,
    %c5_i32 = arith.constant 5 : i32
    %c16_i32_104 = arith.constant 16 : i32
    %132 = arith.muli %c5_i32, %c16_i32_104 : i32
    %133 = tpu.assume_multiple %132, 8 : i32
    %134 = arith.index_cast %133 : i32 to index
    %c0_105 = arith.constant 0 : index
    %135 = vector.load %arg6[%134, %c0_105] : memref<120x8xf32, #tpu.memory_space<vmem>>, vector<8x8xf32>
    %c0_106 = arith.constant 0 : index
    %136 = arith.index_cast %c5_i32 : i32 to index
    %c0_107 = arith.constant 0 : index
    %c0_108 = arith.constant 0 : index
    %137 = vector.load %arg4[%c0_106, %136, %c0_107, %c0_108] : memref<1x8x8x8xbf16, #tpu.memory_space<vmem>>, vector<1x1x8x8xbf16>
    %138 = vector.shape_cast %137 : vector<1x1x8x8xbf16> to vector<8x8xbf16>
    %139 = arith.extf %138 : vector<8x8xbf16> to vector<8x8xf32>
    %140 = arith.addf %135, %139 : vector<8x8xf32>
    %cst_109 = arith.constant 0.000000e+00 : f32
    %141 = vector.broadcast %cst_109 : f32 to vector<8x8xf32>
    %142 = arith.maximumf %140, %141 : vector<8x8xf32>
    %c0_110 = arith.constant 0 : index
    %143 = arith.index_cast %c5_i32 : i32 to index
    %c0_111 = arith.constant 0 : index
    %c0_112 = arith.constant 0 : index
    %144 = vector.load %arg5[%c0_110, %143, %c0_111, %c0_112] : memref<1x8x8x8xf32, #tpu.memory_space<vmem>>, vector<1x1x8x8xf32>
    %145 = vector.shape_cast %144 : vector<1x1x8x8xf32> to vector<8x8xf32>
    %146 = vector.shape_cast %142 : vector<8x8xf32> to vector<1x1x8x8xf32>
    tpu.vector_store %arg5[%c0_110, %143, %c0_111, %c0_112], %146 {strides = array<i32>} : memref<1x8x8x8xf32, #tpu.memory_space<vmem>>, vector<1x1x8x8xf32>,
    %c6_i32 = arith.constant 6 : i32
    %c16_i32_113 = arith.constant 16 : i32
    %147 = arith.muli %c6_i32, %c16_i32_113 : i32
    %148 = tpu.assume_multiple %147, 8 : i32
    %149 = arith.index_cast %148 : i32 to index
    %c0_114 = arith.constant 0 : index
    %150 = vector.load %arg6[%149, %c0_114] : memref<120x8xf32, #tpu.memory_space<vmem>>, vector<8x8xf32>
    %c0_115 = arith.constant 0 : index
    %151 = arith.index_cast %c6_i32 : i32 to index
    %c0_116 = arith.constant 0 : index
    %c0_117 = arith.constant 0 : index
    %152 = vector.load %arg4[%c0_115, %151, %c0_116, %c0_117] : memref<1x8x8x8xbf16, #tpu.memory_space<vmem>>, vector<1x1x8x8xbf16>
    %153 = vector.shape_cast %152 : vector<1x1x8x8xbf16> to vector<8x8xbf16>
    %154 = arith.extf %153 : vector<8x8xbf16> to vector<8x8xf32>
    %155 = arith.addf %150, %154 : vector<8x8xf32>
    %cst_118 = arith.constant 0.000000e+00 : f32
    %156 = vector.broadcast %cst_118 : f32 to vector<8x8xf32>
    %157 = arith.maximumf %155, %156 : vector<8x8xf32>
    %c0_119 = arith.constant 0 : index
    %158 = arith.index_cast %c6_i32 : i32 to index
    %c0_120 = arith.constant 0 : index
    %c0_121 = arith.constant 0 : index
    %159 = vector.load %arg5[%c0_119, %158, %c0_120, %c0_121] : memref<1x8x8x8xf32, #tpu.memory_space<vmem>>, vector<1x1x8x8xf32>
    %160 = vector.shape_cast %159 : vector<1x1x8x8xf32> to vector<8x8xf32>
    %161 = vector.shape_cast %157 : vector<8x8xf32> to vector<1x1x8x8xf32>
    tpu.vector_store %arg5[%c0_119, %158, %c0_120, %c0_121], %161 {strides = array<i32>} : memref<1x8x8x8xf32, #tpu.memory_space<vmem>>, vector<1x1x8x8xf32>,
    %c7_i32 = arith.constant 7 : i32
    %c16_i32_122 = arith.constant 16 : i32
    %162 = arith.muli %c7_i32, %c16_i32_122 : i32
    %163 = tpu.assume_multiple %162, 8 : i32
    %164 = arith.index_cast %163 : i32 to index
    %c0_123 = arith.constant 0 : index
    %165 = vector.load %arg6[%164, %c0_123] : memref<120x8xf32, #tpu.memory_space<vmem>>, vector<8x8xf32>
    %c0_124 = arith.constant 0 : index
    %166 = arith.index_cast %c7_i32 : i32 to index
    %c0_125 = arith.constant 0 : index
    %c0_126 = arith.constant 0 : index
    %167 = vector.load %arg4[%c0_124, %166, %c0_125, %c0_126] : memref<1x8x8x8xbf16, #tpu.memory_space<vmem>>, vector<1x1x8x8xbf16>
    %168 = vector.shape_cast %167 : vector<1x1x8x8xbf16> to vector<8x8xbf16>
    %169 = arith.extf %168 : vector<8x8xbf16> to vector<8x8xf32>
    %170 = arith.addf %165, %169 : vector<8x8xf32>
    %cst_127 = arith.constant 0.000000e+00 : f32
    %171 = vector.broadcast %cst_127 : f32 to vector<8x8xf32>
    %172 = arith.maximumf %170, %171 : vector<8x8xf32>
    %c0_128 = arith.constant 0 : index
    %173 = arith.index_cast %c7_i32 : i32 to index
    %c0_129 = arith.constant 0 : index
    %c0_130 = arith.constant 0 : index
    %174 = vector.load %arg5[%c0_128, %173, %c0_129, %c0_130] : memref<1x8x8x8xf32, #tpu.memory_space<vmem>>, vector<1x1x8x8xf32>
    %175 = vector.shape_cast %174 : vector<1x1x8x8xf32> to vector<8x8xf32>
    %176 = vector.shape_cast %172 : vector<8x8xf32> to vector<1x1x8x8xf32>
    tpu.vector_store %arg5[%c0_128, %173, %c0_129, %c0_130], %176 {strides = array<i32>} : memref<1x8x8x8xf32, #tpu.memory_space<vmem>>, vector<1x1x8x8xf32>,
    %c8_i32 = arith.constant 8 : i32
    return
  }
  func.func @transform_0(%arg0: i32) -> (i32, i32, i32, i32) {
    %c0_i32 = arith.constant 0 : i32
    %c0_i32_0 = arith.constant 0 : i32
    %c0_i32_1 = arith.constant 0 : i32
    %c0_i32_2 = arith.constant 0 : i32
    return %arg0, %c0_i32, %c0_i32_0, %c0_i32_1 : i32, i32, i32, i32
  }
  func.func @transform_1(%arg0: i32) -> (i32, i32, i32) {
    %c0_i32 = arith.constant 0 : i32
    %c0_i32_0 = arith.constant 0 : i32
    %c0_i32_1 = arith.constant 0 : i32
    %c0_i32_2 = arith.constant 0 : i32
    return %c0_i32, %c0_i32_0, %c0_i32_1 : i32, i32, i32
  }
  func.func @transform_2(%arg0: i32) -> (i32, i32) {
    %c0_i32 = arith.constant 0 : i32
    %c0_i32_0 = arith.constant 0 : i32
    %c0_i32_1 = arith.constant 0 : i32
    return %c0_i32, %c0_i32_0 : i32, i32
  }
  func.func @transform_3(%arg0: i32) -> (i32, i32, i32, i32) {
    %c0_i32 = arith.constant 0 : i32
    %c0_i32_0 = arith.constant 0 : i32
    %c0_i32_1 = arith.constant 0 : i32
    %c0_i32_2 = arith.constant 0 : i32
    return %arg0, %c0_i32, %c0_i32_0, %c0_i32_1 : i32, i32, i32, i32
  }
  func.func @transform_4(%arg0: i32) -> (i32, i32, i32, i32) {
    %c0_i32 = arith.constant 0 : i32
    %c0_i32_0 = arith.constant 0 : i32
    %c0_i32_1 = arith.constant 0 : i32
    %c0_i32_2 = arith.constant 0 : i32
    return %arg0, %c0_i32, %c0_i32_0, %c0_i32_1 : i32, i32, i32, i32
  }
}

</mosaic_0001>

<bundles_post_ra>
// kernel: regular_basic_block.4
= control target key start
LH: loop header
LB: loop body
LE: loop exit
PB: predicated region body
PF: predicated region fallthrough
CT: control target
= control target key end

     0   :  { %s438_s12 = smov 0   ;;  %s490_s0 = inlined_call_operand.vmem [shape: bf16[2,1,64,4], index: 0, kind: input, shape index: {}]   ;;  %s491_s1 = inlined_call_operand.vmem [shape: bf16[1,4,8], index: 1, kind: input, shape index: {}]   ;;  %s492_s2 = inlined_call_operand.vmem [shape: f32[1,8], index: 2, kind: input, shape index: {}]   ;;  %s493_s3 = inlined_call_operand.vmem [shape: bf16[2,8,8,8], index: 3, kind: output, shape index: {}]  }
   0x1 LB: > { %s354_s13 = sadd.s32 4294967295, %s416_s12   ;;  %p358_p0 = scmp.ge.s32.totalorder %s416_s12, 1  ;;  %s416_s12 = sphi %s438_s12, %s13_s12  }
   0x2   : > { %p137_p1 = scmp.lt.s32.totalorder %s416_s12, 3 }
   0x4   : > { %p138_p2 = pnand %p358_p0, %p137_p1 }
   0x5   : > { %p161_p3 = scmp.lt.s32.totalorder (!%p138_p2), %s354_s13, 1 }
   0x6   : > { %141 = sbr.rel (%p138_p2) target bundleno = 171 (0xab), region = 32 }
   0xb   : > { %v180_v0 = vld [vmem:[%s491_s1] sm:$0x3]  ;;  %vm218_vm0 = vcmask 1041408   ;;  %s495_s13 = smov (!%p161_p3, %s354_s13), 1  ;;  %vm205_vm1 = vcmask 31744   ;;  %vm251_vm2 = vcmask 64512  }
   0xc   : > { %v220_v1 = vsel %vm218_vm0, %v180_v0, 0  ;;  %s392_s16 = sshll.u32 %s495_s13, 5  ;;  %v409_v6 = vld [vmem:[%s492_s2] ss:$0 sm:$0xff]  ;;  %vm262_vm3 = vcmask 60416  }
   0xd   : > { %229 = vmatpush.bf16.msra.mxu0 %v220_v1  ;;  %398 = vmatpush.bf16.msra.mxu1 %v220_v1  ;;  %s165_s19 = scalar_lea.vmem %s490_s0, %s392_s16  ;;  %s463_s24 = scalar_lea.vmem %s493_s3, %s392_s16 }
   0xe   : > { %399 = vmatpush.bf16.msra.mxu2 %v220_v1  ;;  %400 = vmatpush.bf16.msra.mxu3 %v220_v1  ;;  %v394_v2 = vld [vmem:[%s165_s19] sm:$0xff]  ;;  %v395_v3 = vld [vmem:[%s165_s19 + $0x8] sm:$0xff]  ;;  %v396_v4 = vld [vmem:[%s165_s19 + $0x10] sm:$0xff] }
   0xf   : > { %v397_v5 = vld [vmem:[%s165_s19 + $0x18] sm:$0xff] }
  0x10   : > { %379 = vmatmul.msk.bf16.vlgmr.msra.gmra.mxu0 %vm205_vm1, %v394_v2  ;;  %380 = vmatmul.msk.bf16.vlgmr.msra.gmra.mxu1 %vm205_vm1, %v395_v3 }
  0x11   : > { %381 = vmatmul.msk.bf16.vlgmr.msra.gmra.mxu2 %vm205_vm1, %v396_v4  ;;  %382 = vmatmul.msk.bf16.vlgmr.msra.gmra.mxu3 %vm205_vm1, %v397_v5 }
  0x8d   : > { %v231_v7 = vpop.f32.mrf.mxu0  ;;  %v236_v8 = vpop.f32.mrf.mxu1 }
  0x8e   : > { %v232_v9 = vadd.f32 %v409_v6, %v231_v7  ;;  %v237_v10 = vadd.f32 %v409_v6, %v236_v8 }
  0x90   : > { %252 = vst.msk [vmem:[#allocation2] sm:$0xff] %vm251_vm2, %v232_v9 }
  0x91   : > { %254 = vst.msk [vmem:[#allocation2 + $0x10] sm:$0xff] %vm251_vm2, %v237_v10 }
  0x94   : > { %v241_v11 = vpop.f32.mrf.mxu2  ;;  %v246_v12 = vpop.f32.mrf.mxu3 }
  0x95   : > { %v242_v13 = vadd.f32 %v409_v6, %v241_v11  ;;  %v247_v14 = vadd.f32 %v409_v6, %v246_v12  ;;  %v233_v15 = vpop.f32.mrf.mxu0  ;;  %v238_v16 = vpop.f32.mrf.mxu1 }
  0x96   : > { %v234_v17 = vadd.f32 %v409_v6, %v233_v15  ;;  %v239_v21 = vadd.f32 %v409_v6, %v238_v16 }
  0x97   : > { %v260_v18 = vld [vmem:[#allocation2] sm:$0xff]  ;;  %256 = vst.msk [vmem:[#allocation2 + $0x20] sm:$0xff] %vm251_vm2, %v242_v13 }
  0x98   : > { %v261_v19 = vpack.c.bf16 %v260_v18, %v260_v18  ;;  %v270_v20 = vld [vmem:[#allocation2 + $0x10] sm:$0xff]  ;;  %258 = vst.msk [vmem:[#allocation2 + $0x30] sm:$0xff] %vm251_vm2, %v247_v14 }
  0x99   : > { %v271_v22 = vpack.c.bf16 %v270_v20, %v270_v20  ;;  %253 = vst.msk [vmem:[#allocation2 + $0x8] sm:$0xff] %vm251_vm2, %v234_v17 }
  0x9a   : > { %263 = vst.msk [vmem:[%s463_s24] sm:$0xf] %vm262_vm3, %v261_v19 }
  0x9b   : > { %384 = vst.msk [vmem:[%s463_s24 + $0x8] sm:$0xf] %vm262_vm3, %v271_v22 }
  0x9c   : > { %255 = vst.msk [vmem:[#allocation2 + $0x18] sm:$0xff] %vm251_vm2, %v239_v21  ;;  %v243_v23 = vpop.f32.mrf.mxu2  ;;  %v248_v24 = vpop.f32.mrf.mxu3 }
  0x9d   : > { %v244_v25 = vadd.f32 %v409_v6, %v243_v23  ;;  %v249_v26 = vadd.f32 %v409_v6, %v248_v24 }
  0x9e   : > { %v280_v27 = vld [vmem:[#allocation2 + $0x20] sm:$0xff] }
  0x9f   : > { %v281_v28 = vpack.c.bf16 %v280_v27, %v280_v27  ;;  %v290_v29 = vld [vmem:[#allocation2 + $0x30] sm:$0xff]  ;;  %257 = vst.msk [vmem:[#allocation2 + $0x28] sm:$0xff] %vm251_vm2, %v244_v25 }
  0xa0   : > { %v291_v30 = vpack.c.bf16 %v290_v29, %v290_v29  ;;  %v265_v31 = vld [vmem:[#allocation2 + $0x8] sm:$0xff]  ;;  %259 = vst.msk [vmem:[#allocation2 + $0x38] sm:$0xff] %vm251_vm2, %v249_v26 }
  0xa1   : > { %386 = vst.msk [vmem:[%s463_s24 + $0x10] sm:$0xf] %vm262_vm3, %v281_v28  ;;  %v266_v32 = vpack.c.bf16 %v265_v31, %v265_v31 }
  0xa2   : > { %388 = vst.msk [vmem:[%s463_s24 + $0x18] sm:$0xf] %vm262_vm3, %v291_v30 }
  0xa3   : > { %383 = vst.msk [vmem:[%s463_s24 + $0x4] sm:$0xf] %vm262_vm3, %v266_v32  ;;  %v275_v33 = vld [vmem:[#allocation2 + $0x18] sm:$0xff] }
  0xa4   : > { %v276_v34 = vpack.c.bf16 %v275_v33, %v275_v33 }
  0xa6   : > { %385 = vst.msk [vmem:[%s463_s24 + $0xc] sm:$0xf] %vm262_vm3, %v276_v34  ;;  %v285_v35 = vld [vmem:[#allocation2 + $0x28] sm:$0xff] }
  0xa7   : > { %v286_v36 = vpack.c.bf16 %v285_v35, %v285_v35  ;;  %v295_v37 = vld [vmem:[#allocation2 + $0x38] sm:$0xff] }
  0xa8   : > { %v296_v38 = vpack.c.bf16 %v295_v37, %v295_v37 }
  0xa9   : > { %387 = vst.msk [vmem:[%s463_s24 + $0x14] sm:$0xf] %vm262_vm3, %v286_v36 }
  0xaa   : > { %389 = vst.msk [vmem:[%s463_s24 + $0x1c] sm:$0xf] %vm262_vm3, %v296_v38 }
  0xab PF: > { %s13_s12 = sadd.s32 1, %s416_s12  }
  0xac   : > { %p10_p4 = scmp.ge.s32.totalorder %s13_s12, 4  }
  0xae   :  { %12 = sbr.rel (!%p10_p4) target bundleno = 1 (0x1), region = 76 }

// kernel: regular_basic_block.3
= control target key start
LH: loop header
LB: loop body
LE: loop exit
PB: predicated region body
PF: predicated region fallthrough
CT: control target
= control target key end

     0   :  { %s2406_s15 = smov 0   ;;  %s2727_s0 = inlined_call_operand.vmem [shape: bf16[2,4,144,4], index: 0, kind: input, shape index: {}]   ;;  %s2728_s1 = inlined_call_operand.vmem [shape: bf16[9,4,8], index: 1, kind: input, shape index: {}]   ;;  %s2729_s2 = inlined_call_operand.vmem [shape: f32[1,8], index: 2, kind: input, shape index: {}]   ;;  %s2730_s3 = inlined_call_operand.vmem [shape: f32[1,8], index: 3, kind: input, shape index: {}]   ;;  %s2731_s4 = inlined_call_operand.vmem [shape: bf16[2,8,8,8], index: 4, kind: output, shape index: {}]  }
   0x1 LB: > { %s1855_s16 = sadd.s32 4294967295, %s2379_s15   ;;  %p1859_p0 = scmp.ge.s32.totalorder %s2379_s15, 1  ;;  %s2379_s15 = sphi %s2406_s15, %s14_s15  }
   0x2   : > { %p162_p1 = scmp.lt.s32.totalorder %s2379_s15, 3 }
   0x4   : > { %p163_p2 = pnand %p1859_p0, %p162_p1 }
   0x5   : > { %p188_p3 = scmp.lt.s32.totalorder (!%p163_p2), %s1855_s16, 1 }
   0x6   : > { %166 = sbr.rel (%p163_p2) target bundleno = 445 (0x1bd), region = 36 }
   0xb   : > { %v1878_v0 = vld [vmem:[%s2728_s1 + $0x2] sm:$0x3]  ;;  %vm296_vm0 = vcmask 1041408   ;;  %v1951_v2 = vld [vmem:[%s2728_s1 + $0x4] sm:$0x3]  ;;  %s2733_s16 = smov (!%p188_p3, %s1855_s16), 1 }
   0xc   : > { %v298_v1 = vsel %vm296_vm0, %v1878_v0, 0  ;;  %v2007_v3 = vld [vmem:[%s2728_s1 + $0x6] sm:$0x3]  ;;  %v608_v4 = vsel %vm296_vm0, %v1951_v2, 0  ;;  %v214_v6 = vld [vmem:[%s2728_s1] sm:$0x3] }
   0xd   : > { %2359 = vmatpush.bf16.msra.mxu1 %v298_v1  ;;  %2360 = vmatpush.bf16.msra.mxu2 %v298_v1  ;;  %v754_v5 = vsel %vm296_vm0, %v2007_v3, 0  ;;  %v411_v7 = vsel %vm296_vm0, %v214_v6, 0  ;;  %v2059_v8 = vld [vmem:[%s2728_s1 + $0x8] sm:$0x3]  ;;  %s2362_s27 = smul.u32 288, %s2733_s16  ;;  %vm271_vm1 = vcmask 31744  }
   0xe   : > { %2361 = vmatpush.bf16.msra.mxu3 %v298_v1  ;;  %307 = vmatpush.bf16.msra.mxu0 %v298_v1  ;;  %v900_v9 = vsel %vm296_vm0, %v2059_v8, 0  ;;  %v2153_v14 = vld [vmem:[%s2728_s1 + $0xc] sm:$0x3]  ;;  %v2205_v15 = vld [vmem:[%s2728_s1 + $0xe] sm:$0x3]  ;;  %vm1745_vm4 = vcmask 64512  }
   0xf   : > { %s2440_s30 = scalar_lea.vmem %s2727_s0, %s2362_s27  ;;  %v2112_v16 = vld [vmem:[%s2728_s1 + $0xa] sm:$0x3]  ;;  %v1256_v17 = vsel %vm296_vm0, %v2153_v14, 0  ;;  %v1401_v18 = vsel %vm296_vm0, %v2205_v15, 0  ;;  %v2242_v20 = vld [vmem:[%s2728_s1 + $0x10] sm:$0x3] }
  0x10   : > { %v2302_v10 = vld [vmem:[%s2440_s30 + $0x58] sm:$0xff]  ;;  %v2304_v11 = vld [vmem:[%s2440_s30 + $0x68] sm:$0xff]  ;;  %v1111_v19 = vsel %vm296_vm0, %v2112_v16, 0  ;;  %v1612_v21 = vsel %vm296_vm0, %v2242_v20, 0  ;;  %v1877_v22 = vld [vmem:[%s2440_s30 + $0x80] sm:$0xf] }
  0x11   : > { %617 = vmatpush.bf16.msrb.mxu2 %v608_v4  ;;  %420 = vmatpush.bf16.msrb.mxu1 %v411_v7  ;;  %v2306_v12 = vld [vmem:[%s2440_s30 + $0x78] sm:$0xff]  ;;  %v2300_v13 = vld [vmem:[%s2440_s30 + $0x48] sm:$0xff]  ;;  %v262_v23 = vunpack.c.l.b16 %v1877_v22  ;;  %v2303_v24 = vld [vmem:[%s2440_s30 + $0x60] sm:$0xff]  ;;  %vm519_vm2 = vsmask.f32 7424  ;;  %s2292_s19 = sshll.u32 %s2733_s16, 5 }
  0x12   : > { %763 = vmatpush.bf16.msrb.mxu3 %v754_v5  ;;  %909 = vmatpush.bf16.msrb.mxu0 %v900_v9  ;;  %v2305_v25 = vld [vmem:[%s2440_s30 + $0x70] sm:$0xff]  ;;  %v2307_v28 = vld [vmem:[%s2440_s30] sm:$0xff]  ;;  %v2308_v29 = vld [vmem:[%s2440_s30 + $0x8] sm:$0xff]  ;;  %s2679_s22 = scalar_lea.vmem %s2731_s4, %s2292_s19  ;;  %vm1763_vm5 = vcmask 60416  }
  0x13   : > { %1909 = vmatmul.msk.bf16.vlgmr.msra.gmra.mxu1 %vm271_vm1, %v2302_v10  ;;  %1911 = vmatmul.msk.bf16.vlgmr.msra.gmra.mxu2 %vm271_vm1, %v2304_v11  ;;  %v270_v26 = vpack.c.b16 %v262_v23, %v262_v23  ;;  %v2301_v27 = vld [vmem:[%s2440_s30 + $0x50] sm:$0xff]  ;;  %v523_v30 = vshll.u32 %v2307_v28, 16  ;;  %v521_v31 = vshrl.u32 %v2307_v28, 16  ;;  %v528_v33 = vshll.u32 %v2308_v29, 16  ;;  %v2293_v36 = vld [vmem:[%s2440_s30] sm:$0xff]  ;;  %v2322_v39 = vld [vmem:[%s2440_s30 + $0xd8] sm:$0xff] }
  0x14   : > { %1913 = vmatmul.msk.bf16.vlgmr.msra.gmra.mxu3 %vm271_vm1, %v2306_v12  ;;  %1907 = vmatmul.msk.bf16.vlgmr.msra.gmra.mxu0 %vm271_vm1, %v2300_v13  ;;  %v2315_v38 = vld [vmem:[%s2440_s30 + $0x90] sm:$0xff]  ;;  %v532_v41 = vshrl.u32 %v2308_v29, 16  ;;  %v2294_v45 = vld [vmem:[%s2440_s30 + $0x8] sm:$0xff]  ;;  %v2316_v47 = vld [vmem:[%s2440_s30 + $0x98] sm:$0xff] }
  0x15   : > { %1265 = vmatpush.bf16.msra.mxu2 %v1256_v17  ;;  %1120 = vmatpush.bf16.msra.mxu1 %v1111_v19  ;;  %v525_v32 = vrot.slane %v523_v30, 1  ;;  %v530_v35 = vrot.slane %v528_v33, 1  ;;  %v2309_v40 = vld [vmem:[%s2440_s30 + $0x10] sm:$0xff]  ;;  %v2323_v48 = vld [vmem:[%s2440_s30 + $0xe0] sm:$0xff]  ;;  %v2310_v49 = vld [vmem:[%s2440_s30 + $0x18] sm:$0xff] }
  0x16   : > { %1410 = vmatpush.bf16.msra.mxu3 %v1401_v18  ;;  %1621 = vmatpush.bf16.msra.mxu0 %v1612_v21  ;;  %v536_v42 = vshll.u32 %v2309_v40, 16  ;;  %v540_v50 = vshrl.u32 %v2309_v40, 16  ;;  %v544_v51 = vshll.u32 %v2310_v49, 16  ;;  %v2295_v54 = vld [vmem:[%s2440_s30 + $0x10] sm:$0xff]  ;;  %v2317_v56 = vld [vmem:[%s2440_s30 + $0xa0] sm:$0xff]  ;;  %v2324_v57 = vld [vmem:[%s2440_s30 + $0xe8] sm:$0xff] }
  0x17   : > { %v526_v34 = vor.u32 %v525_v32, %v521_v31  ;;  %v534_v43 = vor.u32 %v532_v41, %v530_v35  ;;  %v2311_v58 = vld [vmem:[%s2440_s30 + $0x20] sm:$0xff]  ;;  %v548_v59 = vshrl.u32 %v2310_v49, 16  ;;  %v2296_v63 = vld [vmem:[%s2440_s30 + $0x18] sm:$0xff]  ;;  %v2318_v1 = vld [vmem:[%s2440_s30 + $0xa8] sm:$0xff] }
  0x18   : > { %v538_v44 = vrot.slane %v536_v42, 1  ;;  %v546_v53 = vrot.slane %v544_v51, 1  ;;  %v552_v60 = vshll.u32 %v2311_v58, 16  ;;  %v2325_v2 = vld [vmem:[%s2440_s30 + $0xf0] sm:$0xff]  ;;  %v2312_v3 = vld [vmem:[%s2440_s30 + $0x28] sm:$0xff]  ;;  %v556_v4 = vshrl.u32 %v2311_v58, 16 }
  0x19   : > { %v531_v37 = vsel %vm519_vm2, %v526_v34, %v530_v35  ;;  %v560_v5 = vshll.u32 %v2312_v3, 16  ;;  %v2297_v8 = vld [vmem:[%s2440_s30 + $0x20] sm:$0xff]  ;;  %v2319_v10 = vld [vmem:[%s2440_s30 + $0xb0] sm:$0xff]  ;;  %v2326_v11 = vld [vmem:[%s2440_s30 + $0xf8] sm:$0xff]  ;;  %v564_v13 = vshrl.u32 %v2312_v3, 16 }
  0x1a   : > { %v539_v46 = vsel %vm519_vm2, %v534_v43, %v538_v44  ;;  %v542_v52 = vor.u32 %v540_v50, %v538_v44  ;;  %v550_v61 = vor.u32 %v548_v59, %v546_v53  ;;  %v554_v62 = vrot.slane %v552_v60, 1  ;;  %v2313_v12 = vld [vmem:[%s2440_s30 + $0x30] sm:$0xff]  ;;  %v2298_v17 = vld [vmem:[%s2440_s30 + $0x28] sm:$0xff]  ;;  %v2320_v19 = vld [vmem:[%s2440_s30 + $0xb8] sm:$0xff] }
  0x1b   : > { %v562_v7 = vrot.slane %v560_v5, 1  ;;  %v568_v14 = vshll.u32 %v2313_v12, 16  ;;  %v2327_v20 = vld [vmem:[%s2440_s30 + $0x100] sm:$0xff]  ;;  %v1982_v21 = vld [vmem:[%s2440_s30 + $0x38] sm:$0xf]  ;;  %v2299_v28 = vld [vmem:[%s2440_s30 + $0x30] sm:$0xff] }
  0x1c   : > { %v547_v55 = vsel %vm519_vm2, %v542_v52, %v546_v53  ;;  %v555_v0 = vsel %vm519_vm2, %v550_v61, %v554_v62  ;;  %v558_v6 = vor.u32 %v556_v4, %v554_v62  ;;  %v2314_v22 = vld [vmem:[%s2440_s30 + $0x38] sm:$0x10]  ;;  %v2321_v31 = vld [vmem:[%s2440_s30 + $0xc0] sm:$0xff]  ;;  %v2328_v32 = vld [vmem:[%s2440_s30 + $0x108] sm:$0xff] }
  0x1d   : > { %v566_v15 = vor.u32 %v564_v13, %v562_v7  ;;  %v570_v16 = vrot.slane %v568_v14, 1  ;;  %v1983_v23 = vor.u32 %v2314_v22, %v1982_v21  ;;  %v2058_v40 = vld [vmem:[%s2440_s30 + $0x110] sm:$0xf] }
  0x1e   : > { %v563_v9 = vsel %vm519_vm2, %v558_v6, %v562_v7  ;;  %v866_v44 = vunpack.c.l.b16 %v2058_v40  ;;  %v2329_v52 = vld [vmem:[%s2440_s30 + $0x90] sm:$0xff] }
  0x1f   : > { %v571_v18 = vsel %vm519_vm2, %v566_v15, %v570_v16  ;;  %v580_v42 = vshrl.u32 %v1983_v23, 16  ;;  %v1024_v62 = vshrl.u32 %v2329_v52, 16  ;;  %v2344_v14 = vld [vmem:[%s2440_s30 + $0x50] sm:$0xff] }
  0x20   : > { %v874_v51 = vpack.c.b16 %v866_v44, %v866_v44  ;;  %v2338_v40 = vld [vmem:[%s2440_s30 + $0x10] sm:$0xff] }
  0x23   : > { %1910 = vmatmul.msk.bf16.gmra.mxu1 %vm271_vm1, %v2303_v24  ;;  %1912 = vmatmul.msk.bf16.gmra.mxu2 %vm271_vm1, %v2305_v25  ;;  %v572_v24 = vshrl.u32 %v2313_v12, 16  ;;  %v576_v25 = vshll.u32 %v1983_v23, 16 }
  0x24   : > { %1914 = vmatmul.msk.bf16.gmra.mxu3 %vm271_vm1, %v270_v26  ;;  %1908 = vmatmul.msk.bf16.gmra.mxu0 %vm271_vm1, %v2301_v27 }
  0x25   : > { %v574_v26 = vor.u32 %v572_v24, %v570_v16  ;;  %v578_v27 = vrot.slane %v576_v25, 1 }
  0x27   : > { %v579_v30 = vsel %vm519_vm2, %v574_v26, %v578_v27 }
  0x33   : > { %1943 = vmatmul.msk.bf16.vlgmr.msrb.gmra.mxu1 %vm271_vm1, %v2293_v36  ;;  %1984 = vmatmul.msk.bf16.vlgmr.msrb.gmra.mxu2 %vm271_vm1, %v531_v37  ;;  %v213_v37 = vld [vmem:[%s2440_s30 + $0x38] sm:$0xf] }
  0x34   : > { %2036 = vmatmul.msk.bf16.vlgmr.msrb.gmra.mxu3 %vm271_vm1, %v2315_v38  ;;  %2088 = vmatmul.msk.bf16.vlgmr.msrb.gmra.mxu0 %vm271_vm1, %v2322_v39  ;;  %v2006_v39 = vld [vmem:[%s2440_s30 + $0xc8] sm:$0xf]  ;;  %v377_v41 = vunpack.c.l.b16 %v213_v37 }
  0x35   : > { %v720_v43 = vunpack.c.l.b16 %v2006_v39 }
  0x37   : > { %v728_v50 = vpack.c.b16 %v720_v43, %v720_v43  ;;  %v2345_v43 = vld [vmem:[%s2440_s30 + $0x58] sm:$0xff] }
  0x43   : > { %1944 = vmatmul.msk.bf16.gmra.mxu1 %vm271_vm1, %v2294_v45  ;;  %1985 = vmatmul.msk.bf16.gmra.mxu2 %vm271_vm1, %v539_v46 }
  0x44   : > { %2037 = vmatmul.msk.bf16.gmra.mxu3 %vm271_vm1, %v2316_v47  ;;  %2089 = vmatmul.msk.bf16.gmra.mxu0 %vm271_vm1, %v2323_v48  ;;  %v385_v47 = vpack.c.b16 %v377_v41, %v377_v41  ;;  %v582_v48 = vor.u32 %v580_v42, %v578_v27 }
  0x53   : > { %1945 = vmatmul.msk.bf16.gmra.mxu1 %vm271_vm1, %v2295_v54  ;;  %1986 = vmatmul.msk.bf16.gmra.mxu2 %vm271_vm1, %v547_v55  ;;  %v2351_v54 = vld [vmem:[%s2440_s30 + $0x8] sm:$0xff]  ;;  %v2330_v55 = vld [vmem:[%s2440_s30 + $0x98] sm:$0xff] }
  0x54   : > { %2038 = vmatmul.msk.bf16.gmra.mxu3 %vm271_vm1, %v2317_v56  ;;  %2090 = vmatmul.msk.bf16.gmra.mxu0 %vm271_vm1, %v2324_v57  ;;  %v1026_v56 = vshll.u32 %v2329_v52, 16  ;;  %v2352_v57 = vld [vmem:[%s2440_s30 + $0x10] sm:$0xff]  ;;  %v1527_v58 = vshll.u32 %v2351_v54, 16  ;;  %v1035_v24 = vshrl.u32 %v2330_v55, 16 }
  0x55   : > { %v1532_v4 = vshll.u32 %v2352_v57, 16 }
  0x56   : > { %v1529_v3 = vrot.slane %v1527_v58, 1 }
  0x63   : > { %1946 = vmatmul.msk.bf16.gmra.mxu1 %vm271_vm1, %v2296_v63  ;;  %1987 = vmatmul.msk.bf16.gmra.mxu2 %vm271_vm1, %v555_v0  ;;  %v1028_v63 = vrot.slane %v1026_v56, 1  ;;  %v1031_v0 = vshll.u32 %v2330_v55, 16 }
  0x64   : > { %2039 = vmatmul.msk.bf16.gmra.mxu3 %vm271_vm1, %v2318_v1  ;;  %2091 = vmatmul.msk.bf16.gmra.mxu0 %vm271_vm1, %v2325_v2  ;;  %v1525_v2 = vshrl.u32 %v2351_v54, 16 }
  0x65   : > { %v1029_v5 = vor.u32 %v1028_v63, %v1024_v62  ;;  %v1033_v6 = vrot.slane %v1031_v0, 1 }
  0x66   : > { %v1530_v7 = vor.u32 %v1529_v3, %v1525_v2 }
  0x67   : > { %v1034_v13 = vsel %vm519_vm2, %v1029_v5, %v1033_v6  ;;  %v2339_v5 = vld [vmem:[%s2440_s30 + $0x18] sm:$0xff] }
  0x73   : > { %1947 = vmatmul.msk.bf16.gmra.mxu1 %vm271_vm1, %v2297_v8  ;;  %1988 = vmatmul.msk.bf16.gmra.mxu2 %vm271_vm1, %v563_v9  ;;  %v1534_v8 = vrot.slane %v1532_v4, 1 }
  0x74   : > { %2040 = vmatmul.msk.bf16.gmra.mxu3 %vm271_vm1, %v2319_v10  ;;  %2092 = vmatmul.msk.bf16.gmra.mxu0 %vm271_vm1, %v2326_v11  ;;  %v2337_v11 = vld [vmem:[%s2440_s30 + $0x8] sm:$0xff] }
  0x83   : > { %1948 = vmatmul.msk.bf16.gmra.mxu1 %vm271_vm1, %v2298_v17  ;;  %1989 = vmatmul.msk.bf16.gmra.mxu2 %vm271_vm1, %v571_v18  ;;  %v1535_v17 = vsel %vm519_vm2, %v1530_v7, %v1534_v8  ;;  %v2331_v18 = vld [vmem:[%s2440_s30 + $0xa0] sm:$0xff] }
  0x84   : > { %2041 = vmatmul.msk.bf16.gmra.mxu3 %vm271_vm1, %v2320_v19  ;;  %2093 = vmatmul.msk.bf16.gmra.mxu0 %vm271_vm1, %v2327_v20  ;;  %v2353_v19 = vld [vmem:[%s2440_s30 + $0x18] sm:$0xff]  ;;  %v1039_v25 = vshll.u32 %v2331_v18, 16  ;;  %v1043_v55 = vshrl.u32 %v2331_v18, 16 }
  0x85   : > { %v1544_v58 = vshrl.u32 %v2353_v19, 16 }
  0x90   : > { %v2532_v29 = vpop.f32.mrf.mxu1 }
  0x91   : > { %v309_v33 = vpop.f32.mrf.mxu0 }
  0x93   : > { %1949 = vmatmul.msk.bf16.gmra.mxu1 %vm271_vm1, %v2299_v28  ;;  %1990 = vmatmul.msk.bf16.gmra.mxu2 %vm271_vm1, %v579_v30  ;;  %v1536_v28 = vshrl.u32 %v2352_v57, 16  ;;  %v1540_v30 = vshll.u32 %v2353_v19, 16 }
  0x94   : > { %2042 = vmatmul.msk.bf16.gmra.mxu3 %vm271_vm1, %v2321_v31  ;;  %2094 = vmatmul.msk.bf16.gmra.mxu0 %vm271_vm1, %v2328_v32  ;;  %v1037_v32 = vor.u32 %v1035_v24, %v1033_v6 }
  0x95   : > { %v1542_v37 = vrot.slane %v1540_v30, 1 }
  0x96   : > { %v2541_v34 = vpop.f32.mrf.mxu2 }
  0x97   : > { %v2543_v35 = vpop.f32.mrf.mxu3 }
  0x98   : > { %v321_v36 = vpop.f32.mrf.mxu1 }
  0x99   : > { %v311_v38 = vpop.f32.mrf.mxu0  ;;  %v1538_v36 = vor.u32 %v1536_v28, %v1534_v8  ;;  %v2346_v8 = vld [vmem:[%s2440_s30 + $0x60] sm:$0xff] }
  0x9e   : > { %v331_v45 = vpop.f32.mrf.mxu2 }
  0x9f   : > { %v341_v46 = vpop.f32.mrf.mxu3 }
  0xa0   : > { %v2548_v49 = vpop.f32.mrf.mxu1  ;;  %v1543_v46 = vsel %vm519_vm2, %v1538_v36, %v1542_v37 }
  0xa1   : > { %v314_v53 = vpop.f32.mrf.mxu0 }
  0xa3   : > { %1950 = vmatmul.msk.bf16.gmra.mxu1 %vm271_vm1, %v385_v47  ;;  %1991 = vmatmul.msk.bf16.gmra.mxu2 %vm271_vm1, %v582_v48  ;;  %v2332_v47 = vld [vmem:[%s2440_s30 + $0xa8] sm:$0xff]  ;;  %v2354_v48 = vld [vmem:[%s2440_s30 + $0x20] sm:$0xff] }
  0xa4   : > { %2043 = vmatmul.msk.bf16.gmra.mxu3 %vm271_vm1, %v728_v50  ;;  %2095 = vmatmul.msk.bf16.gmra.mxu0 %vm271_vm1, %v874_v51  ;;  %v1051_v18 = vshrl.u32 %v2332_v47, 16 }
  0xa6   : > { %v2558_v59 = vpop.f32.mrf.mxu2 }
  0xa7   : > { %v2560_v60 = vpop.f32.mrf.mxu3 }
  0xa8   : > { %v326_v61 = vpop.f32.mrf.mxu1 }
  0xa9   : > { %v316_v1 = vpop.f32.mrf.mxu0  ;;  %v1548_v61 = vshll.u32 %v2354_v48, 16 }
  0xaa   : > { %v1546_v1 = vor.u32 %v1544_v58, %v1542_v37  ;;  %v2347_v37 = vld [vmem:[%s2440_s30 + $0x68] sm:$0xff] }
  0xab   : > { %v1550_v2 = vrot.slane %v1548_v61, 1 }
  0xae   : > { %v336_v9 = vpop.f32.mrf.mxu2 }
  0xaf   : > { %v346_v10 = vpop.f32.mrf.mxu3 }
  0xb0   : > { %v422_v12 = vpop.f32.mrf.mxu1 }
  0xb1   : > { %v423_v15 = vadd.f32 %v422_v12, %v309_v33  ;;  %v911_v16 = vpop.f32.mrf.mxu0  ;;  %v1041_v33 = vrot.slane %v1039_v25, 1  ;;  %v2333_v12 = vld [vmem:[%s2440_s30 + $0xb0] sm:$0xff] }
  0xb3   : > { %2145 = vmatmul.msk.bf16.vlgmr.msra.gmra.mxu1 %vm271_vm1, %v1034_v13  ;;  %2182 = vmatmul.msk.bf16.vlgmr.msra.gmra.mxu2 %vm271_vm1, %v2337_v11  ;;  %v1042_v42 = vsel %vm519_vm2, %v1037_v32, %v1041_v33  ;;  %v1045_v63 = vor.u32 %v1043_v55, %v1041_v33  ;;  %v1551_v11 = vsel %vm519_vm2, %v1546_v1, %v1550_v2  ;;  %v2355_v13 = vld [vmem:[%s2440_s30 + $0x28] sm:$0xff]  ;;  %v2340_v32 = vld [vmem:[%s2440_s30 + $0x20] sm:$0xff] }
  0xb4   : > { %2234 = vmatmul.msk.bf16.vlgmr.msra.gmra.mxu3 %vm271_vm1, %v2344_v14  ;;  %2275 = vmatmul.msk.bf16.vlgmr.msra.gmra.mxu0 %vm271_vm1, %v1535_v17 }
  0xb6   : > { %v619_v20 = vpop.f32.mrf.mxu2 }
  0xb7   : > { %v658_v21 = vadd.f32 %v619_v20, %v423_v15  ;;  %v765_v22 = vpop.f32.mrf.mxu3 }
  0xb8   : > { %v424_v23 = vpop.f32.mrf.mxu1 }
  0xb9   : > { %v804_v26 = vadd.f32 %v765_v22, %v658_v21  ;;  %v913_v27 = vpop.f32.mrf.mxu0  ;;  %v1552_v21 = vshrl.u32 %v2354_v48, 16  ;;  %v1556_v22 = vshll.u32 %v2355_v13, 16 }
  0xbb   : > { %v2572_v31 = vadd.f32 %v911_v16, %v804_v26  ;;  %v1554_v26 = vor.u32 %v1552_v21, %v1550_v2  ;;  %v1558_v27 = vrot.slane %v1556_v22, 1  ;;  %v2348_v2 = vld [vmem:[%s2440_s30 + $0x70] sm:$0xff] }
  0xbe   : > { %v621_v38 = vpop.f32.mrf.mxu2 }
  0xbf   : > { %v767_v39 = vpop.f32.mrf.mxu3 }
  0xc0   : > { %v427_v41 = vpop.f32.mrf.mxu1 }
  0xc1   : > { %v428_v44 = vadd.f32 %v427_v41, %v314_v53  ;;  %v916_v45 = vpop.f32.mrf.mxu0  ;;  %v1047_v53 = vshll.u32 %v2332_v47, 16  ;;  %v2334_v41 = vld [vmem:[%s2440_s30 + $0xb8] sm:$0xff]  ;;  %v1059_v47 = vshrl.u32 %v2333_v12, 16 }
  0xc3   : > { %2146 = vmatmul.msk.bf16.gmra.mxu1 %vm271_vm1, %v1042_v42  ;;  %2183 = vmatmul.msk.bf16.gmra.mxu2 %vm271_vm1, %v2338_v40  ;;  %v1049_v0 = vrot.slane %v1047_v53, 1  ;;  %v1559_v40 = vsel %vm519_vm2, %v1554_v26, %v1558_v27  ;;  %v2356_v42 = vld [vmem:[%s2440_s30 + $0x30] sm:$0xff] }
  0xc4   : > { %2235 = vmatmul.msk.bf16.gmra.mxu3 %vm271_vm1, %v2345_v43  ;;  %2276 = vmatmul.msk.bf16.gmra.mxu0 %vm271_vm1, %v1543_v46 }
  0xc5   : > { %v1050_v7 = vsel %vm519_vm2, %v1045_v63, %v1049_v0  ;;  %v1053_v24 = vor.u32 %v1051_v18, %v1049_v0  ;;  %v2341_v63 = vld [vmem:[%s2440_s30 + $0x28] sm:$0xff] }
  0xc6   : > { %v624_v50 = vpop.f32.mrf.mxu2 }
  0xc7   : > { %v660_v51 = vadd.f32 %v624_v50, %v428_v44  ;;  %v770_v52 = vpop.f32.mrf.mxu3 }
  0xc8   : > { %v429_v54 = vpop.f32.mrf.mxu1 }
  0xc9   : > { %v806_v56 = vadd.f32 %v770_v52, %v660_v51  ;;  %v918_v57 = vpop.f32.mrf.mxu0  ;;  %v1560_v51 = vshrl.u32 %v2355_v13, 16  ;;  %v1564_v52 = vshll.u32 %v2356_v42, 16 }
  0xcb   : > { %v2584_v62 = vadd.f32 %v916_v45, %v806_v56  ;;  %v1562_v56 = vor.u32 %v1560_v51, %v1558_v27  ;;  %v1566_v57 = vrot.slane %v1564_v52, 1  ;;  %v2349_v27 = vld [vmem:[%s2440_s30 + $0x78] sm:$0xff] }
  0xce   : > { %v626_v3 = vpop.f32.mrf.mxu2 }
  0xcf   : > { %v772_v4 = vpop.f32.mrf.mxu3 }
  0xd0   : > { %v432_v6 = vpop.f32.mrf.mxu1  ;;  %v1567_v4 = vsel %vm519_vm2, %v1562_v56, %v1566_v57 }
  0xd1   : > { %v433_v9 = vadd.f32 %v432_v6, %v2532_v29  ;;  %v921_v10 = vpop.f32.mrf.mxu0  ;;  %v1055_v29 = vshll.u32 %v2333_v12, 16  ;;  %v1067_v12 = vshrl.u32 %v2334_v41, 16 }
  0xd3   : > { %2147 = vmatmul.msk.bf16.gmra.mxu1 %vm271_vm1, %v1050_v7  ;;  %2184 = vmatmul.msk.bf16.gmra.mxu2 %vm271_vm1, %v2339_v5  ;;  %v1057_v25 = vrot.slane %v1055_v29, 1  ;;  %v2335_v5 = vld [vmem:[%s2440_s30 + $0xc0] sm:$0xff]  ;;  %v2357_v7 = vld [vmem:[%s2440_s30 + $0x38] sm:$0xff] }
  0xd4   : > { %2236 = vmatmul.msk.bf16.gmra.mxu3 %vm271_vm1, %v2346_v8  ;;  %2277 = vmatmul.msk.bf16.gmra.mxu0 %vm271_vm1, %v1551_v11  ;;  %v1071_v13 = vshll.u32 %v2335_v5, 16 }
  0xd5   : > { %v1058_v36 = vsel %vm519_vm2, %v1053_v24, %v1057_v25  ;;  %v1061_v55 = vor.u32 %v1059_v47, %v1057_v25  ;;  %v2342_v24 = vld [vmem:[%s2440_s30 + $0x30] sm:$0xff] }
  0xd6   : > { %v629_v14 = vpop.f32.mrf.mxu2  ;;  %v1073_v29 = vrot.slane %v1071_v13, 1 }
  0xd7   : > { %v662_v15 = vadd.f32 %v629_v14, %v433_v9  ;;  %v775_v16 = vpop.f32.mrf.mxu3 }
  0xd8   : > { %v434_v17 = vpop.f32.mrf.mxu1 }
  0xd9   : > { %v808_v19 = vadd.f32 %v775_v16, %v662_v15  ;;  %v923_v20 = vpop.f32.mrf.mxu0  ;;  %v1568_v16 = vshrl.u32 %v2356_v42, 16  ;;  %v1572_v17 = vshll.u32 %v2357_v7, 16 }
  0xdb   : > { %v2597_v23 = vadd.f32 %v921_v10, %v808_v19  ;;  %v1570_v19 = vor.u32 %v1568_v16, %v1566_v57  ;;  %v1574_v20 = vrot.slane %v1572_v17, 1 }
  0xde   : > { %v631_v28 = vpop.f32.mrf.mxu2 }
  0xdf   : > { %v777_v30 = vpop.f32.mrf.mxu3 }
  0xe0   : > { %v437_v33 = vpop.f32.mrf.mxu1  ;;  %v1575_v30 = vsel %vm519_vm2, %v1570_v19, %v1574_v20 }
  0xe1   : > { %v438_v38 = vadd.f32 %v437_v33, %v2548_v49  ;;  %v926_v39 = vpop.f32.mrf.mxu0  ;;  %v1063_v49 = vshll.u32 %v2334_v41, 16  ;;  %v2336_v33 = vld [vmem:[%s2440_s30 + $0xc8] sm:$0x10] }
  0xe3   : > { %2148 = vmatmul.msk.bf16.gmra.mxu1 %vm271_vm1, %v1058_v36  ;;  %2185 = vmatmul.msk.bf16.gmra.mxu2 %vm271_vm1, %v2340_v32  ;;  %v1065_v53 = vrot.slane %v1063_v49, 1  ;;  %v2143_v32 = vld [vmem:[%s2440_s30 + $0xc8] sm:$0xf]  ;;  %v2273_v36 = vld [vmem:[%s2440_s30 + $0x40] sm:$0xf] }
  0xe4   : > { %2237 = vmatmul.msk.bf16.gmra.mxu3 %vm271_vm1, %v2347_v37  ;;  %2278 = vmatmul.msk.bf16.gmra.mxu0 %vm271_vm1, %v1559_v40  ;;  %v2358_v37 = vld [vmem:[%s2440_s30 + $0x40] sm:$0x10] }
  0xe5   : > { %v1066_v1 = vsel %vm519_vm2, %v1061_v55, %v1065_v53  ;;  %v2274_v40 = vor.u32 %v2358_v37, %v2273_v36 }
  0xe6   : > { %v634_v43 = vpop.f32.mrf.mxu2 }
  0xe7   : > { %v664_v44 = vadd.f32 %v634_v43, %v438_v38  ;;  %v780_v45 = vpop.f32.mrf.mxu3  ;;  %v2144_v38 = vor.u32 %v2336_v33, %v2143_v32  ;;  %v1584_v16 = vshrl.u32 %v2274_v40, 16 }
  0xe8   : > { %v439_v46 = vpop.f32.mrf.mxu1 }
  0xe9   : > { %v810_v48 = vadd.f32 %v780_v45, %v664_v44  ;;  %v928_v50 = vpop.f32.mrf.mxu0  ;;  %v1075_v45 = vshrl.u32 %v2335_v5, 16  ;;  %v1079_v46 = vshll.u32 %v2144_v38, 16 }
  0xea   : > { %v1580_v50 = vshll.u32 %v2274_v40, 16 }
  0xeb   : > { %v2610_v54 = vadd.f32 %v926_v39, %v810_v48  ;;  %v1576_v48 = vshrl.u32 %v2357_v7, 16  ;;  %v1077_v52 = vor.u32 %v1075_v45, %v1073_v29  ;;  %v1081_v55 = vrot.slane %v1079_v46, 1 }
  0xec   : > { %v1582_v56 = vrot.slane %v1580_v50, 1 }
  0xee   : > { %v636_v58 = vpop.f32.mrf.mxu2 }
  0xef   : > { %v782_v61 = vpop.f32.mrf.mxu3  ;;  %v2343_v58 = vld [vmem:[%s2440_s30 + $0x38] sm:$0xff] }
  0xf0   : > { %v442_v0 = vpop.f32.mrf.mxu1 }
  0xf1   : > { %v931_v3 = vpop.f32.mrf.mxu0  ;;  %v443_v6 = vadd.f32 %v442_v0, %v2541_v34  ;;  %v1069_v34 = vor.u32 %v1067_v12, %v1065_v53  ;;  %v1578_v53 = vor.u32 %v1576_v48, %v1574_v20  ;;  %v2350_v0 = vld [vmem:[%s2440_s30 + $0x80] sm:$0xff]  ;;  %v1083_v12 = vshrl.u32 %v2144_v38, 16 }
  0xf3   : > { %2149 = vmatmul.msk.bf16.gmra.mxu1 %vm271_vm1, %v1066_v1  ;;  %2186 = vmatmul.msk.bf16.gmra.mxu2 %vm271_vm1, %v2341_v63  ;;  %v1074_v26 = vsel %vm519_vm2, %v1069_v34, %v1073_v29  ;;  %v1082_v63 = vsel %vm519_vm2, %v1077_v52, %v1081_v55  ;;  %v1085_v29 = vor.u32 %v1083_v12, %v1081_v55 }
  0xf4   : > { %2238 = vmatmul.msk.bf16.gmra.mxu3 %vm271_vm1, %v2348_v2  ;;  %2279 = vmatmul.msk.bf16.gmra.mxu0 %vm271_vm1, %v1567_v4  ;;  %v1583_v2 = vsel %vm519_vm2, %v1578_v53, %v1582_v56 }
  0xf6   : > { %v639_v8 = vpop.f32.mrf.mxu2 }
  0xf7   : > { %v666_v9 = vadd.f32 %v639_v8, %v443_v6  ;;  %v785_v10 = vpop.f32.mrf.mxu3  ;;  %v1190_v8 = vld [vmem:[%s2440_s30 + $0x40] sm:$0xf] }
  0xf8   : > { %v444_v11 = vpop.f32.mrf.mxu1  ;;  %v1222_v13 = vunpack.c.l.b16 %v1190_v8 }
  0xf9   : > { %v812_v14 = vadd.f32 %v785_v10, %v666_v9  ;;  %v933_v15 = vpop.f32.mrf.mxu0  ;;  %v2204_v11 = vld [vmem:[%s2440_s30 + $0x88] sm:$0xf] }
  0xfa   : > { %v1367_v15 = vunpack.c.l.b16 %v2204_v11  ;;  %v1230_v19 = vpack.c.b16 %v1222_v13, %v1222_v13 }
  0xfb   : > { %v2623_v18 = vadd.f32 %v931_v3, %v812_v14 }
  0xfe   : > { %v641_v21 = vpop.f32.mrf.mxu2 }
  0xff   : > { %v787_v22 = vpop.f32.mrf.mxu3  ;;  %v1586_v21 = vor.u32 %v1584_v16, %v1582_v56 }
 0x100   : > { %v447_v25 = vpop.f32.mrf.mxu1 }
 0x101   : > { %v936_v28 = vpop.f32.mrf.mxu0  ;;  %v448_v39 = vadd.f32 %v447_v25, %v2558_v59 }
 0x103   : > { %2150 = vmatmul.msk.bf16.gmra.mxu1 %vm271_vm1, %v1074_v26  ;;  %2187 = vmatmul.msk.bf16.gmra.mxu2 %vm271_vm1, %v2342_v24 }
 0x104   : > { %2239 = vmatmul.msk.bf16.gmra.mxu3 %vm271_vm1, %v2349_v27  ;;  %2280 = vmatmul.msk.bf16.gmra.mxu0 %vm271_vm1, %v1575_v30 }
 0x106   : > { %v644_v41 = vpop.f32.mrf.mxu2 }
 0x107   : > { %v668_v42 = vadd.f32 %v644_v41, %v448_v39  ;;  %v790_v43 = vpop.f32.mrf.mxu3 }
 0x108   : > { %v449_v44 = vpop.f32.mrf.mxu1 }
 0x109   : > { %v814_v47 = vadd.f32 %v790_v43, %v668_v42  ;;  %v938_v49 = vpop.f32.mrf.mxu0 }
 0x10a   : > { %v2669_v49 = vld [vmem:[%s2730_s3] ss:$0 sm:$0xff] }
 0x10b   : > { %v2638_v51 = vadd.f32 %v936_v28, %v814_v47 }
 0x10e   : > { %v646_v59 = vpop.f32.mrf.mxu2 }
 0x10f   : > { %v792_v57 = vpop.f32.mrf.mxu3 }
 0x110   : > { %v452_v61 = vpop.f32.mrf.mxu1 }
 0x111   : > { %v941_v1 = vpop.f32.mrf.mxu0  ;;  %v453_v3 = vadd.f32 %v452_v61, %v2543_v35  ;;  %v1375_v35 = vpack.c.b16 %v1367_v15, %v1367_v15 }
 0x113   : > { %2151 = vmatmul.msk.bf16.gmra.mxu1 %vm271_vm1, %v1082_v63  ;;  %2188 = vmatmul.msk.bf16.gmra.mxu2 %vm271_vm1, %v2343_v58 }
 0x114   : > { %2240 = vmatmul.msk.bf16.gmra.mxu3 %vm271_vm1, %v2350_v0  ;;  %2281 = vmatmul.msk.bf16.gmra.mxu0 %vm271_vm1, %v1583_v2 }
 0x116   : > { %v649_v4 = vpop.f32.mrf.mxu2 }
 0x117   : > { %v670_v5 = vadd.f32 %v649_v4, %v453_v3  ;;  %v795_v6 = vpop.f32.mrf.mxu3 }
 0x118   : > { %v454_v7 = vpop.f32.mrf.mxu1 }
 0x119   : > { %v816_v9 = vadd.f32 %v795_v6, %v670_v5  ;;  %v943_v10 = vpop.f32.mrf.mxu0 }
 0x11b   : > { %v2651_v14 = vadd.f32 %v941_v1, %v816_v9 }
 0x11e   : > { %v651_v17 = vpop.f32.mrf.mxu2 }
 0x11f   : > { %v797_v34 = vpop.f32.mrf.mxu3 }
 0x120   : > { %v457_v20 = vpop.f32.mrf.mxu1 }
 0x121   : > { %v946_v22 = vpop.f32.mrf.mxu0  ;;  %v458_v24 = vadd.f32 %v457_v20, %v2560_v60  ;;  %v2664_v60 = vld [vmem:[%s2729_s2] ss:$0 sm:$0xff] }
 0x123   : > { %2152 = vmatmul.msk.bf16.gmra.mxu1 %vm271_vm1, %v1085_v29  ;;  %2189 = vmatmul.msk.bf16.gmra.mxu2 %vm271_vm1, %v1230_v19 }
 0x124   : > { %2241 = vmatmul.msk.bf16.gmra.mxu3 %vm271_vm1, %v1375_v35  ;;  %2282 = vmatmul.msk.bf16.gmra.mxu0 %vm271_vm1, %v1586_v21 }
 0x126   : > { %v654_v25 = vpop.f32.mrf.mxu2 }
 0x127   : > { %v672_v26 = vadd.f32 %v654_v25, %v458_v24  ;;  %v800_v27 = vpop.f32.mrf.mxu3 }
 0x128   : > { %v459_v28 = vpop.f32.mrf.mxu1 }
 0x129   : > { %v818_v30 = vadd.f32 %v800_v27, %v672_v26  ;;  %v948_v32 = vpop.f32.mrf.mxu0 }
 0x12b   : > { %v2658_v33 = vadd.f32 %v946_v22, %v818_v30 }
 0x12e   : > { %v656_v36 = vpop.f32.mrf.mxu2 }
 0x12f   : > { %v802_v37 = vpop.f32.mrf.mxu3 }
 0x130   : > { %v1122_v38 = vpop.f32.mrf.mxu1 }
 0x131   : > { %v1623_v39 = vpop.f32.mrf.mxu0  ;;  %v1161_v40 = vadd.f32 %v1122_v38, %v2572_v31 }
 0x136   : > { %v1267_v41 = vpop.f32.mrf.mxu2 }
 0x137   : > { %v1306_v42 = vadd.f32 %v1267_v41, %v1161_v40  ;;  %v1412_v43 = vpop.f32.mrf.mxu3 }
 0x138   : > { %v1124_v44 = vpop.f32.mrf.mxu1 }
 0x139   : > { %v1451_v45 = vadd.f32 %v1412_v43, %v1306_v42  ;;  %v1625_v46 = vpop.f32.mrf.mxu0 }
 0x13b   : > { %v1662_v47 = vadd.f32 %v1623_v39, %v1451_v45 }
 0x13d   : > { %v1681_v31 = vadd.f32 %v2664_v60, %v1662_v47 }
 0x13e   : > { %v1269_v48 = vpop.f32.mrf.mxu2 }
 0x13f   : > { %vm1696_vm3 = vcmp.ge.f32.partialorder %v1681_v31, 0.0  ;;  %v1715_v50 = vmul.f32 %v2669_v49, %v1681_v31  ;;  %v1414_v52 = vpop.f32.mrf.mxu3 }
 0x140   : > { %v1127_v55 = vpop.f32.mrf.mxu1 }
 0x141   : > { %v1730_v53 = vsel %vm1696_vm3, %v1681_v31, %v1715_v50  ;;  %v1628_v56 = vpop.f32.mrf.mxu0  ;;  %v1163_v59 = vadd.f32 %v1127_v55, %v2584_v62 }
 0x142   : > { %1746 = vst.msk [vmem:[#allocation2] sm:$0xff] %vm1745_vm4, %v1730_v53 }
 0x146   : > { %v1272_v57 = vpop.f32.mrf.mxu2 }
 0x147   : > { %v1308_v58 = vadd.f32 %v1272_v57, %v1163_v59  ;;  %v1417_v61 = vpop.f32.mrf.mxu3 }
 0x148   : > { %v1129_v63 = vpop.f32.mrf.mxu1 }
 0x149   : > { %v1761_v0 = vld [vmem:[#allocation2] sm:$0xff]  ;;  %v1453_v1 = vadd.f32 %v1417_v61, %v1308_v58  ;;  %v1630_v2 = vpop.f32.mrf.mxu0 }
 0x14a   : > { %v1762_v3 = vpack.c.bf16 %v1761_v0, %v1761_v0 }
 0x14b   : > { %v1664_v4 = vadd.f32 %v1628_v56, %v1453_v1 }
 0x14c   : > { %1764 = vst.msk [vmem:[%s2679_s22] sm:$0xf] %vm1763_vm5, %v1762_v3 }
 0x14d   : > { %v1683_v62 = vadd.f32 %v2664_v60, %v1664_v4 }
 0x14e   : > { %v1274_v5 = vpop.f32.mrf.mxu2 }
 0x14f   : > { %vm1698_vm6 = vcmp.ge.f32.partialorder %v1683_v62, 0.0  ;;  %v1717_v6 = vmul.f32 %v2669_v49, %v1683_v62  ;;  %v1419_v7 = vpop.f32.mrf.mxu3 }
 0x150   : > { %v1132_v8 = vpop.f32.mrf.mxu1 }
 0x151   : > { %v1732_v9 = vsel %vm1698_vm6, %v1683_v62, %v1717_v6  ;;  %v1633_v10 = vpop.f32.mrf.mxu0  ;;  %v1165_v11 = vadd.f32 %v1132_v8, %v2597_v23 }
 0x152   : > { %1748 = vst.msk [vmem:[#allocation2 + $0x10] sm:$0xff] %vm1745_vm4, %v1732_v9 }
 0x156   : > { %v1277_v12 = vpop.f32.mrf.mxu2 }
 0x157   : > { %v1310_v13 = vadd.f32 %v1277_v12, %v1165_v11  ;;  %v1422_v15 = vpop.f32.mrf.mxu3 }
 0x158   : > { %v1134_v16 = vpop.f32.mrf.mxu1 }
 0x159   : > { %v1766_v17 = vld [vmem:[#allocation2 + $0x10] sm:$0xff]  ;;  %v1455_v34 = vadd.f32 %v1422_v15, %v1310_v13  ;;  %v1635_v29 = vpop.f32.mrf.mxu0 }
 0x15a   : > { %v1767_v19 = vpack.c.bf16 %v1766_v17, %v1766_v17 }
 0x15b   : > { %v1666_v20 = vadd.f32 %v1633_v10, %v1455_v34 }
 0x15c   : > { %2283 = vst.msk [vmem:[%s2679_s22 + $0x4] sm:$0xf] %vm1763_vm5, %v1767_v19 }
 0x15d   : > { %v1685_v35 = vadd.f32 %v2664_v60, %v1666_v20 }
 0x15e   : > { %v1279_v21 = vpop.f32.mrf.mxu2 }
 0x15f   : > { %vm1700_vm7 = vcmp.ge.f32.partialorder %v1685_v35, 0.0  ;;  %v1719_v22 = vmul.f32 %v2669_v49, %v1685_v35  ;;  %v1424_v24 = vpop.f32.mrf.mxu3 }
 0x160   : > { %v1137_v23 = vpop.f32.mrf.mxu1 }
 0x161   : > { %v1734_v25 = vsel %vm1700_vm7, %v1685_v35, %v1719_v22  ;;  %v1638_v26 = vpop.f32.mrf.mxu0  ;;  %v1167_v27 = vadd.f32 %v1137_v23, %v2610_v54 }
 0x162   : > { %1750 = vst.msk [vmem:[#allocation2 + $0x20] sm:$0xff] %vm1745_vm4, %v1734_v25 }
 0x166   : > { %v1282_v28 = vpop.f32.mrf.mxu2 }
 0x167   : > { %v1312_v30 = vadd.f32 %v1282_v28, %v1167_v27  ;;  %v1427_v32 = vpop.f32.mrf.mxu3 }
 0x168   : > { %v1139_v36 = vpop.f32.mrf.mxu1 }
 0x169   : > { %v1771_v37 = vld [vmem:[#allocation2 + $0x20] sm:$0xff]  ;;  %v1457_v38 = vadd.f32 %v1427_v32, %v1312_v30  ;;  %v1640_v39 = vpop.f32.mrf.mxu0 }
 0x16a   : > { %v1772_v40 = vpack.c.bf16 %v1771_v37, %v1771_v37 }
 0x16b   : > { %v1668_v41 = vadd.f32 %v1638_v26, %v1457_v38 }
 0x16c   : > { %2284 = vst.msk [vmem:[%s2679_s22 + $0x8] sm:$0xf] %vm1763_vm5, %v1772_v40 }
 0x16d   : > { %v1687_v42 = vadd.f32 %v2664_v60, %v1668_v41 }
 0x16e   : > { %v1284_v43 = vpop.f32.mrf.mxu2 }
 0x16f   : > { %vm1702_vm8 = vcmp.ge.f32.partialorder %v1687_v42, 0.0  ;;  %v1721_v44 = vmul.f32 %v2669_v49, %v1687_v42  ;;  %v1429_v45 = vpop.f32.mrf.mxu3 }
 0x170   : > { %v1142_v54 = vpop.f32.mrf.mxu1 }
 0x171   : > { %v1736_v46 = vsel %vm1702_vm8, %v1687_v42, %v1721_v44  ;;  %v1643_v47 = vpop.f32.mrf.mxu0  ;;  %v1169_v31 = vadd.f32 %v1142_v54, %v2623_v18 }
 0x172   : > { %1752 = vst.msk [vmem:[#allocation2 + $0x30] sm:$0xff] %vm1745_vm4, %v1736_v46 }
 0x176   : > { %v1287_v48 = vpop.f32.mrf.mxu2 }
 0x177   : > { %v1314_v50 = vadd.f32 %v1287_v48, %v1169_v31  ;;  %v1432_v52 = vpop.f32.mrf.mxu3 }
 0x178   : > { %v1144_v55 = vpop.f32.mrf.mxu1 }
 0x179   : > { %v1776_v53 = vld [vmem:[#allocation2 + $0x30] sm:$0xff]  ;;  %v1459_v56 = vadd.f32 %v1432_v52, %v1314_v50  ;;  %v1645_v59 = vpop.f32.mrf.mxu0 }
 0x17a   : > { %v1777_v57 = vpack.c.bf16 %v1776_v53, %v1776_v53 }
 0x17b   : > { %v1670_v58 = vadd.f32 %v1643_v47, %v1459_v56 }
 0x17c   : > { %2285 = vst.msk [vmem:[%s2679_s22 + $0xc] sm:$0xf] %vm1763_vm5, %v1777_v57 }
 0x17d   : > { %v1689_v61 = vadd.f32 %v2664_v60, %v1670_v58 }
 0x17e   : > { %v1289_v63 = vpop.f32.mrf.mxu2 }
 0x17f   : > { %vm1704_vm9 = vcmp.ge.f32.partialorder %v1689_v61, 0.0  ;;  %v1723_v0 = vmul.f32 %v2669_v49, %v1689_v61  ;;  %v1434_v1 = vpop.f32.mrf.mxu3 }
 0x180   : > { %v1147_v18 = vpop.f32.mrf.mxu1 }
 0x181   : > { %v1738_v2 = vsel %vm1704_vm9, %v1689_v61, %v1723_v0  ;;  %v1648_v3 = vpop.f32.mrf.mxu0  ;;  %v1171_v4 = vadd.f32 %v1147_v18, %v2638_v51 }
 0x182   : > { %1754 = vst.msk [vmem:[#allocation2 + $0x40] sm:$0xff] %vm1745_vm4, %v1738_v2 }
 0x186   : > { %v1292_v62 = vpop.f32.mrf.mxu2 }
 0x187   : > { %v1316_v5 = vadd.f32 %v1292_v62, %v1171_v4  ;;  %v1437_v6 = vpop.f32.mrf.mxu3 }
 0x188   : > { %v1149_v7 = vpop.f32.mrf.mxu1 }
 0x189   : > { %v1781_v8 = vld [vmem:[#allocation2 + $0x40] sm:$0xff]  ;;  %v1461_v9 = vadd.f32 %v1437_v6, %v1316_v5  ;;  %v1650_v10 = vpop.f32.mrf.mxu0 }
 0x18a   : > { %v1782_v11 = vpack.c.bf16 %v1781_v8, %v1781_v8 }
 0x18b   : > { %v1672_v12 = vadd.f32 %v1648_v3, %v1461_v9 }
 0x18c   : > { %2286 = vst.msk [vmem:[%s2679_s22 + $0x10] sm:$0xf] %vm1763_vm5, %v1782_v11 }
 0x18d   : > { %v1691_v13 = vadd.f32 %v2664_v60, %v1672_v12 }
 0x18e   : > { %v1294_v15 = vpop.f32.mrf.mxu2 }
 0x18f   : > { %vm1706_vm10 = vcmp.ge.f32.partialorder %v1691_v13, 0.0  ;;  %v1725_v16 = vmul.f32 %v2669_v49, %v1691_v13  ;;  %v1439_v17 = vpop.f32.mrf.mxu3 }
 0x190   : > { %v1152_v51 = vpop.f32.mrf.mxu1 }
 0x191   : > { %v1740_v34 = vsel %vm1706_vm10, %v1691_v13, %v1725_v16  ;;  %v1653_v29 = vpop.f32.mrf.mxu0  ;;  %v1173_v19 = vadd.f32 %v1152_v51, %v2651_v14 }
 0x192   : > { %1756 = vst.msk [vmem:[#allocation2 + $0x50] sm:$0xff] %vm1745_vm4, %v1740_v34 }
 0x196   : > { %v1297_v20 = vpop.f32.mrf.mxu2 }
 0x197   : > { %v1318_v35 = vadd.f32 %v1297_v20, %v1173_v19  ;;  %v1442_v21 = vpop.f32.mrf.mxu3 }
 0x198   : > { %v1154_v22 = vpop.f32.mrf.mxu1 }
 0x199   : > { %v1786_v24 = vld [vmem:[#allocation2 + $0x50] sm:$0xff]  ;;  %v1463_v23 = vadd.f32 %v1442_v21, %v1318_v35  ;;  %v1655_v25 = vpop.f32.mrf.mxu0 }
 0x19a   : > { %v1787_v26 = vpack.c.bf16 %v1786_v24, %v1786_v24 }
 0x19b   : > { %v1674_v27 = vadd.f32 %v1653_v29, %v1463_v23 }
 0x19c   : > { %2287 = vst.msk [vmem:[%s2679_s22 + $0x14] sm:$0xf] %vm1763_vm5, %v1787_v26 }
 0x19d   : > { %v1693_v28 = vadd.f32 %v2664_v60, %v1674_v27 }
 0x19e   : > { %v1299_v30 = vpop.f32.mrf.mxu2 }
 0x19f   : > { %vm1708_vm11 = vcmp.ge.f32.partialorder %v1693_v28, 0.0  ;;  %v1727_v32 = vmul.f32 %v2669_v49, %v1693_v28  ;;  %v1444_v36 = vpop.f32.mrf.mxu3 }
 0x1a0   : > { %v1157_v14 = vpop.f32.mrf.mxu1 }
 0x1a1   : > { %v1742_v37 = vsel %vm1708_vm11, %v1693_v28, %v1727_v32  ;;  %v1658_v38 = vpop.f32.mrf.mxu0  ;;  %v1175_v39 = vadd.f32 %v1157_v14, %v2658_v33 }
 0x1a2   : > { %1758 = vst.msk [vmem:[#allocation2 + $0x60] sm:$0xff] %vm1745_vm4, %v1742_v37 }
 0x1a6   : > { %v1302_v40 = vpop.f32.mrf.mxu2 }
 0x1a7   : > { %v1320_v41 = vadd.f32 %v1302_v40, %v1175_v39  ;;  %v1447_v42 = vpop.f32.mrf.mxu3 }
 0x1a8   : > { %v1159_v43 = vpop.f32.mrf.mxu1 }
 0x1a9   : > { %v1791_v44 = vld [vmem:[#allocation2 + $0x60] sm:$0xff]  ;;  %v1465_v45 = vadd.f32 %v1447_v42, %v1320_v41  ;;  %v1660_v54 = vpop.f32.mrf.mxu0 }
 0x1aa   : > { %v1792_v46 = vpack.c.bf16 %v1791_v44, %v1791_v44 }
 0x1ab   : > { %v1676_v47 = vadd.f32 %v1658_v38, %v1465_v45 }
 0x1ac   : > { %2288 = vst.msk [vmem:[%s2679_s22 + $0x18] sm:$0xf] %vm1763_vm5, %v1792_v46 }
 0x1ad   : > { %v1695_v31 = vadd.f32 %v2664_v60, %v1676_v47 }
 0x1ae   : > { %v1304_v48 = vpop.f32.mrf.mxu2 }
 0x1af   : > { %vm1710_vm12 = vcmp.ge.f32.partialorder %v1695_v31, 0.0  ;;  %v1729_v50 = vmul.f32 %v2669_v49, %v1695_v31  ;;  %v1449_v52 = vpop.f32.mrf.mxu3 }
 0x1b1   : > { %v1744_v33 = vsel %vm1710_vm12, %v1695_v31, %v1729_v50 }
 0x1b2   : > { %1760 = vst.msk [vmem:[#allocation2 + $0x70] sm:$0xff] %vm1745_vm4, %v1744_v33 }
 0x1b9   : > { %v1796_v55 = vld [vmem:[#allocation2 + $0x70] sm:$0xff] }
 0x1ba   : > { %v1797_v53 = vpack.c.bf16 %v1796_v55, %v1796_v55 }
 0x1bc   : > { %2289 = vst.msk [vmem:[%s2679_s22 + $0x1c] sm:$0xf] %vm1763_vm5, %v1797_v53 }
 0x1bd PF: > { %s14_s15 = sadd.s32 1, %s2379_s15  }
 0x1be   : > { %p11_p4 = scmp.ge.s32.totalorder %s14_s15, 4  }
 0x1c0   :  { %13 = sbr.rel (!%p11_p4) target bundleno = 1 (0x1), region = 91 }

// kernel: regular_basic_block.5
= control target key start
LH: loop header
LB: loop body
LE: loop exit
PB: predicated region body
PF: predicated region fallthrough
CT: control target
= control target key end

     0   :  { %9 = vsyncpa [#allocation4], 0  ;;  %s2635_s0 = inlined_call_operand.vmem [shape: bf16[2,1,160,8], index: 0, kind: input, shape index: {}]   ;;  %s2636_s1 = inlined_call_operand.vmem [shape: bf16[9,8,8], index: 1, kind: input, shape index: {}]   ;;  %s2637_s2 = inlined_call_operand.vmem [shape: f32[1,8], index: 2, kind: input, shape index: {}]   ;;  %s2638_s3 = inlined_call_operand.vmem [shape: bf16[2,8,8,8], index: 3, kind: input, shape index: {}]   ;;  %s2639_s4 = inlined_call_operand.hbm [shape: f32[2,8,8,8], index: 4, kind: output, shape index: {}]  }
   0x1   :  { %11 = vsyncpa [#allocation4 + $0x1], 0  ;;  %s2164_s15 = smov 0   ;;  %s2166_s16 = smov 0  }
   0x2   :  { %s2168_s17 = smov 0   ;;  %s2170_s18 = smov 0  }
   0x3 LB: > { %s2185_s19 = sadd.s32 4294967295, %s2135_s18   ;;  %s1725_s20 = sadd.s32 4294967294, %s2135_s18   ;;  %s2135_s18 = sphi %s2170_s18, %s2645_s18   ;;  %s2131_s17 = sphi %s2168_s17, %s2644_s17   ;;  %s2127_s16 = sphi %s2166_s16, %s2643_s16   ;;  %s2123_s15 = sphi %s2164_s15, %s2642_s15  }
   0x4   : > { %s2189_s21 = sadd.s32 1, %s2135_s18   ;;  %s118_s22 = sadd.s32 1, %s2131_s17 }
   0x5   : > { %s115_s23 = ssub.s32 %s2135_s18, %s2189_s21  ;;  %p128_p0 = scmp.ne.s32.totalorder %s2131_s17, %s2127_s16 }
   0x6   : > { %p116_p1 = scmp.eq.s32.totalorder %s115_s23, 0  ;;  %p129_p2 = scmp.eq.s32.totalorder %s2185_s19, 1 }
   0x7   : > { %p134_p3 = scmp.ne.s32.totalorder %s2127_s16, %s2123_s15  ;;  %p135_p4 = scmp.eq.s32.totalorder %s1725_s20, 1 }
   0x8   : > { %s2200_s24 = scalar_select %p116_p1, %s2131_s17, %s118_s22  }
   0x9   : > { %p2202_p5 = por %p129_p2, %p128_p0  ;;  %p2206_p6 = por %p135_p4, %p134_p3 }
   0xa   : > { %p1728_p7 = scmp.ge.s32.totalorder %s2135_s18, 1  ;;  %p175_p8 = scmp.lt.s32.totalorder %s2135_s18, 3 }
   0xc   : > { %p176_p9 = pnand %p1728_p7, %p175_p8 }
   0xd   : > { %p206_p10 = scmp.lt.s32.totalorder (!%p176_p9), %s2185_s19, 1  ;;  %s203_s14 = sand.u32 (!%p176_p9), 1, %s2127_s16  }
   0xe   : > { %179 = sbr.rel (%p176_p9) target bundleno = 462 (0x1ce), region = 36  ;;  %s2003_s22 = sshll.u32 (!%p176_p9), %s2185_s19, 6 }
   0xf   : > { %s1647_s28 = scalar_lea.hbm (!%p176_p9), %s2639_s4, %s2003_s22  ;;  %s1636_s5 = scalar_lea.sflag (!%p176_p9), [#allocation4], %s203_s14 }
  0x10   : > { %s1650_s30 = sshll.u32 (!%p176_p9), %s1647_s28, 4  ;;  %s1651_s30 = int_to_ptr.hbm [resolvable:$true] %s1650_s30 }
  0x11   : > { %s2087_s6 = sshra.s32 (!%p176_p9), %s1651_s30, 4  ;;  %s2088_s6 = int_to_ptr.hbm [resolvable:$true] %s2087_s6 }
  0x12   : > { %p2094_p0 = scmp.lt.s32.totalorder (!%p176_p9), %s2088_s6, %s2639_s4 }
  0x13   : > { %v1733_v0 = vld [vmem:[%s2636_s1 + $0x4] sm:$0xf]  ;;  %vm365_vm0 = vcmask 1043456   ;;  %v1774_v2 = vld [vmem:[%s2636_s1 + $0x8] sm:$0xf]  ;;  %s2224_s7 = scalar_select %p206_p10, %s2185_s19, 1 }
  0x14   : > { %v367_v1 = vsel %vm365_vm0, %v1733_v0, 0  ;;  %v1783_v3 = vld [vmem:[%s2636_s1 + $0xc] sm:$0xf]  ;;  %v533_v4 = vsel %vm365_vm0, %v1774_v2, 0  ;;  %v232_v6 = vld [vmem:[%s2636_s1] sm:$0xf] }
  0x15   : > { %2027 = vmatpush.bf16.msra.mxu1 %v367_v1  ;;  %2028 = vmatpush.bf16.msra.mxu2 %v367_v1  ;;  %v678_v5 = vsel %vm365_vm0, %v1783_v3, 0  ;;  %v436_v7 = vsel %vm365_vm0, %v232_v6, 0  ;;  %v1820_v8 = vld [vmem:[%s2636_s1 + $0x10] sm:$0xf]  ;;  %s2030_s12 = smul.u32 80, %s2224_s7  ;;  %vm340_vm2 = vcmask 64512  }
  0x16   : > { %2029 = vmatpush.bf16.msra.mxu3 %v367_v1  ;;  %376 = vmatpush.bf16.msra.mxu0 %v367_v1  ;;  %v889_v9 = vsel %vm365_vm0, %v1820_v8, 0  ;;  %vm276_vm1 = vsmask.f32 7424  ;;  %v1866_v50 = vld [vmem:[%s2636_s1 + $0x18] sm:$0xf]  ;;  %vm492_vm3 = vcmask 1046528  }
  0x17   : > { %s2240_s20 = scalar_lea.vmem %s2635_s0, %s2030_s12  ;;  %v1145_v52 = vsel %vm365_vm0, %v1866_v50, 0  ;;  %v1903_v53 = vld [vmem:[%s2636_s1 + $0x1c] sm:$0xf]  ;;  %v1857_v56 = vld [vmem:[%s2636_s1 + $0x14] sm:$0xf]  ;;  %s1968_s10 = sshll.u32 %s2224_s7, 5 }
  0x18   : > { %v2243_v10 = vld [vmem:[%s2240_s20 + $0x10] sm:$0xff]  ;;  %v2246_v11 = vld [vmem:[%s2240_s20 + $0x18] sm:$0xff]  ;;  %v2249_v12 = vld [vmem:[%s2240_s20 + $0x20] sm:$0xff]  ;;  %v1356_v55 = vsel %vm365_vm0, %v1903_v53, 0  ;;  %v1000_v58 = vsel %vm365_vm0, %v1857_v56, 0  ;;  %s2551_s13 = scalar_lea.vmem %s2638_s3, %s1968_s10  ;;  %s1729_s7 = sshll.u32 %s203_s14, 6 }
  0x19   : > { %542 = vmatpush.bf16.msrb.mxu2 %v533_v4  ;;  %445 = vmatpush.bf16.msrb.mxu1 %v436_v7  ;;  %v2252_v13 = vld [vmem:[%s2240_s20 + $0x28] sm:$0xff]  ;;  %v2255_v14 = vld [vmem:[%s2240_s20 + $0x30] sm:$0xff]  ;;  %v231_v15 = vld [vmem:[%s2240_s20 + $0x38] sm:$0xf]  ;;  %v293_v16 = vshll.u32 %v2243_v10, 16  ;;  %v297_v17 = vshrl.u32 %v2243_v10, 16 }
  0x1a   : > { %687 = vmatpush.bf16.msrb.mxu3 %v678_v5  ;;  %898 = vmatpush.bf16.msrb.mxu0 %v889_v9  ;;  %v301_v18 = vshll.u32 %v2246_v11, 16  ;;  %v309_v19 = vshll.u32 %v2249_v12, 16  ;;  %v233_v20 = vld [vmem:[%s2240_s20 + $0x3c] sm:$0x1]  ;;  %v313_v21 = vshrl.u32 %v2249_v12, 16  ;;  %v317_v22 = vshll.u32 %v2252_v13, 16 }
  0x1b   : > { %v2265_v23 = vunpack.c.l.b16 %v231_v15  ;;  %v267_v24 = vunpack.c.l.b16 %v233_v20  ;;  %v2268_v25 = vld [vmem:[%s2240_s20] sm:$0xff]   ;;  %v2271_v26 = vld [vmem:[%s2240_s20 + $0x8] sm:$0xff]  ;;  %v295_v27 = vrot.slane %v293_v16, 1  ;;  %v325_v30 = vshll.u32 %v2255_v14, 16  ;;  %v2321_v9 = vld [vmem:[%s2240_s20 + $0x10] sm:$0xff]  ;;  %s2089_s19 = scalar_lea.hbm %s2088_s6, 64 }
  0x1c   : > { %v303_v28 = vrot.slane %v301_v18, 1  ;;  %v311_v29 = vrot.slane %v309_v19, 1  ;;  %v319_v31 = vrot.slane %v317_v22, 1  ;;  %v329_v33 = vshrl.u32 %v2255_v14, 16  ;;  %v1940_v57 = vld [vmem:[%s2636_s1 + $0x20] sm:$0xf]  ;;  %p2090_p11 = scmp.ne.s32.totalorder %s2088_s6, %s2089_s19 }
  0x1d   : > { %v2275_v32 = vpack.c.b16 %v267_v24, %v2265_v23  ;;  %v278_v34 = vshrl.u32 %v2268_v25, 16  ;;  %v299_v35 = vor.u32 %v297_v17, %v295_v27  ;;  %v327_v37 = vrot.slane %v325_v30, 1  ;;  %v2016_v5 = vld [vmem:[%s2240_s20] sm:$0xf0]  ;;  %v2017_v6 = vld [vmem:[%s2240_s20] sm:$0xe] }
  0x1e   : > { %v315_v36 = vor.u32 %v313_v21, %v311_v29  ;;  %v280_v38 = vshll.u32 %v2268_v25, 16  ;;  %v285_v40 = vshll.u32 %v2271_v26, 16  ;;  %v305_v51 = vshrl.u32 %v2246_v11, 16  ;;  %v2019_v7 = vld [vmem:[%s2240_s20 + $0x8] sm:$0xff]   ;;  %p2091_p12 = pnand %p2090_p11, %p2202_p5  ;;  %s2093_s10 = scalar_lea.hbm %s2639_s4, 128 }
  0x1f   : > { %v333_v39 = vshll.u32 %v2275_v32, 16  ;;  %v304_v41 = vsel %vm276_vm1, %v299_v35, %v303_v28  ;;  %v331_v43 = vor.u32 %v329_v33, %v327_v37  ;;  %v321_v54 = vshrl.u32 %v2252_v13, 16  ;;  %p2095_p1 = scmp.lt.s32.totalorder %s2093_s10, %s2089_s19 }
  0x20   : > { %v320_v42 = vsel %vm276_vm1, %v315_v36, %v319_v31  ;;  %v282_v44 = vrot.slane %v280_v38, 1  ;;  %1760 = vmatmul.msk.bf16.vlgmr.msra.gmra.mxu1 %vm340_vm2, %v304_v41  ;;  %v287_v46 = vrot.slane %v285_v40, 1  ;;  %v1467_v59 = vsel %vm365_vm0, %v1940_v57, 0  ;;  %v1976_v36 = vld [vmem:[%s2240_s20 + $0x10] sm:$0xff]  ;;  %v2348_v38 = vld [vmem:[%s2240_s20 + $0x20] sm:$0xff]  ;;  %p2092_p13 = pneg %p2091_p12 }
  0x21   : > { %1762 = vmatmul.msk.bf16.vlgmr.msra.gmra.mxu2 %vm340_vm2, %v320_v42  ;;  %v335_v45 = vrot.slane %v333_v39, 1  ;;  %1009 = vmatpush.bf16.msra.mxu1 %v1000_v58  ;;  %v307_v60 = vor.u32 %v305_v51, %v303_v28  ;;  %v323_v61 = vor.u32 %v321_v54, %v319_v31  ;;  %v289_v62 = vshrl.u32 %v2271_v26, 16  ;;  %v2376_v54 = vld [vmem:[%s2240_s20 + $0x30] sm:$0xff]  ;;  %p2096_p2 = por %p2095_p1, %p2094_p0 }
  0x22   : > { %v283_v47 = vor.u32 %v282_v44, %v278_v34  ;;  %1154 = vmatpush.bf16.msra.mxu2 %v1145_v52  ;;  %v337_v63 = vshrl.u32 %v2275_v32, 16  ;;  %v2018_v8 = vor.u32 %v2017_v6, %v2016_v5  ;;  %v804_v15 = vshll.u32 %v2019_v7, 16  ;;  %v1977_v44 = vld [vmem:[%s2240_s20 + $0x18] sm:$0xff]  ;;  %v1978_v52 = vld [vmem:[%s2240_s20 + $0x20] sm:$0xff] }
  0x23   : > { %v336_v48 = vsel %vm276_vm1, %v331_v43, %v335_v45  ;;  %v312_v0 = vsel %vm276_vm1, %v307_v60, %v311_v29  ;;  %v328_v1 = vsel %vm276_vm1, %v323_v61, %v327_v37  ;;  %v291_v2 = vor.u32 %v289_v62, %v287_v46  ;;  %v2334_v29 = vld [vmem:[%s2240_s20 + $0x18] sm:$0xff]  ;;  %v1979_v60 = vld [vmem:[%s2240_s20 + $0x28] sm:$0xff]  ;;  %v1847_v6 = vld [vmem:[%s2240_s20 + $0x40] sm:$0xf]  ;;  %p2097_p3 = pnand %p2096_p2, %p2092_p13 }
  0x24   : > { %1764 = vmatmul.msk.bf16.vlgmr.msra.gmra.mxu3 %vm340_vm2, %v336_v48  ;;  %v288_v49 = vsel %vm276_vm1, %v283_v47, %v287_v46  ;;  %v339_v3 = vor.u32 %v337_v63, %v335_v45  ;;  %v493_v16 = vrot.slane %v2018_v8, 1  ;;  %v494_v17 = vrot.slane %v2271_v26, 1  ;;  %v2362_v46 = vld [vmem:[%s2240_s20 + $0x28] sm:$0xff]  ;;  %v2390_v62 = vld [vmem:[%s2240_s20 + $0x38] sm:$0xff] }
  0x25   : > { %1758 = vmatmul.msk.bf16.vlgmr.msra.gmra.mxu0 %vm340_vm2, %v288_v49  ;;  %1365 = vmatpush.bf16.msra.mxu3 %v1356_v55  ;;  %v296_v4 = vsel %vm276_vm1, %v291_v2, %v295_v27  ;;  %v802_v18 = vshrl.u32 %v2019_v7, 16  ;;  %v806_v19 = vrot.slane %v804_v15, 1  ;;  %v809_v20 = vshll.u32 %v2321_v9, 16  ;;  %v1975_v27 = vld [vmem:[%s2240_s20 + $0x8] sm:$0xff]  ;;  %v1988_v7 = vld [vmem:[%s2240_s20 + $0x40] sm:$0x10] }
  0x26   : > { %1476 = vmatpush.bf16.msra.mxu0 %v1467_v59  ;;  %v495_v21 = vsel %vm492_vm3, %v493_v16, %v494_v17  ;;  %v496_v30 = vrot.slane %v2243_v10, 1  ;;  %v813_v31 = vshrl.u32 %v2321_v9, 16  ;;  %v817_v33 = vshll.u32 %v2334_v29, 16 }
  0x27   : > { %v807_v22 = vor.u32 %v806_v19, %v802_v18  ;;  %v811_v24 = vrot.slane %v809_v20, 1  ;;  %v498_v39 = vrot.slane %v2246_v11, 1  ;;  %v821_v40 = vshrl.u32 %v2334_v29, 16 }
  0x28   : > { %v497_v34 = vsel %vm492_vm3, %v494_v17, %v496_v30  ;;  %v819_v35 = vrot.slane %v817_v33, 1  ;;  %v825_v41 = vshll.u32 %v2348_v38, 16  ;;  %v500_v47 = vrot.slane %v2249_v12, 1 }
  0x29   : > { %v812_v28 = vsel %vm276_vm1, %v807_v22, %v811_v24  ;;  %v499_v42 = vsel %vm492_vm3, %v496_v30, %v498_v39  ;;  %v829_v48 = vshrl.u32 %v2348_v38, 16  ;;  %v833_v49 = vshll.u32 %v2362_v46, 16  ;;  %v612_v30 = vld [vmem:[%s2240_s20 + $0x40] sm:$0xf] }
  0x2a   : > { %v827_v43 = vrot.slane %v825_v41, 1  ;;  %v501_v50 = vsel %vm492_vm3, %v498_v39, %v500_v47  ;;  %v502_v55 = vrot.slane %v2252_v13, 1  ;;  %v837_v56 = vshrl.u32 %v2362_v46, 16  ;;  %v2023_v41 = vld [vmem:[%s2240_s20 + $0x10] sm:$0xff]  }
  0x2b   : > { %v835_v51 = vrot.slane %v833_v49, 1  ;;  %v841_v57 = vshll.u32 %v2376_v54, 16  ;;  %v504_v63 = vrot.slane %v2255_v14, 1  ;;  %v2405_v8 = vor.u32 %v1988_v7, %v1847_v6  ;;  %v2024_v49 = vld [vmem:[%s2240_s20 + $0x10] sm:$0xf0]  ;;  %v1997_v7 = vld [vmem:[%s2240_s20 + $0x20] sm:$0xff] }
  0x2c   : > { %v503_v58 = vsel %vm492_vm3, %v500_v47, %v502_v55  ;;  %v506_v15 = vrot.slane %v2275_v32, 1  ;;  %v853_v16 = vshrl.u32 %v2390_v62, 16  ;;  %v644_v33 = vunpack.c.l.b16 %v612_v30 }
  0x2d   : > { %v843_v59 = vrot.slane %v841_v57, 1  ;;  %v857_v17 = vshll.u32 %v2405_v8, 16 }
  0x2e   : > { %v507_v18 = vsel %vm492_vm3, %v504_v63, %v506_v15 }
  0x2f   : > { %v859_v20 = vrot.slane %v857_v17, 1 }
  0x30   : > { %1761 = vmatmul.msk.bf16.gmra.mxu1 %vm340_vm2, %v312_v0  ;;  %v845_v0 = vshrl.u32 %v2376_v54, 16 }
  0x31   : > { %1763 = vmatmul.msk.bf16.gmra.mxu2 %vm340_vm2, %v328_v1  ;;  %v849_v1 = vshll.u32 %v2390_v62, 16 }
  0x32   : > { %v847_v2 = vor.u32 %v845_v0, %v843_v59 }
  0x34   : > { %1765 = vmatmul.msk.bf16.gmra.mxu3 %vm340_vm2, %v339_v3  ;;  %v851_v3 = vrot.slane %v849_v1, 1 }
  0x35   : > { %1759 = vmatmul.msk.bf16.gmra.mxu0 %vm340_vm2, %v296_v4  ;;  %v1980_v4 = vld [vmem:[%s2240_s20 + $0x30] sm:$0xff] }
  0x36   : > { %v852_v5 = vsel %vm276_vm1, %v847_v2, %v851_v3  ;;  %v855_v19 = vor.u32 %v853_v16, %v851_v3 }
  0x38   : > { %v860_v32 = vsel %vm276_vm1, %v855_v19, %v859_v20  ;;  %v1284_v19 = vshll.u32 %v1997_v7, 16 }
  0x40   : > { %1766 = vmatmul.msk.bf16.vlgmr.msrb.gmra.mxu1 %vm340_vm2, %v2268_v25  ;;  %v815_v25 = vor.u32 %v813_v31, %v811_v24 }
  0x41   : > { %1775 = vmatmul.msk.bf16.vlgmr.msrb.gmra.mxu2 %vm340_vm2, %v495_v21  ;;  %v1981_v21 = vld [vmem:[%s2240_s20 + $0x38] sm:$0xff] }
  0x42   : > { %v820_v37 = vsel %vm276_vm1, %v815_v25, %v819_v35  ;;  %v861_v25 = vshrl.u32 %v2405_v8, 16 }
  0x44   : > { %1812 = vmatmul.msk.bf16.vlgmr.msrb.gmra.mxu3 %vm340_vm2, %v1975_v27  ;;  %v863_v39 = vor.u32 %v861_v25, %v859_v20 }
  0x45   : > { %1849 = vmatmul.msk.bf16.vlgmr.msrb.gmra.mxu0 %vm340_vm2, %v812_v28 }
  0x50   : > { %1767 = vmatmul.msk.bf16.gmra.mxu1 %vm340_vm2, %v2271_v26  ;;  %v823_v26 = vor.u32 %v821_v40, %v819_v35 }
  0x51   : > { %1776 = vmatmul.msk.bf16.gmra.mxu2 %vm340_vm2, %v497_v34  ;;  %v417_v34 = vpack.c.b16 %v2265_v23, %v2265_v23 }
  0x52   : > { %v828_v45 = vsel %vm276_vm1, %v823_v26, %v827_v43  ;;  %v2021_v26 = vld [vmem:[%s2240_s20 + $0x8] sm:$0xe] }
  0x54   : > { %1813 = vmatmul.msk.bf16.gmra.mxu3 %vm340_vm2, %v1976_v36 }
  0x55   : > { %1850 = vmatmul.msk.bf16.gmra.mxu0 %vm340_vm2, %v820_v37  ;;  %v652_v37 = vpack.c.b16 %v644_v33, %v644_v33 }
  0x60   : > { %1768 = vmatmul.msk.bf16.gmra.mxu1 %vm340_vm2, %v2243_v10  ;;  %v831_v10 = vor.u32 %v829_v48, %v827_v43  ;;  %v1996_v43 = vld [vmem:[%s2240_s20 + $0x18] sm:$0xff] }
  0x61   : > { %1777 = vmatmul.msk.bf16.gmra.mxu2 %vm340_vm2, %v499_v42  ;;  %v2020_v42 = vld [vmem:[%s2240_s20 + $0x8] sm:$0xf0]  ;;  %v1428_v1 = vrot.slane %v1996_v43, 1 }
  0x62   : > { %v836_v53 = vsel %vm276_vm1, %v831_v10, %v835_v51  ;;  %v2022_v47 = vor.u32 %v2021_v26, %v2020_v42  ;;  %v1269_v10 = vshrl.u32 %v2023_v41, 16  ;;  %v1998_v26 = vld [vmem:[%s2240_s20 + $0x28] sm:$0xff] }
  0x64   : > { %1814 = vmatmul.msk.bf16.gmra.mxu3 %vm340_vm2, %v1977_v44  ;;  %v1271_v44 = vshll.u32 %v2023_v41, 16 }
  0x65   : > { %1851 = vmatmul.msk.bf16.gmra.mxu0 %vm340_vm2, %v828_v45 }
  0x70   : > { %1769 = vmatmul.msk.bf16.gmra.mxu1 %vm340_vm2, %v2246_v11  ;;  %v839_v11 = vor.u32 %v837_v56, %v835_v51  ;;  %v1273_v51 = vrot.slane %v1271_v44, 1  ;;  %v961_v56 = vrot.slane %v2321_v9, 1 }
  0x71   : > { %1778 = vmatmul.msk.bf16.gmra.mxu2 %vm340_vm2, %v501_v50  ;;  %v2025_v50 = vld [vmem:[%s2240_s20 + $0x10] sm:$0xe] }
  0x72   : > { %v844_v61 = vsel %vm276_vm1, %v839_v11, %v843_v59  ;;  %v2026_v57 = vor.u32 %v2025_v50, %v2024_v49  ;;  %v1989_v11 = vld [vmem:[%s2240_s20 + $0x10] sm:$0xff]  ;;  %v1274_v59 = vor.u32 %v1273_v51, %v1269_v10  ;;  %v965_v50 = vrot.slane %v2348_v38, 1 }
  0x74   : > { %1815 = vmatmul.msk.bf16.gmra.mxu3 %vm340_vm2, %v1978_v52  ;;  %v1276_v52 = vshll.u32 %v1996_v43, 16  ;;  %v1427_v0 = vrot.slane %v2026_v57, 1 }
  0x75   : > { %1852 = vmatmul.msk.bf16.gmra.mxu0 %vm340_vm2, %v836_v53 }
  0x80   : > { %1770 = vmatmul.msk.bf16.gmra.mxu1 %vm340_vm2, %v2249_v12  ;;  %v505_v12 = vsel %vm492_vm3, %v502_v55, %v504_v63  ;;  %v960_v55 = vrot.slane %v2022_v47, 1  ;;  %v1292_v47 = vshll.u32 %v1998_v26, 16 }
  0x81   : > { %1779 = vmatmul.msk.bf16.gmra.mxu2 %vm340_vm2, %v503_v58 }
  0x82   : > { %v962_v63 = vsel %vm492_vm3, %v960_v55, %v961_v56  ;;  %v1294_v55 = vrot.slane %v1292_v47, 1 }
  0x84   : > { %1816 = vmatmul.msk.bf16.gmra.mxu3 %vm340_vm2, %v1979_v60  ;;  %v1278_v60 = vrot.slane %v1276_v52, 1  ;;  %v1991_v52 = vld [vmem:[%s2240_s20 + $0x20] sm:$0xff] }
  0x85   : > { %1853 = vmatmul.msk.bf16.gmra.mxu0 %vm340_vm2, %v844_v61 }
  0x86   : > { %v1279_v3 = vsel %vm276_vm1, %v1274_v59, %v1278_v60 }
  0x90   : > { %1771 = vmatmul.msk.bf16.gmra.mxu1 %vm340_vm2, %v2252_v13 }
  0x91   : > { %1780 = vmatmul.msk.bf16.gmra.mxu2 %vm340_vm2, %v505_v12 }
  0x94   : > { %1817 = vmatmul.msk.bf16.gmra.mxu3 %vm340_vm2, %v1980_v4  ;;  %v1429_v4 = vsel %vm492_vm3, %v1427_v0, %v1428_v1 }
  0x95   : > { %1854 = vmatmul.msk.bf16.gmra.mxu0 %vm340_vm2, %v852_v5 }
  0x9d   : > { %v2410_v13 = vpop.f32.mrf.mxu1 }
  0xa0   : > { %1772 = vmatmul.msk.bf16.gmra.mxu1 %vm340_vm2, %v2255_v14 }
  0xa1   : > { %1781 = vmatmul.msk.bf16.gmra.mxu2 %vm340_vm2, %v507_v18  ;;  %v1280_v18 = vshrl.u32 %v1996_v43, 16 }
  0xa2   : > { %v378_v22 = vpop.f32.mrf.mxu0 }
  0xa3   : > { %v1282_v30 = vor.u32 %v1280_v18, %v1278_v60 }
  0xa4   : > { %1818 = vmatmul.msk.bf16.gmra.mxu3 %vm340_vm2, %v1981_v21  ;;  %v2419_v24 = vpop.f32.mrf.mxu2  ;;  %v963_v21 = vrot.slane %v2334_v29, 1 }
  0xa5   : > { %1855 = vmatmul.msk.bf16.gmra.mxu0 %vm340_vm2, %v860_v32  ;;  %v390_v27 = vpop.f32.mrf.mxu1 }
  0xa6   : > { %v1990_v27 = vld [vmem:[%s2240_s20 + $0x18] sm:$0xff]  ;;  %v964_v33 = vsel %vm492_vm3, %v961_v56, %v963_v21  ;;  %v966_v57 = vsel %vm492_vm3, %v963_v21, %v965_v50 }
  0xa7   : > { %v2422_v28 = vpop.f32.mrf.mxu3 }
  0xaa   : > { %v380_v31 = vpop.f32.mrf.mxu0 }
  0xab   : > { %v1286_v31 = vrot.slane %v1284_v19, 1 }
  0xac   : > { %v400_v14 = vpop.f32.mrf.mxu2 }
  0xad   : > { %v2428_v35 = vpop.f32.mrf.mxu1 }
  0xaf   : > { %v410_v36 = vpop.f32.mrf.mxu3 }
  0xb0   : > { %1773 = vmatmul.msk.bf16.gmra.mxu1 %vm340_vm2, %v417_v34  ;;  %v1430_v34 = vrot.slane %v1997_v7, 1 }
  0xb1   : > { %1782 = vmatmul.msk.bf16.gmra.mxu2 %vm340_vm2, %v506_v15 }
  0xb2   : > { %v383_v40 = vpop.f32.mrf.mxu0 }
  0xb4   : > { %1819 = vmatmul.msk.bf16.gmra.mxu3 %vm340_vm2, %v652_v37  ;;  %v2436_v23 = vpop.f32.mrf.mxu2  ;;  %v1287_v37 = vsel %vm276_vm1, %v1282_v30, %v1286_v31 }
  0xb5   : > { %1856 = vmatmul.msk.bf16.gmra.mxu0 %vm340_vm2, %v863_v39  ;;  %v395_v45 = vpop.f32.mrf.mxu1  ;;  %v1431_v39 = vsel %vm492_vm3, %v1428_v1, %v1430_v34  ;;  %v1999_v1 = vld [vmem:[%s2240_s20 + $0x30] sm:$0xff] }
  0xb6   : > { %v1288_v45 = vshrl.u32 %v1997_v7, 16 }
  0xb7   : > { %v2440_v48 = vpop.f32.mrf.mxu3 }
  0xba   : > { %v385_v53 = vpop.f32.mrf.mxu0 }
  0xbb   : > { %v1290_v53 = vor.u32 %v1288_v45, %v1286_v31 }
  0xbc   : > { %v405_v58 = vpop.f32.mrf.mxu2 }
  0xbd   : > { %v447_v61 = vpop.f32.mrf.mxu1  ;;  %v1432_v58 = vrot.slane %v1998_v26, 1  ;;  %v1295_v38 = vsel %vm276_vm1, %v1290_v53, %v1294_v55 }
  0xbe   : > { %v448_v2 = vadd.f32 %v447_v61, %v378_v22 }
  0xbf   : > { %v415_v12 = vpop.f32.mrf.mxu3  ;;  %v1433_v61 = vsel %vm492_vm3, %v1430_v34, %v1432_v58 }
  0xc0   : > { %1858 = vmatmul.msk.bf16.vlgmr.msra.gmra.mxu1 %vm340_vm2, %v962_v63 }
  0xc1   : > { %1895 = vmatmul.msk.bf16.vlgmr.msra.gmra.mxu2 %vm340_vm2, %v1989_v11 }
  0xc2   : > { %v900_v9 = vpop.f32.mrf.mxu0 }
  0xc4   : > { %1932 = vmatmul.msk.bf16.vlgmr.msra.gmra.mxu3 %vm340_vm2, %v1279_v3  ;;  %v544_v5 = vpop.f32.mrf.mxu2  ;;  %v1296_v3 = vshrl.u32 %v1998_v26, 16  ;;  %v1993_v26 = vld [vmem:[%s2240_s20 + $0x30] sm:$0xff] }
  0xc5   : > { %1941 = vmatmul.msk.bf16.vlgmr.msra.gmra.mxu0 %vm340_vm2, %v1429_v4  ;;  %v583_v6 = vadd.f32 %v544_v5, %v448_v2  ;;  %v449_v15 = vpop.f32.mrf.mxu1  ;;  %v967_v5 = vrot.slane %v2362_v46, 1 }
  0xc6   : > { %v1992_v15 = vld [vmem:[%s2240_s20 + $0x28] sm:$0xff] }
  0xc7   : > { %v689_v16 = vpop.f32.mrf.mxu3  ;;  %v968_v19 = vsel %vm492_vm3, %v965_v50, %v967_v5 }
  0xc8   : > { %v728_v17 = vadd.f32 %v689_v16, %v583_v6  ;;  %v1298_v16 = vor.u32 %v1296_v3, %v1294_v55 }
  0xca   : > { %v902_v20 = vpop.f32.mrf.mxu0  ;;  %v2455_v22 = vadd.f32 %v900_v9, %v728_v17  ;;  %v1300_v9 = vshll.u32 %v1999_v1, 16 }
  0xcb   : > { %v1434_v20 = vrot.slane %v1999_v1, 1 }
  0xcc   : > { %v546_v32 = vpop.f32.mrf.mxu2  ;;  %v1302_v17 = vrot.slane %v1300_v9, 1 }
  0xcd   : > { %v452_v14 = vpop.f32.mrf.mxu1  ;;  %v1435_v30 = vsel %vm492_vm3, %v1432_v58, %v1434_v20 }
  0xce   : > { %v453_v36 = vadd.f32 %v452_v14, %v383_v40  ;;  %v1303_v46 = vsel %vm276_vm1, %v1298_v16, %v1302_v17 }
  0xcf   : > { %v691_v25 = vpop.f32.mrf.mxu3 }
  0xd0   : > { %1859 = vmatmul.msk.bf16.gmra.mxu1 %vm340_vm2, %v964_v33  ;;  %v2000_v33 = vld [vmem:[%s2240_s20 + $0x38] sm:$0xff] }
  0xd1   : > { %1896 = vmatmul.msk.bf16.gmra.mxu2 %vm340_vm2, %v1990_v27  ;;  %v1436_v47 = vrot.slane %v2000_v33, 1 }
  0xd2   : > { %v905_v29 = vpop.f32.mrf.mxu0 }
  0xd4   : > { %1933 = vmatmul.msk.bf16.gmra.mxu3 %vm340_vm2, %v1287_v37  ;;  %v549_v41 = vpop.f32.mrf.mxu2  ;;  %v1308_v37 = vshll.u32 %v2000_v33, 16 }
  0xd5   : > { %1942 = vmatmul.msk.bf16.gmra.mxu0 %vm340_vm2, %v1431_v39  ;;  %v585_v42 = vadd.f32 %v549_v41, %v453_v36  ;;  %v454_v43 = vpop.f32.mrf.mxu1  ;;  %v1304_v36 = vshrl.u32 %v1999_v1, 16  ;;  %v969_v39 = vrot.slane %v2376_v54, 1  ;;  %v1437_v54 = vsel %vm492_vm3, %v1434_v20, %v1436_v47 }
  0xd7   : > { %v694_v44 = vpop.f32.mrf.mxu3  ;;  %v1306_v43 = vor.u32 %v1304_v36, %v1302_v17  ;;  %v970_v45 = vsel %vm492_vm3, %v967_v5, %v969_v39 }
  0xd8   : > { %v730_v40 = vadd.f32 %v694_v44, %v585_v42  ;;  %v1310_v44 = vrot.slane %v1308_v37, 1 }
  0xda   : > { %v907_v49 = vpop.f32.mrf.mxu0  ;;  %v2467_v10 = vadd.f32 %v905_v29, %v730_v40  ;;  %v1311_v50 = vsel %vm276_vm1, %v1306_v43, %v1310_v44 }
  0xdc   : > { %v551_v51 = vpop.f32.mrf.mxu2 }
  0xdd   : > { %v457_v56 = vpop.f32.mrf.mxu1 }
  0xde   : > { %v458_v59 = vadd.f32 %v457_v56, %v2410_v13  ;;  %v2001_v56 = vld [vmem:[%s2240_s20 + $0x40] sm:$0xff] }
  0xdf   : > { %v696_v11 = vpop.f32.mrf.mxu3  ;;  %v1438_v3 = vrot.slane %v2001_v56, 1 }
  0xe0   : > { %1860 = vmatmul.msk.bf16.gmra.mxu1 %vm340_vm2, %v966_v57 }
  0xe1   : > { %1897 = vmatmul.msk.bf16.gmra.mxu2 %vm340_vm2, %v1991_v52 }
  0xe2   : > { %v910_v60 = vpop.f32.mrf.mxu0 }
  0xe4   : > { %1934 = vmatmul.msk.bf16.gmra.mxu3 %vm340_vm2, %v1295_v38  ;;  %v554_v63 = vpop.f32.mrf.mxu2  ;;  %v1316_v38 = vshll.u32 %v2001_v56, 16 }
  0xe5   : > { %1943 = vmatmul.msk.bf16.gmra.mxu0 %vm340_vm2, %v1433_v61  ;;  %v587_v0 = vadd.f32 %v554_v63, %v458_v59  ;;  %v459_v12 = vpop.f32.mrf.mxu1  ;;  %v1312_v59 = vshrl.u32 %v2000_v33, 16  ;;  %v971_v61 = vrot.slane %v2390_v62, 1  ;;  %v1439_v62 = vsel %vm492_vm3, %v1436_v47, %v1438_v3 }
  0xe6   : > { %v1318_v12 = vrot.slane %v1316_v38, 1 }
  0xe7   : > { %v699_v2 = vpop.f32.mrf.mxu3  ;;  %v1314_v1 = vor.u32 %v1312_v59, %v1310_v44 }
  0xe8   : > { %v732_v13 = vadd.f32 %v699_v2, %v587_v0  ;;  %v1994_v0 = vld [vmem:[%s2240_s20 + $0x38] sm:$0xff] }
  0xea   : > { %v912_v4 = vpop.f32.mrf.mxu0  ;;  %v2480_v6 = vadd.f32 %v910_v60, %v732_v13  ;;  %v972_v13 = vsel %vm492_vm3, %v969_v39, %v971_v61 }
  0xeb   : > { %v1319_v4 = vsel %vm276_vm1, %v1314_v1, %v1318_v12 }
  0xec   : > { %v556_v7 = vpop.f32.mrf.mxu2 }
  0xed   : > { %v462_v18 = vpop.f32.mrf.mxu1  ;;  %v1930_v7 = vld [vmem:[%s2240_s20 + $0x48] sm:$0xf] }
  0xee   : > { %v463_v32 = vadd.f32 %v462_v18, %v2428_v35 }
  0xef   : > { %v701_v21 = vpop.f32.mrf.mxu3 }
  0xf0   : > { %1861 = vmatmul.msk.bf16.gmra.mxu1 %vm340_vm2, %v968_v19 }
  0xf1   : > { %1898 = vmatmul.msk.bf16.gmra.mxu2 %vm340_vm2, %v1992_v15  ;;  %v2002_v15 = vld [vmem:[%s2240_s20 + $0x48] sm:$0x10] }
  0xf2   : > { %v915_v27 = vpop.f32.mrf.mxu0  ;;  %v1931_v19 = vor.u32 %v2002_v15, %v1930_v7  ;;  %v2545_v15 = vld [vmem:[%s2637_s2] ss:$0 sm:$0xff] }
  0xf4   : > { %1935 = vmatmul.msk.bf16.gmra.mxu3 %vm340_vm2, %v1303_v46  ;;  %v559_v31 = vpop.f32.mrf.mxu2  ;;  %v1320_v46 = vshrl.u32 %v2001_v56, 16  ;;  %v1440_v37 = vrot.slane %v1931_v19, 1 }
  0xf5   : > { %1944 = vmatmul.msk.bf16.gmra.mxu0 %vm340_vm2, %v1435_v30  ;;  %v589_v14 = vadd.f32 %v559_v31, %v463_v32  ;;  %v464_v34 = vpop.f32.mrf.mxu1  ;;  %v973_v31 = vrot.slane %v2405_v8, 1 }
  0xf6   : > { %v1995_v34 = vld [vmem:[%s2240_s20 + $0x40] sm:$0xff]  ;;  %v1441_v8 = vsel %vm492_vm3, %v1438_v3, %v1440_v37 }
  0xf7   : > { %v704_v25 = vpop.f32.mrf.mxu3  ;;  %v974_v36 = vsel %vm492_vm3, %v971_v61, %v973_v31 }
  0xf8   : > { %v734_v35 = vadd.f32 %v704_v25, %v589_v14 }
  0xfa   : > { %v917_v29 = vpop.f32.mrf.mxu0  ;;  %v2493_v41 = vadd.f32 %v915_v27, %v734_v35  ;;  %v1324_v27 = vshll.u32 %v1931_v19, 16 }
  0xfc   : > { %v561_v42 = vpop.f32.mrf.mxu2  ;;  %v1326_v25 = vrot.slane %v1324_v27, 1 }
  0xfd   : > { %v467_v40 = vpop.f32.mrf.mxu1 }
  0xfe   : > { %v468_v52 = vadd.f32 %v467_v40, %v2419_v24 }
  0xff   : > { %v706_v49 = vpop.f32.mrf.mxu3 }
 0x100   : > { %1862 = vmatmul.msk.bf16.gmra.mxu1 %vm340_vm2, %v970_v45  ;;  %v1079_v45 = vld [vmem:[%s2240_s20 + $0x48] sm:$0xf]  ;;  %s2560_s20 = scalar_lea.vmem [#allocation3], %s1729_s7 }
 0x101   : > { %1899 = vmatmul.msk.bf16.gmra.mxu2 %vm340_vm2, %v1993_v26  ;;  %s1648_s29 = sshll.u32 %s2560_s20, 4  ;;  %s1649_s29 = int_to_ptr.vmem [resolvable:$true] %s1648_s29 }
 0x102   : > { %v920_v51 = vpop.f32.mrf.mxu0 }
 0x104   : > { %1936 = vmatmul.msk.bf16.gmra.mxu3 %vm340_vm2, %v1311_v50  ;;  %v564_v53 = vpop.f32.mrf.mxu2  ;;  %v1111_v50 = vunpack.c.l.b16 %v1079_v45 }
 0x105   : > { %1945 = vmatmul.msk.bf16.gmra.mxu0 %vm340_vm2, %v1437_v54  ;;  %v591_v55 = vadd.f32 %v564_v53, %v468_v52  ;;  %v469_v57 = vpop.f32.mrf.mxu1  ;;  %v1328_v53 = vshrl.u32 %v1931_v19, 16 }
 0x107   : > { %v709_v58 = vpop.f32.mrf.mxu3 }
 0x108   : > { %v736_v11 = vadd.f32 %v709_v58, %v591_v55  ;;  %v1119_v55 = vpack.c.b16 %v1111_v50, %v1111_v50 }
 0x10a   : > { %v922_v60 = vpop.f32.mrf.mxu0  ;;  %v2506_v63 = vadd.f32 %v920_v51, %v736_v11 }
 0x10c   : > { %v566_v24 = vpop.f32.mrf.mxu2 }
 0x10d   : > { %v472_v2 = vpop.f32.mrf.mxu1 }
 0x10e   : > { %v473_v16 = vadd.f32 %v472_v2, %v2436_v23  ;;  %v1322_v23 = vor.u32 %v1320_v46, %v1318_v12 }
 0x10f   : > { %v711_v9 = vpop.f32.mrf.mxu3 }
 0x110   : > { %1863 = vmatmul.msk.bf16.gmra.mxu1 %vm340_vm2, %v972_v13  ;;  %v1327_v39 = vsel %vm276_vm1, %v1322_v23, %v1326_v25 }
 0x111   : > { %1900 = vmatmul.msk.bf16.gmra.mxu2 %vm340_vm2, %v1994_v0 }
 0x112   : > { %v925_v5 = vpop.f32.mrf.mxu0 }
 0x114   : > { %1937 = vmatmul.msk.bf16.gmra.mxu3 %vm340_vm2, %v1319_v4  ;;  %v569_v17 = vpop.f32.mrf.mxu2 }
 0x115   : > { %1946 = vmatmul.msk.bf16.gmra.mxu0 %vm340_vm2, %v1439_v62  ;;  %v593_v18 = vadd.f32 %v569_v17, %v473_v16  ;;  %v474_v20 = vpop.f32.mrf.mxu1 }
 0x116   : > { %v1567_v20 = vld [vmem:[%s2551_s13] sm:$0xff]  }
 0x117   : > { %v714_v21 = vpop.f32.mrf.mxu3 }
 0x118   : > { %v738_v32 = vadd.f32 %v714_v21, %v593_v18 }
 0x11a   : > { %v927_v30 = vpop.f32.mrf.mxu0  ;;  %v2520_v14 = vadd.f32 %v925_v5, %v738_v32  ;;  %v1568_v32 = vunpack.c.l.bf16 %v1567_v20 }
 0x11c   : > { %v571_v33 = vpop.f32.mrf.mxu2 }
 0x11d   : > { %v477_v35 = vpop.f32.mrf.mxu1 }
 0x11e   : > { %v478_v26 = vadd.f32 %v477_v35, %v2422_v28  ;;  %v1330_v28 = vor.u32 %v1328_v53, %v1326_v25 }
 0x11f   : > { %v716_v29 = vpop.f32.mrf.mxu3 }
 0x120   : > { %1864 = vmatmul.msk.bf16.gmra.mxu1 %vm340_vm2, %v974_v36 }
 0x121   : > { %1901 = vmatmul.msk.bf16.gmra.mxu2 %vm340_vm2, %v1995_v34 }
 0x122   : > { %v930_v42 = vpop.f32.mrf.mxu0 }
 0x124   : > { %1938 = vmatmul.msk.bf16.gmra.mxu3 %vm340_vm2, %v1327_v39  ;;  %v574_v43 = vpop.f32.mrf.mxu2 }
 0x125   : > { %1947 = vmatmul.msk.bf16.gmra.mxu0 %vm340_vm2, %v1441_v8  ;;  %v595_v44 = vadd.f32 %v574_v43, %v478_v26  ;;  %v479_v40 = vpop.f32.mrf.mxu1  ;;  %v1576_v26 = vunpack.c.h.bf16 %v1567_v20 }
 0x127   : > { %v719_v47 = vpop.f32.mrf.mxu3 }
 0x128   : > { %v740_v49 = vadd.f32 %v719_v47, %v595_v44 }
 0x12a   : > { %v932_v51 = vpop.f32.mrf.mxu0  ;;  %v2532_v54 = vadd.f32 %v930_v42, %v740_v49 }
 0x12c   : > { %v576_v52 = vpop.f32.mrf.mxu2 }
 0x12d   : > { %v482_v56 = vpop.f32.mrf.mxu1 }
 0x12e   : > { %v483_v11 = vadd.f32 %v482_v56, %v2440_v48 }
 0x12f   : > { %v721_v57 = vpop.f32.mrf.mxu3 }
 0x130   : > { %1865 = vmatmul.msk.bf16.gmra.mxu1 %vm340_vm2, %v973_v31 }
 0x131   : > { %1902 = vmatmul.msk.bf16.gmra.mxu2 %vm340_vm2, %v1119_v55 }
 0x132   : > { %v935_v58 = vpop.f32.mrf.mxu0 }
 0x134   : > { %1939 = vmatmul.msk.bf16.gmra.mxu3 %vm340_vm2, %v1330_v28  ;;  %v579_v59 = vpop.f32.mrf.mxu2 }
 0x135   : > { %1948 = vmatmul.msk.bf16.gmra.mxu0 %vm340_vm2, %v1440_v37  ;;  %v597_v38 = vadd.f32 %v579_v59, %v483_v11  ;;  %v484_v60 = vpop.f32.mrf.mxu1 }
 0x137   : > { %v724_v61 = vpop.f32.mrf.mxu3 }
 0x138   : > { %v742_v24 = vadd.f32 %v724_v61, %v597_v38 }
 0x13a   : > { %v937_v0 = vpop.f32.mrf.mxu0  ;;  %v2539_v1 = vadd.f32 %v935_v58, %v742_v24 }
 0x13c   : > { %v581_v12 = vpop.f32.mrf.mxu2 }
 0x13d   : > { %v1011_v2 = vpop.f32.mrf.mxu1 }
 0x13e   : > { %v1050_v9 = vadd.f32 %v1011_v2, %v2455_v22 }
 0x13f   : > { %v726_v13 = vpop.f32.mrf.mxu3 }
 0x142   : > { %v1478_v3 = vpop.f32.mrf.mxu0 }
 0x144   : > { %v1156_v48 = vpop.f32.mrf.mxu2 }
 0x145   : > { %v1195_v4 = vadd.f32 %v1156_v48, %v1050_v9  ;;  %v1013_v5 = vpop.f32.mrf.mxu1 }
 0x147   : > { %v1367_v62 = vpop.f32.mrf.mxu3 }
 0x148   : > { %v1406_v7 = vadd.f32 %v1367_v62, %v1195_v4 }
 0x14a   : > { %v1517_v16 = vadd.f32 %v1478_v3, %v1406_v7  ;;  %v1480_v17 = vpop.f32.mrf.mxu0 }
 0x14c   : > { %v1536_v22 = vadd.f32 %v2545_v15, %v1517_v16  ;;  %v1158_v18 = vpop.f32.mrf.mxu2 }
 0x14d   : > { %v1016_v19 = vpop.f32.mrf.mxu1 }
 0x14e   : > { %1551 = vst.msk [vmem:[#allocation2] sm:$0xff] %vm340_vm2, %v1536_v22  ;;  %v1052_v27 = vadd.f32 %v1016_v19, %v2467_v10 }
 0x14f   : > { %v1369_v21 = vpop.f32.mrf.mxu3 }
 0x152   : > { %v1483_v46 = vpop.f32.mrf.mxu0 }
 0x154   : > { %v1161_v30 = vpop.f32.mrf.mxu2 }
 0x155   : > { %v1566_v31 = vld [vmem:[#allocation2] sm:$0xff]  ;;  %v1197_v33 = vadd.f32 %v1161_v30, %v1052_v27  ;;  %v1018_v23 = vpop.f32.mrf.mxu1 }
 0x156   : > { %v1569_v34 = vadd.f32 %v1568_v32, %v1566_v31 }
 0x157   : > { %v1372_v25 = vpop.f32.mrf.mxu3 }
 0x158   : > { %v1570_v35 = vmax.f32 %v1569_v34, 0.0  ;;  %v1408_v36 = vadd.f32 %v1372_v25, %v1197_v33 }
 0x15a   : > { %v1519_v37 = vadd.f32 %v1483_v46, %v1408_v36  ;;  %v1485_v29 = vpop.f32.mrf.mxu0  ;;  %1571 = vst.msk [vmem:[%s2560_s20] sm:$0xff] %vm340_vm2, %v1570_v35 }
 0x15c   : > { %v1538_v39 = vadd.f32 %v2545_v15, %v1519_v37  ;;  %v1163_v10 = vpop.f32.mrf.mxu2 }
 0x15d   : > { %v1021_v42 = vpop.f32.mrf.mxu1 }
 0x15e   : > { %1553 = vst.msk [vmem:[#allocation2 + $0x10] sm:$0xff] %vm340_vm2, %v1538_v39  ;;  %v1054_v44 = vadd.f32 %v1021_v42, %v2480_v6  ;;  %v1951_v6 = vld [vmem:[%s2551_s13 + $0x8] sm:$0xff]  }
 0x15f   : > { %v1374_v8 = vpop.f32.mrf.mxu3  ;;  %v1585_v59 = vunpack.c.l.bf16 %v1951_v6  ;;  %v1594_v16 = vunpack.c.h.bf16 %v1951_v6 }
 0x162   : > { %v1488_v43 = vpop.f32.mrf.mxu0 }
 0x164   : > { %v1166_v40 = vpop.f32.mrf.mxu2 }
 0x165   : > { %v1573_v45 = vld [vmem:[#allocation2 + $0x10] sm:$0xff]  ;;  %v1199_v47 = vadd.f32 %v1166_v40, %v1054_v44  ;;  %v1023_v50 = vpop.f32.mrf.mxu1 }
 0x166   : > { %v1577_v49 = vadd.f32 %v1576_v26, %v1573_v45 }
 0x167   : > { %v1377_v51 = vpop.f32.mrf.mxu3 }
 0x168   : > { %v1578_v52 = vmax.f32 %v1577_v49, 0.0  ;;  %v1410_v53 = vadd.f32 %v1377_v51, %v1199_v47 }
 0x16a   : > { %v1521_v55 = vadd.f32 %v1488_v43, %v1410_v53  ;;  %v1490_v56 = vpop.f32.mrf.mxu0  ;;  %1950 = vst.msk [vmem:[%s2560_s20 + $0x8] sm:$0xff] %vm340_vm2, %v1578_v52 }
 0x16c   : > { %v1540_v57 = vadd.f32 %v2545_v15, %v1521_v55  ;;  %v1168_v28 = vpop.f32.mrf.mxu2 }
 0x16d   : > { %v1026_v58 = vpop.f32.mrf.mxu1 }
 0x16e   : > { %1555 = vst.msk [vmem:[#allocation2 + $0x20] sm:$0xff] %vm340_vm2, %v1540_v57  ;;  %v1056_v60 = vadd.f32 %v1026_v58, %v2493_v41 }
 0x16f   : > { %v1379_v11 = vpop.f32.mrf.mxu3 }
 0x172   : > { %v1493_v38 = vpop.f32.mrf.mxu0 }
 0x174   : > { %v1171_v61 = vpop.f32.mrf.mxu2 }
 0x175   : > { %v1582_v24 = vld [vmem:[#allocation2 + $0x20] sm:$0xff]  ;;  %v1201_v0 = vadd.f32 %v1171_v61, %v1056_v60  ;;  %v1028_v2 = vpop.f32.mrf.mxu1 }
 0x176   : > { %v1586_v12 = vadd.f32 %v1585_v59, %v1582_v24 }
 0x177   : > { %v1382_v13 = vpop.f32.mrf.mxu3 }
 0x178   : > { %v1587_v3 = vmax.f32 %v1586_v12, 0.0  ;;  %v1412_v9 = vadd.f32 %v1382_v13, %v1201_v0 }
 0x17a   : > { %v1523_v48 = vadd.f32 %v1493_v38, %v1412_v9  ;;  %v1495_v4 = vpop.f32.mrf.mxu0  ;;  %1952 = vst.msk [vmem:[%s2560_s20 + $0x10] sm:$0xff] %vm340_vm2, %v1587_v3 }
 0x17c   : > { %v1542_v5 = vadd.f32 %v2545_v15, %v1523_v48  ;;  %v1173_v62 = vpop.f32.mrf.mxu2 }
 0x17d   : > { %v1031_v7 = vpop.f32.mrf.mxu1 }
 0x17e   : > { %1557 = vst.msk [vmem:[#allocation2 + $0x30] sm:$0xff] %vm340_vm2, %v1542_v5  ;;  %v1058_v22 = vadd.f32 %v1031_v7, %v2506_v63  ;;  %v1955_v63 = vld [vmem:[%s2551_s13 + $0x10] sm:$0xff]  }
 0x17f   : > { %v1384_v41 = vpop.f32.mrf.mxu3  ;;  %v1603_v36 = vunpack.c.l.bf16 %v1955_v63  ;;  %v1612_v52 = vunpack.c.h.bf16 %v1955_v63 }
 0x182   : > { %v1498_v17 = vpop.f32.mrf.mxu0 }
 0x184   : > { %v1176_v18 = vpop.f32.mrf.mxu2 }
 0x185   : > { %v1591_v19 = vld [vmem:[#allocation2 + $0x30] sm:$0xff]  ;;  %v1203_v20 = vadd.f32 %v1176_v18, %v1058_v22  ;;  %v1033_v32 = vpop.f32.mrf.mxu1 }
 0x186   : > { %v1595_v21 = vadd.f32 %v1594_v16, %v1591_v19 }
 0x187   : > { %v1387_v46 = vpop.f32.mrf.mxu3 }
 0x188   : > { %v1596_v27 = vmax.f32 %v1595_v21, 0.0  ;;  %v1414_v30 = vadd.f32 %v1387_v46, %v1203_v20 }
 0x18a   : > { %v1525_v31 = vadd.f32 %v1498_v17, %v1414_v30  ;;  %v1500_v33 = vpop.f32.mrf.mxu0  ;;  %1954 = vst.msk [vmem:[%s2560_s20 + $0x18] sm:$0xff] %vm340_vm2, %v1596_v27 }
 0x18c   : > { %v1544_v34 = vadd.f32 %v2545_v15, %v1525_v31  ;;  %v1178_v23 = vpop.f32.mrf.mxu2 }
 0x18d   : > { %v1036_v25 = vpop.f32.mrf.mxu1 }
 0x18e   : > { %1559 = vst.msk [vmem:[#allocation2 + $0x40] sm:$0xff] %vm340_vm2, %v1544_v34  ;;  %v1060_v29 = vadd.f32 %v1036_v25, %v2520_v14 }
 0x18f   : > { %v1389_v35 = vpop.f32.mrf.mxu3 }
 0x192   : > { %v1503_v37 = vpop.f32.mrf.mxu0 }
 0x194   : > { %v1181_v39 = vpop.f32.mrf.mxu2 }
 0x195   : > { %v1600_v10 = vld [vmem:[#allocation2 + $0x40] sm:$0xff]  ;;  %v1205_v42 = vadd.f32 %v1181_v39, %v1060_v29  ;;  %v1038_v26 = vpop.f32.mrf.mxu1 }
 0x196   : > { %v1604_v8 = vadd.f32 %v1603_v36, %v1600_v10 }
 0x197   : > { %v1392_v43 = vpop.f32.mrf.mxu3 }
 0x198   : > { %v1605_v44 = vmax.f32 %v1604_v8, 0.0  ;;  %v1416_v40 = vadd.f32 %v1392_v43, %v1205_v42 }
 0x19a   : > { %v1527_v45 = vadd.f32 %v1503_v37, %v1416_v40  ;;  %v1505_v47 = vpop.f32.mrf.mxu0  ;;  %1956 = vst.msk [vmem:[%s2560_s20 + $0x20] sm:$0xff] %vm340_vm2, %v1605_v44 }
 0x19c   : > { %v1546_v49 = vadd.f32 %v2545_v15, %v1527_v45  ;;  %v1183_v50 = vpop.f32.mrf.mxu2 }
 0x19d   : > { %v1041_v51 = vpop.f32.mrf.mxu1 }
 0x19e   : > { %1561 = vst.msk [vmem:[#allocation2 + $0x50] sm:$0xff] %vm340_vm2, %v1546_v49  ;;  %v1062_v55 = vadd.f32 %v1041_v51, %v2532_v54  ;;  %v1959_v54 = vld [vmem:[%s2551_s13 + $0x18] sm:$0xff]  }
 0x19f   : > { %v1394_v14 = vpop.f32.mrf.mxu3  ;;  %v1621_v13 = vunpack.c.l.bf16 %v1959_v54  ;;  %v1630_v21 = vunpack.c.h.bf16 %v1959_v54 }
 0x1a2   : > { %v1508_v53 = vpop.f32.mrf.mxu0 }
 0x1a4   : > { %v1186_v56 = vpop.f32.mrf.mxu2 }
 0x1a5   : > { %v1609_v57 = vld [vmem:[#allocation2 + $0x50] sm:$0xff]  ;;  %v1207_v28 = vadd.f32 %v1186_v56, %v1062_v55  ;;  %v1043_v6 = vpop.f32.mrf.mxu1 }
 0x1a6   : > { %v1613_v58 = vadd.f32 %v1612_v52, %v1609_v57 }
 0x1a7   : > { %v1397_v11 = vpop.f32.mrf.mxu3 }
 0x1a8   : > { %v1614_v59 = vmax.f32 %v1613_v58, 0.0  ;;  %v1418_v38 = vadd.f32 %v1397_v11, %v1207_v28 }
 0x1aa   : > { %v1529_v60 = vadd.f32 %v1508_v53, %v1418_v38  ;;  %v1510_v61 = vpop.f32.mrf.mxu0  ;;  %1958 = vst.msk [vmem:[%s2560_s20 + $0x28] sm:$0xff] %vm340_vm2, %v1614_v59 }
 0x1ac   : > { %v1548_v24 = vadd.f32 %v2545_v15, %v1529_v60  ;;  %v1188_v0 = vpop.f32.mrf.mxu2 }
 0x1ad   : > { %v1046_v12 = vpop.f32.mrf.mxu1 }
 0x1ae   : > { %1563 = vst.msk [vmem:[#allocation2 + $0x60] sm:$0xff] %vm340_vm2, %v1548_v24  ;;  %v1064_v9 = vadd.f32 %v1046_v12, %v2539_v1 }
 0x1af   : > { %v1399_v2 = vpop.f32.mrf.mxu3 }
 0x1b2   : > { %v1513_v3 = vpop.f32.mrf.mxu0 }
 0x1b4   : > { %v1191_v48 = vpop.f32.mrf.mxu2 }
 0x1b5   : > { %v1618_v4 = vld [vmem:[#allocation2 + $0x60] sm:$0xff]  ;;  %v1209_v5 = vadd.f32 %v1191_v48, %v1064_v9  ;;  %v1048_v7 = vpop.f32.mrf.mxu1 }
 0x1b6   : > { %v1622_v62 = vadd.f32 %v1621_v13, %v1618_v4 }
 0x1b7   : > { %v1402_v41 = vpop.f32.mrf.mxu3 }
 0x1b8   : > { %v1623_v16 = vmax.f32 %v1622_v62, 0.0  ;;  %v1420_v17 = vadd.f32 %v1402_v41, %v1209_v5 }
 0x1ba   : > { %v1531_v22 = vadd.f32 %v1513_v3, %v1420_v17  ;;  %v1515_v18 = vpop.f32.mrf.mxu0  ;;  %1960 = vst.msk [vmem:[%s2560_s20 + $0x30] sm:$0xff] %vm340_vm2, %v1623_v16 }
 0x1bc   : > { %v1550_v19 = vadd.f32 %v2545_v15, %v1531_v22  ;;  %v1193_v20 = vpop.f32.mrf.mxu2 }
 0x1be   : > { %1565 = vst.msk [vmem:[#allocation2 + $0x70] sm:$0xff] %vm340_vm2, %v1550_v19 }
 0x1bf   : > { %v1404_v1 = vpop.f32.mrf.mxu3 }
 0x1c5   : > { %v1627_v32 = vld [vmem:[#allocation2 + $0x70] sm:$0xff] }
 0x1c6   : > { %v1631_v46 = vadd.f32 %v1630_v21, %v1627_v32 }
 0x1c8   : > { %v1632_v27 = vmax.f32 %v1631_v46, 0.0 }
 0x1ca   : > { %1962 = vst.msk [vmem:[%s2560_s20 + $0x38] sm:$0xff] %vm340_vm2, %v1632_v27 }
 0x1cb   : > { %2100 = shalt.err (!%p2097_p3)
}
 0x1cc   : > { %s2137_s13 = smov 128   ;;  %s2138_s14 = smov 8  }
 0x1cd   : > { %2031 = dma.vmem_to_hbm [thread:$0]  (%p2202_p5), %s1649_s29, 1024, %s1651_s30, %s1636_s5, %s2137_s13, %s2137_s13, %s2138_s14  }
 0x1ce PF: > { %p2037_p4 = scmp.ge.s32.totalorder %s2135_s18, 2  ;;  %s1665_s7 = sand.u32 1, %s2123_s15  }
 0x1cf   : > { %s1666_s20 = scalar_lea.sflag [#allocation4], %s1665_s7 }
 0x1d0   : > { %p2034_p7 = pnand %p2037_p4, %p2206_p6 }
 0x1d2   : > { %p2035_p8 = pneg %p2034_p7 }
 0x1d4   : > { %2118 = dma.done.wait (%p2035_p8), %s1666_s20, 1024  }
 0x1d5   : > { %2120 = vsyncadd (%p2035_p8), %s1666_s20, 4294966272  ;;  %p14_p9 = scmp.ge.s32.totalorder %s2189_s21, 4   ;;  %s2642_s15 = smov %s2127_s16 }
 0x1d6   : > { %s2643_s16 = smov %s2131_s17  ;;  %s2644_s17 = smov %s2200_s24 }
 0x1d7   : > { %s2645_s18 = smov %s2189_s21  ;;  %16 = sbr.rel (!%p14_p9) target bundleno = 3 (0x3), region = 103 }
 0x1dc   :  { %1672 = vsyncpa [#allocation4], 1 }
 0x1dd   :  { %1674 = vsyncpa [#allocation4 + $0x1], 1 }

</bundles_post_ra>
